<compile_context>
chip_gen: v7x
topology: tpu7x:2x2x1
jax: 0.10.0
libtpu: 0.0.40
codegen_flags: <defaults>
</compile_context>

<pallas_src>
import jax
import jax.numpy as jnp
from jax.experimental import pallas as pl
from jax.experimental.pallas import tpu as pltpu


def _decoder_block_kernel(x_ref, w_ref, scale_ref, bias_ref, out_ref, xpad_ref):
    # x_ref:     (Bn, H, W, Cin)        unpadded NHWC input tile
    # w_ref:     (4, 4*Cin, Cout)       fused tap weights, row = 2*ry + rx
    # scale_ref: (1, Cout)              folded BN scale (gamma / sqrt(var+eps))
    # bias_ref:  (1, Cout)              folded BN bias  (beta - mean*scale)
    # out_ref:   (Bn, H, 1, W, 2*Cout)  out[b,m,0,p,rx*Cout+c] = y[b,2m+ry,2p+rx,c]
    # xpad_ref:  (Bn, H+2, W+2, Cin)    VMEM scratch: zero-padded input (halo)
    bn, h, w, cin = x_ref.shape
    cout = scale_ref.shape[1]
    ry = pl.program_id(1)                       # output row parity for this step

    # Build the zero-padded tile in VMEM (no HBM pad copy in the wrapper).
    xpad_ref[...] = jnp.zeros(xpad_ref.shape, xpad_ref.dtype)
    xpad_ref[:, 1:h + 1, 1:w + 1, :] = x_ref[...]

    scale = scale_ref[...].astype(jnp.float32)  # (1, Cout) lane-dense
    bias = bias_ref[...].astype(jnp.float32)

    m_rows = bn * h * w
    ys = []
    for rx in (0, 1):                           # both column parities this step
        # im2col of the 2x2 tap window for parity (ry, rx): LHS is (M, 4*Cin).
        parts = []
        for dy in (0, 1):
            for dx in (0, 1):
                patch = xpad_ref[:, pl.ds(ry + dy, h), pl.ds(rx + dx, w), :]
                parts.append(patch.reshape(m_rows, cin))
        lhs = jnp.concatenate(parts, axis=-1)                       # (M, 4*Cin)
        acc = jnp.dot(lhs, w_ref[2 * ry + rx],                      # one MXU matmul, K=4*Cin
                      preferred_element_type=jnp.float32)           # (M, Cout) f32
        ys.append(jnp.maximum(acc * scale + bias, 0.0).astype(out_ref.dtype))

    # Dense (W sublanes x 2*Cout lanes) store of both column parities at once.
    out_ref[...] = jnp.concatenate(ys, axis=-1).reshape(bn, h, 1, w, 2 * cout)


def decoder_block(x, weight, gamma, beta, running_mean, running_var,
                  *, eps=1e-5, block_n=None):
    """Fused ConvTranspose2d(k=4, s=2, p=1, bias=False) + BatchNorm2d(eval) + ReLU.

    x:      (N, Cin, H, W)      NCHW, as in the PyTorch module
    weight: (Cin, Cout, 4, 4)   PyTorch ConvTranspose2d weight layout
    gamma, beta, running_mean, running_var: (Cout,)
    returns (N, Cout, 2H, 2W)
    """
    n, cin, h, w = x.shape
    cin_w, cout, kh, kw = weight.shape
    assert cin_w == cin and (kh, kw) == (4, 4), "kernel assumes k=4, s=2, p=1"

    # ---- layout plumbing (XLA): NCHW -> NHWC (kernel pads in VMEM) ---------
    x_nhwc = jnp.transpose(x, (0, 2, 3, 1))                       # (N, H, W, Cin)

    # ---- fused tap weights: one (4*Cin, Cout) RHS per output parity --------
    w_t = jnp.transpose(weight, (2, 3, 0, 1))                     # (4, 4, Cin, Cout)
    blocks = []
    for ry in (0, 1):
        for rx in (0, 1):
            parts = [w_t[3 - 2 * dy - ry, 3 - 2 * dx - rx]
                     for dy in (0, 1) for dx in (0, 1)]
            blocks.append(jnp.concatenate(parts, axis=0))         # (4*Cin, Cout)
    wfused = jnp.stack(blocks, axis=0).astype(x.dtype)            # (4, 4*Cin, Cout)

    # ---- fold eval-mode BatchNorm into a lane-dense per-channel affine -----
    inv_std = jax.lax.rsqrt(running_var.astype(jnp.float32) + eps)
    scale = (gamma.astype(jnp.float32) * inv_std).reshape(1, cout)
    bias = (beta.astype(jnp.float32)
            - running_mean.astype(jnp.float32) * gamma.astype(jnp.float32) * inv_std
            ).reshape(1, cout)

    # ---- VMEM budget / tile sizing ------------------------------------------
    try:
        vmem_cap = int(pltpu.get_tpu_info().vmem_capacity_bytes)
    except Exception:
        vmem_cap = 64 * 1024 * 1024                               # v7x-safe fallback
    vmem_limit = min(100 * 1024 * 1024, (3 * vmem_cap) // 4)      # ~48MiB v7x, ~96MiB v5e/v6e
    budget = (3 * vmem_limit) // 4                                # headroom for Mosaic scratch

    itemsize = jnp.dtype(x.dtype).itemsize
    fixed = 2 * 16 * cin * cout * itemsize + 4 * 2 * cout * 4     # weight tile + scale/bias
    per_n = ((h * w * cin * (2 + 8)                               # input (dbuf) + patches + lhs
              + (h + 2) * (w + 2) * cin                           # pad scratch
              + h * w * 2 * cout * 2) * itemsize                  # output tile (dbuf)
             + h * w * cout * 4 * 4)                              # f32 accs + concat result
    if block_n is None:
        block_n = max(1, min(n, (budget - fixed) // max(1, per_n)))
        while n % block_n:                                        # keep the grid exact
            block_n -= 1
    # grid axis 1 = output row parity ry -> >= 2 parallel steps even when N == 1
    grid = (n // block_n, 2)

    out = pl.pallas_call(
        _decoder_block_kernel,
        out_shape=jax.ShapeDtypeStruct((n, h, 2, w, 2 * cout), x.dtype),
        grid_spec=pltpu.PrefetchScalarGridSpec(
            num_scalar_prefetch=0,
            grid=grid,
            in_specs=[
                pl.BlockSpec((block_n, h, w, cin), lambda i, r: (i, 0, 0, 0)),
                pl.BlockSpec((4, 4 * cin, cout), lambda i, r: (0, 0, 0)),
                pl.BlockSpec((1, cout), lambda i, r: (0, 0)),
                pl.BlockSpec((1, cout), lambda i, r: (0, 0)),
            ],
            out_specs=pl.BlockSpec((block_n, h, 1, w, 2 * cout),
                                   lambda i, r: (i, 0, r, 0, 0)),
            scratch_shapes=[pltpu.VMEM((block_n, h + 2, w + 2, cin), x.dtype)],
        ),
        compiler_params=pltpu.CompilerParams(
            dimension_semantics=("parallel", "parallel"),
            vmem_limit_bytes=vmem_limit,
        ),
    )(x_nhwc, wfused, scale, bias)

    # (N, H, 2, W, 2*Cout) -> (N, 2H, 2W, Cout) is a FREE reshape (verified
    # index-exact); a single NHWC -> NCHW transpose finishes the job.
    out = out.reshape(n, 2 * h, 2 * w, cout)
    return jnp.transpose(out, (0, 3, 1, 2))


def _reference(x, weight, gamma, beta, running_mean, running_var, eps=1e-5):
    # ConvTranspose2d(k, s=2, p=1) == dilated conv with the flipped, transposed kernel.
    k = weight.shape[2]
    w_reg = jnp.transpose(weight[:, :, ::-1, ::-1], (1, 0, 2, 3))       # (Cout, Cin, k, k)
    z = jax.lax.conv_general_dilated(
        x, w_reg,
        window_strides=(1, 1),
        padding=((k - 2, k - 2), (k - 2, k - 2)),                       # k - 1 - p, p = 1
        lhs_dilation=(2, 2),
        dimension_numbers=("NCHW", "OIHW", "NCHW"),
        precision=jax.lax.Precision.HIGHEST)
    inv_std = jax.lax.rsqrt(running_var + eps)
    z = (z - running_mean[None, :, None, None]) * inv_std[None, :, None, None]
    z = z * gamma[None, :, None, None] + beta[None, :, None, None]
    return jnp.maximum(z, 0.0)


if __name__ == "__main__":
    # Small shapes consistent with the module: decoder halves channels, doubles spatial.
    N, Cin, Cout, H, W = 2, 8, 4, 16, 16

    key = jax.random.PRNGKey(0)
    kx, kw, kg, kb, km, kv = jax.random.split(key, 6)

    x = jax.random.normal(kx, (N, Cin, H, W), dtype=jnp.float32)
    weight = jax.random.normal(kw, (Cin, Cout, 4, 4), dtype=jnp.float32) * 0.1
    gamma = 1.0 + 0.1 * jax.random.normal(kg, (Cout,), dtype=jnp.float32)
    beta = 0.1 * jax.random.normal(kb, (Cout,), dtype=jnp.float32)
    running_mean = 0.1 * jax.random.normal(km, (Cout,), dtype=jnp.float32)
    running_var = jax.random.uniform(kv, (Cout,), dtype=jnp.float32,
                                     minval=0.5, maxval=1.5)

    y = decoder_block(x, weight, gamma, beta, running_mean, running_var)
    y = jax.block_until_ready(y)

    y_ref = _reference(x, weight, gamma, beta, running_mean, running_var)
    assert y.shape == (N, Cout, 2 * H, 2 * W), y.shape
    err = float(jnp.max(jnp.abs(y - y_ref)))
    # Kernel uses default MXU precision (per perf review: HIGHEST dropped);
    # tolerance sized for the bf16-pass matmul vs the HIGHEST-precision reference.
    assert jnp.allclose(y, y_ref, atol=2e-2, rtol=2e-2), (
        "mismatch vs reference, max abs err = %e" % err)

    print("KERNEL_OK")
</pallas_src>

<mosaic_0001>
module attributes {stable_mosaic.version = 11 : i64} {
  func.func @_decoder_block_kernel(%arg0: i32, %arg1: i32, %arg2: memref<2x16x16x8xf32, #tpu.memory_space<vmem>>, %arg3: memref<4x32x4xf32, #tpu.memory_space<vmem>>, %arg4: memref<1x4xf32, #tpu.memory_space<vmem>>, %arg5: memref<1x4xf32, #tpu.memory_space<vmem>>, %arg6: memref<2x16x1x16x8xf32, #tpu.memory_space<vmem>>, %arg7: memref<2x18x18x8xf32, #tpu.memory_space<vmem>>) attributes {dimension_semantics = [#tpu.dimension_semantics<parallel>, #tpu.dimension_semantics<parallel>], iteration_bounds = array<i64: 1, 2>, scalar_prefetch = 0 : i64, scratch_operands = 1 : i64, tpu.core_type = #tpu.core_type<tc>, window_params = [{transform_indices = @transform_0, window_bounds = array<i64: 2, 16, 16, 8>}, {pipeline_mode = #tpu.pipeline_mode<synchronous>, transform_indices = @transform_1, window_bounds = array<i64: 4, 32, 4>}, {pipeline_mode = #tpu.pipeline_mode<synchronous>, transform_indices = @transform_2, window_bounds = array<i64: 1, 4>}, {pipeline_mode = #tpu.pipeline_mode<synchronous>, transform_indices = @transform_3, window_bounds = array<i64: 1, 4>}, {transform_indices = @transform_4, window_bounds = array<i64: 2, 16, 1, 16, 8>}]} {
    %cst = arith.constant 0.000000e+00 : f32
    %0 = vector.broadcast %cst : f32 to vector<2x18x18x8xf32>
    %c0 = arith.constant 0 : index
    %c0_0 = arith.constant 0 : index
    %c0_1 = arith.constant 0 : index
    %c0_2 = arith.constant 0 : index
    %1 = vector.load %arg7[%c0, %c0_0, %c0_1, %c0_2] : memref<2x18x18x8xf32, #tpu.memory_space<vmem>>, vector<2x18x18x8xf32>
    tpu.vector_store %arg7[%c0, %c0_0, %c0_1, %c0_2], %0 {strides = array<i32>} : memref<2x18x18x8xf32, #tpu.memory_space<vmem>>, vector<2x18x18x8xf32>,
    %c0_3 = arith.constant 0 : index
    %c0_4 = arith.constant 0 : index
    %c0_5 = arith.constant 0 : index
    %c0_6 = arith.constant 0 : index
    %2 = vector.load %arg2[%c0_3, %c0_4, %c0_5, %c0_6] : memref<2x16x16x8xf32, #tpu.memory_space<vmem>>, vector<2x16x16x8xf32>
    %c0_7 = arith.constant 0 : index
    %c1 = arith.constant 1 : index
    %c1_8 = arith.constant 1 : index
    %c0_9 = arith.constant 0 : index
    %3 = vector.load %arg7[%c0_7, %c1, %c1_8, %c0_9] : memref<2x18x18x8xf32, #tpu.memory_space<vmem>>, vector<2x16x16x8xf32>
    tpu.vector_store %arg7[%c0_7, %c1, %c1_8, %c0_9], %2 {strides = array<i32>} : memref<2x18x18x8xf32, #tpu.memory_space<vmem>>, vector<2x16x16x8xf32>,
    %c0_10 = arith.constant 0 : index
    %c0_11 = arith.constant 0 : index
    %4 = vector.load %arg4[%c0_10, %c0_11] : memref<1x4xf32, #tpu.memory_space<vmem>>, vector<1x4xf32>
    %c0_12 = arith.constant 0 : index
    %c0_13 = arith.constant 0 : index
    %5 = vector.load %arg5[%c0_12, %c0_13] : memref<1x4xf32, #tpu.memory_space<vmem>>, vector<1x4xf32>
    %c0_i32 = arith.constant 0 : i32
    %6 = arith.addi %arg1, %c0_i32 : i32
    %c0_14 = arith.constant 0 : index
    %7 = arith.index_cast %6 : i32 to index
    %c0_15 = arith.constant 0 : index
    %c0_16 = arith.constant 0 : index
    %8 = vector.load %arg7[%c0_14, %7, %c0_15, %c0_16] : memref<2x18x18x8xf32, #tpu.memory_space<vmem>>, vector<2x16x16x8xf32>
    %9 = vector.shape_cast %8 : vector<2x16x16x8xf32> to vector<512x8xf32>
    %c0_i32_17 = arith.constant 0 : i32
    %10 = arith.addi %arg1, %c0_i32_17 : i32
    %c0_18 = arith.constant 0 : index
    %11 = arith.index_cast %10 : i32 to index
    %c1_19 = arith.constant 1 : index
    %c0_20 = arith.constant 0 : index
    %12 = vector.load %arg7[%c0_18, %11, %c1_19, %c0_20] : memref<2x18x18x8xf32, #tpu.memory_space<vmem>>, vector<2x16x16x8xf32>
    %13 = vector.shape_cast %12 : vector<2x16x16x8xf32> to vector<512x8xf32>
    %c1_i32 = arith.constant 1 : i32
    %14 = arith.addi %arg1, %c1_i32 : i32
    %c0_21 = arith.constant 0 : index
    %15 = arith.index_cast %14 : i32 to index
    %c0_22 = arith.constant 0 : index
    %c0_23 = arith.constant 0 : index
    %16 = vector.load %arg7[%c0_21, %15, %c0_22, %c0_23] : memref<2x18x18x8xf32, #tpu.memory_space<vmem>>, vector<2x16x16x8xf32>
    %17 = vector.shape_cast %16 : vector<2x16x16x8xf32> to vector<512x8xf32>
    %c1_i32_24 = arith.constant 1 : i32
    %18 = arith.addi %arg1, %c1_i32_24 : i32
    %c0_25 = arith.constant 0 : index
    %19 = arith.index_cast %18 : i32 to index
    %c1_26 = arith.constant 1 : index
    %c0_27 = arith.constant 0 : index
    %20 = vector.load %arg7[%c0_25, %19, %c1_26, %c0_27] : memref<2x18x18x8xf32, #tpu.memory_space<vmem>>, vector<2x16x16x8xf32>
    %21 = vector.shape_cast %20 : vector<2x16x16x8xf32> to vector<512x8xf32>
    %22 = tpu.concatenate %9, %13, %17, %21 in 1 : vector<512x8xf32>, vector<512x8xf32>, vector<512x8xf32>, vector<512x8xf32> -> vector<512x32xf32>
    %c2_i32 = arith.constant 2 : i32
    %23 = arith.muli %c2_i32, %arg1 : i32
    %c0_i32_28 = arith.constant 0 : i32
    %24 = arith.addi %23, %c0_i32_28 : i32
    %25 = arith.index_cast %24 : i32 to index
    %c0_29 = arith.constant 0 : index
    %c0_30 = arith.constant 0 : index
    %26 = vector.load %arg3[%25, %c0_29, %c0_30] : memref<4x32x4xf32, #tpu.memory_space<vmem>>, vector<1x32x4xf32>
    %27 = vector.shape_cast %26 : vector<1x32x4xf32> to vector<32x4xf32>
    %cst_31 = arith.constant dense<0.000000e+00> : vector<512x4xf32>
    %28 = tpu.matmul %22, %27, %cst_31 {dimension_numbers = #tpu.dot_dimension_numbers<[1], [0], [0], [1], [0, 0, 1, 1], [], []>} : vector<512x32xf32>, vector<32x4xf32>, vector<512x4xf32> -> vector<512x4xf32>
    %29 = vector.broadcast %4 : vector<1x4xf32> to vector<512x4xf32>
    %30 = arith.mulf %28, %29 : vector<512x4xf32>
    %31 = vector.broadcast %5 : vector<1x4xf32> to vector<512x4xf32>
    %32 = arith.addf %30, %31 : vector<512x4xf32>
    %cst_32 = arith.constant 0.000000e+00 : f32
    %33 = vector.broadcast %cst_32 : f32 to vector<512x4xf32>
    %34 = arith.maximumf %32, %33 : vector<512x4xf32>
    %c0_i32_33 = arith.constant 0 : i32
    %35 = arith.addi %arg1, %c0_i32_33 : i32
    %c0_34 = arith.constant 0 : index
    %36 = arith.index_cast %35 : i32 to index
    %c1_35 = arith.constant 1 : index
    %c0_36 = arith.constant 0 : index
    %37 = vector.load %arg7[%c0_34, %36, %c1_35, %c0_36] : memref<2x18x18x8xf32, #tpu.memory_space<vmem>>, vector<2x16x16x8xf32>
    %38 = vector.shape_cast %37 : vector<2x16x16x8xf32> to vector<512x8xf32>
    %c0_i32_37 = arith.constant 0 : i32
    %39 = arith.addi %arg1, %c0_i32_37 : i32
    %c0_38 = arith.constant 0 : index
    %40 = arith.index_cast %39 : i32 to index
    %c2 = arith.constant 2 : index
    %c0_39 = arith.constant 0 : index
    %41 = vector.load %arg7[%c0_38, %40, %c2, %c0_39] : memref<2x18x18x8xf32, #tpu.memory_space<vmem>>, vector<2x16x16x8xf32>
    %42 = vector.shape_cast %41 : vector<2x16x16x8xf32> to vector<512x8xf32>
    %c1_i32_40 = arith.constant 1 : i32
    %43 = arith.addi %arg1, %c1_i32_40 : i32
    %c0_41 = arith.constant 0 : index
    %44 = arith.index_cast %43 : i32 to index
    %c1_42 = arith.constant 1 : index
    %c0_43 = arith.constant 0 : index
    %45 = vector.load %arg7[%c0_41, %44, %c1_42, %c0_43] : memref<2x18x18x8xf32, #tpu.memory_space<vmem>>, vector<2x16x16x8xf32>
    %46 = vector.shape_cast %45 : vector<2x16x16x8xf32> to vector<512x8xf32>
    %c1_i32_44 = arith.constant 1 : i32
    %47 = arith.addi %arg1, %c1_i32_44 : i32
    %c0_45 = arith.constant 0 : index
    %48 = arith.index_cast %47 : i32 to index
    %c2_46 = arith.constant 2 : index
    %c0_47 = arith.constant 0 : index
    %49 = vector.load %arg7[%c0_45, %48, %c2_46, %c0_47] : memref<2x18x18x8xf32, #tpu.memory_space<vmem>>, vector<2x16x16x8xf32>
    %50 = vector.shape_cast %49 : vector<2x16x16x8xf32> to vector<512x8xf32>
    %51 = tpu.concatenate %38, %42, %46, %50 in 1 : vector<512x8xf32>, vector<512x8xf32>, vector<512x8xf32>, vector<512x8xf32> -> vector<512x32xf32>
    %c2_i32_48 = arith.constant 2 : i32
    %52 = arith.muli %c2_i32_48, %arg1 : i32
    %c1_i32_49 = arith.constant 1 : i32
    %53 = arith.addi %52, %c1_i32_49 : i32
    %54 = arith.index_cast %53 : i32 to index
    %c0_50 = arith.constant 0 : index
    %c0_51 = arith.constant 0 : index
    %55 = vector.load %arg3[%54, %c0_50, %c0_51] : memref<4x32x4xf32, #tpu.memory_space<vmem>>, vector<1x32x4xf32>
    %56 = vector.shape_cast %55 : vector<1x32x4xf32> to vector<32x4xf32>
    %cst_52 = arith.constant dense<0.000000e+00> : vector<512x4xf32>
    %57 = tpu.matmul %51, %56, %cst_52 {dimension_numbers = #tpu.dot_dimension_numbers<[1], [0], [0], [1], [0, 0, 1, 1], [], []>} : vector<512x32xf32>, vector<32x4xf32>, vector<512x4xf32> -> vector<512x4xf32>
    %58 = vector.broadcast %4 : vector<1x4xf32> to vector<512x4xf32>
    %59 = arith.mulf %57, %58 : vector<512x4xf32>
    %60 = vector.broadcast %5 : vector<1x4xf32> to vector<512x4xf32>
    %61 = arith.addf %59, %60 : vector<512x4xf32>
    %cst_53 = arith.constant 0.000000e+00 : f32
    %62 = vector.broadcast %cst_53 : f32 to vector<512x4xf32>
    %63 = arith.maximumf %61, %62 : vector<512x4xf32>
    %64 = tpu.concatenate %34, %63 in 1 : vector<512x4xf32>, vector<512x4xf32> -> vector<512x8xf32>
    %65 = vector.shape_cast %64 : vector<512x8xf32> to vector<2x16x1x16x8xf32>
    %c0_54 = arith.constant 0 : index
    %c0_55 = arith.constant 0 : index
    %c0_56 = arith.constant 0 : index
    %c0_57 = arith.constant 0 : index
    %c0_58 = arith.constant 0 : index
    %66 = vector.load %arg6[%c0_54, %c0_55, %c0_56, %c0_57, %c0_58] : memref<2x16x1x16x8xf32, #tpu.memory_space<vmem>>, vector<2x16x1x16x8xf32>
    tpu.vector_store %arg6[%c0_54, %c0_55, %c0_56, %c0_57, %c0_58], %65 {strides = array<i32>} : memref<2x16x1x16x8xf32, #tpu.memory_space<vmem>>, vector<2x16x1x16x8xf32>,
    return
  }
  func.func @transform_0(%arg0: i32, %arg1: i32) -> (i32, i32, i32, i32) {
    %c0_i32 = arith.constant 0 : i32
    %c0_i32_0 = arith.constant 0 : i32
    %c0_i32_1 = arith.constant 0 : i32
    %c0_i32_2 = arith.constant 0 : i32
    return %arg0, %c0_i32, %c0_i32_0, %c0_i32_1 : i32, i32, i32, i32
  }
  func.func @transform_1(%arg0: i32, %arg1: i32) -> (i32, i32, i32) {
    %c0_i32 = arith.constant 0 : i32
    %c0_i32_0 = arith.constant 0 : i32
    %c0_i32_1 = arith.constant 0 : i32
    %c0_i32_2 = arith.constant 0 : i32
    return %c0_i32, %c0_i32_0, %c0_i32_1 : i32, i32, i32
  }
  func.func @transform_2(%arg0: i32, %arg1: i32) -> (i32, i32) {
    %c0_i32 = arith.constant 0 : i32
    %c0_i32_0 = arith.constant 0 : i32
    %c0_i32_1 = arith.constant 0 : i32
    return %c0_i32, %c0_i32_0 : i32, i32
  }
  func.func @transform_3(%arg0: i32, %arg1: i32) -> (i32, i32) {
    %c0_i32 = arith.constant 0 : i32
    %c0_i32_0 = arith.constant 0 : i32
    %c0_i32_1 = arith.constant 0 : i32
    return %c0_i32, %c0_i32_0 : i32, i32
  }
  func.func @transform_4(%arg0: i32, %arg1: i32) -> (i32, i32, i32, i32, i32) {
    %c0_i32 = arith.constant 0 : i32
    %c0_i32_0 = arith.constant 0 : i32
    %c0_i32_1 = arith.constant 0 : i32
    %c0_i32_2 = arith.constant 0 : i32
    return %arg0, %c0_i32, %arg1, %c0_i32_0, %c0_i32_1 : i32, i32, i32, i32, i32
  }
}

</mosaic_0001>

<bundles_post_ra>
// kernel: tpu_custom_call.1
= control target key start
LH: loop header
LB: loop body
LE: loop exit
PB: predicated region body
PF: predicated region fallthrough
CT: control target
= control target key end

     0   :  { %s5972_s15 = smov 0   ;;  %s5974_s16 = smov 0   ;;  %s9548_s0 = inlined_call_operand.vmem [shape: f32[2,16,16,8], index: 0, kind: input, shape index: {}]   ;;  %s9549_s1 = inlined_call_operand.vmem [shape: f32[4,32,4], index: 1, kind: input, shape index: {}]   ;;  %s9550_s2 = inlined_call_operand.vmem [shape: f32[1,4], index: 2, kind: input, shape index: {}]   ;;  %s9551_s3 = inlined_call_operand.vmem [shape: f32[1,4], index: 3, kind: input, shape index: {}]   ;;  %s9552_s4 = inlined_call_operand.vmem [shape: f32[2,16,2,16,8], index: 4, kind: output, shape index: {}]  }
   0x1   :  { %s5976_s17 = smov 0   ;;  %s5978_s18 = smov 0  }
   0x2   :  { %s5980_s19 = smov 0  }
   0x3 LB: > { %s5023_s20 = sadd.s32 4294967295, %s5940_s19   ;;  %s23_s21 = sadd.s32 1, %s5936_s18  ;;  %s5940_s19 = sphi %s5980_s19, %s14_s19   ;;  %s5936_s18 = sphi %s5978_s18, %s9839_s18   ;;  %s5932_s17 = sphi %s5976_s17, %s9838_s17   ;;  %s5928_s16 = sphi %s5974_s16, %s9837_s16   ;;  %s5924_s15 = sphi %s5972_s15, %s9836_s15  }
   0x4   : > { %p24_p0 = scmp.ge.s32.totalorder %s23_s21, 2  ;;  %s124_s22 = sadd.s32 1, %s5928_s16 }
   0x5   : > { %p134_p1 = scmp.ne.s32.totalorder %s5928_s16, %s5924_s15  ;;  %p135_p2 = scmp.eq.s32.totalorder %s5023_s20, 1 }
   0x6   : > { %s9841_s21 = smov (%p24_p0, %s23_s21), 0  ;;  %p5027_p4 = scmp.ge.s32.totalorder %s5940_s19, 1 }
   0x7   : > { %p6004_p3 = por %p135_p2, %p134_p1  ;;  %s120_s24 = ssub.s32 %s5936_s18, %s9841_s21 }
   0x8   : > { %p178_p5 = scmp.lt.s32.totalorder %s5940_s19, 3  ;;  %p122_p6 = scmp.eq.s32.totalorder %s120_s24, 0 }
   0xa   : > { %p179_p7 = pnand %p5027_p4, %p178_p5 }
   0xb   : > { %s6013_s25 = scalar_select %p122_p6, %s5928_s16, %s124_s22  }
   0xc   : > { %182 = sbr.rel (%p179_p7) target bundleno = 1339 (0x53b), region = 36 }
  0x13   : > { %vm212_vm0 = vcmask 64512   ;;  %vm215_vm1 = vcmask 58368   ;;  %v6018_v0 = vld [vmem:[%s9548_s0] sm:$0xff]  ;;  %v6023_v1 = vld [vmem:[%s9548_s0 + $0x8] sm:$0xff]  ;;  %v6028_v2 = vld [vmem:[%s9548_s0 + $0x10] sm:$0xff]  ;;  %v5942_v3 = vmov 0.0  }
  0x14   : > { %213 = vst.msk [vmem:[#allocation2] sm:$0xff] %vm212_vm0, %v5942_v3  ;;  %214 = vst.msk [vmem:[#allocation2 + $0x8] sm:$0xff] %vm212_vm0, %v5942_v3  ;;  %v325_v4 = vld [vmem:[%s9548_s0 + $0x18] sm:$0xff]  ;;  %v326_v5 = vld [vmem:[%s9548_s0 + $0x20] sm:$0xff]  ;;  %s453_s28 = smul.u32 24, %s5932_s17  ;;  %s5943_s30 = smov 8  }
  0x15   : > { %216 = vst.msk [vmem:[#allocation2 + $0x10] sm:$0x3] %vm215_vm1, %v5942_v3  ;;  %219 = vst.msk [vmem:[#allocation2 + $0x28] sm:$0x3] %vm215_vm1, %v5942_v3  ;;  %v327_v6 = vld [vmem:[%s9548_s0 + $0x28] sm:$0xff]  ;;  %v328_v7 = vld [vmem:[%s9548_s0 + $0x30] sm:$0xff] }
  0x16   : > { %217 = vst.msk [vmem:[#allocation2 + $0x18] sm:$0xff] %vm212_vm0, %v5942_v3  ;;  %218 = vst.msk [vmem:[#allocation2 + $0x20] sm:$0xff] %vm212_vm0, %v5942_v3  ;;  %v329_v8 = vld [vmem:[%s9548_s0 + $0x38] sm:$0xff]  ;;  %v330_v9 = vld [vmem:[%s9548_s0 + $0x40] sm:$0xff]  ;;  %s6497_s29 = scalar_lea.vmem [#allocation2], %s453_s28  ;;  %s5944_s5 = smov 16  }
  0x17   : > { %220 = vst.msk [vmem:[#allocation2 + $0x30] sm:$0xff] %vm212_vm0, %v5942_v3  ;;  %221 = vst.msk [vmem:[#allocation2 + $0x38] sm:$0xff] %vm212_vm0, %v5942_v3  ;;  %v331_v10 = vld [vmem:[%s9548_s0 + $0x48] sm:$0xff]  ;;  %v332_v11 = vld [vmem:[%s9548_s0 + $0x50] sm:$0xff]  ;;  %s5364_s6 = sshll.u32 %s5932_s17, 6  ;;  %s5945_s10 = smov 24  }
  0x18   : > { %222 = vst.msk [vmem:[#allocation2 + $0x40] sm:$0x3] %vm215_vm1, %v5942_v3  ;;  %225 = vst.msk [vmem:[#allocation2 + $0x58] sm:$0x3] %vm215_vm1, %v5942_v3  ;;  %v333_v12 = vld [vmem:[%s9548_s0 + $0x58] sm:$0xff]  ;;  %v334_v13 = vld [vmem:[%s9548_s0 + $0x60] sm:$0xff]  ;;  %s7039_s9 = scalar_lea.vmem %s9549_s1, %s5364_s6 }
  0x19   : > { %223 = vst.msk [vmem:[#allocation2 + $0x48] sm:$0xff] %vm212_vm0, %v5942_v3  ;;  %224 = vst.msk [vmem:[#allocation2 + $0x50] sm:$0xff] %vm212_vm0, %v5942_v3  ;;  %v335_v14 = vld [vmem:[%s9548_s0 + $0x68] sm:$0xff]  ;;  %v336_v15 = vld [vmem:[%s9548_s0 + $0x70] sm:$0xff]  ;;  %vm1546_vm2 = vcmask 130048   ;;  %vm1611_vm3 = vcmask 195584  }
  0x1a   : > { %226 = vst.msk [vmem:[#allocation2 + $0x60] sm:$0xff] %vm212_vm0, %v5942_v3  ;;  %227 = vst.msk [vmem:[#allocation2 + $0x68] sm:$0xff] %vm212_vm0, %v5942_v3  ;;  %v337_v16 = vld [vmem:[%s9548_s0 + $0x78] sm:$0xff]  ;;  %v338_v17 = vld [vmem:[%s9548_s0 + $0x80] sm:$0xff]  ;;  %vm1683_vm4 = vcmask 261120   ;;  %s5946_s20 = smov 4  }
  0x1b   : > { %228 = vst.msk [vmem:[#allocation2 + $0x70] sm:$0x3] %vm215_vm1, %v5942_v3  ;;  %231 = vst.msk [vmem:[#allocation2 + $0x88] sm:$0x3] %vm215_vm1, %v5942_v3  ;;  %v339_v18 = vld [vmem:[%s9548_s0 + $0x88] sm:$0xff]  ;;  %v340_v19 = vld [vmem:[%s9548_s0 + $0x90] sm:$0xff] }
  0x1c   : > { %229 = vst.msk [vmem:[#allocation2 + $0x78] sm:$0xff] %vm212_vm0, %v5942_v3  ;;  %230 = vst.msk [vmem:[#allocation2 + $0x80] sm:$0xff] %vm212_vm0, %v5942_v3  ;;  %v341_v20 = vld [vmem:[%s9548_s0 + $0x98] sm:$0xff]  ;;  %v342_v21 = vld [vmem:[%s9548_s0 + $0xa0] sm:$0xff]  ;;  %s201_s22 = sand.u32 1, %s5924_s15   ;;  %vm4521_vm5 = vcmask 31744  }
  0x1d   : > { %232 = vst.msk [vmem:[#allocation2 + $0x90] sm:$0xff] %vm212_vm0, %v5942_v3  ;;  %233 = vst.msk [vmem:[#allocation2 + $0x98] sm:$0xff] %vm212_vm0, %v5942_v3  ;;  %v343_v22 = vld [vmem:[%s9548_s0 + $0xa8] sm:$0xff]  ;;  %v344_v23 = vld [vmem:[%s9548_s0 + $0xb0] sm:$0xff]  ;;  %s5028_s24 = sshll.u32 %s201_s22, 9 }
  0x1e   : > { %234 = vst.msk [vmem:[#allocation2 + $0xa0] sm:$0x3] %vm215_vm1, %v5942_v3  ;;  %237 = vst.msk [vmem:[#allocation2 + $0xb8] sm:$0x3] %vm215_vm1, %v5942_v3  ;;  %v345_v24 = vld [vmem:[%s9548_s0 + $0xb8] sm:$0xff]  ;;  %v346_v25 = vld [vmem:[%s9548_s0 + $0xc0] sm:$0xff] }
  0x1f   : > { %235 = vst.msk [vmem:[#allocation2 + $0xa8] sm:$0xff] %vm212_vm0, %v5942_v3  ;;  %236 = vst.msk [vmem:[#allocation2 + $0xb0] sm:$0xff] %vm212_vm0, %v5942_v3  ;;  %v347_v26 = vld [vmem:[%s9548_s0 + $0xc8] sm:$0xff]  ;;  %v348_v27 = vld [vmem:[%s9548_s0 + $0xd0] sm:$0xff]  ;;  %s8905_s15 = scalar_lea.vmem [#allocation3], %s5028_s24 }
  0x20   : > { %238 = vst.msk [vmem:[#allocation2 + $0xc0] sm:$0xff] %vm212_vm0, %v5942_v3  ;;  %239 = vst.msk [vmem:[#allocation2 + $0xc8] sm:$0xff] %vm212_vm0, %v5942_v3  ;;  %v349_v28 = vld [vmem:[%s9548_s0 + $0xd8] sm:$0xff]  ;;  %v350_v29 = vld [vmem:[%s9548_s0 + $0xe0] sm:$0xff] }
  0x21   : > { %240 = vst.msk [vmem:[#allocation2 + $0xd0] sm:$0x3] %vm215_vm1, %v5942_v3  ;;  %243 = vst.msk [vmem:[#allocation2 + $0xe8] sm:$0x3] %vm215_vm1, %v5942_v3  ;;  %v351_v30 = vld [vmem:[%s9548_s0 + $0xe8] sm:$0xff]  ;;  %v352_v31 = vld [vmem:[%s9548_s0 + $0xf0] sm:$0xff] }
  0x22   : > { %241 = vst.msk [vmem:[#allocation2 + $0xd8] sm:$0xff] %vm212_vm0, %v5942_v3  ;;  %242 = vst.msk [vmem:[#allocation2 + $0xe0] sm:$0xff] %vm212_vm0, %v5942_v3  ;;  %v353_v32 = vld [vmem:[%s9548_s0 + $0xf8] sm:$0xff]  ;;  %v354_v33 = vld [vmem:[%s9548_s0 + $0x100] sm:$0xff] }
  0x23   : > { %244 = vst.msk [vmem:[#allocation2 + $0xf0] sm:$0xff] %vm212_vm0, %v5942_v3  ;;  %245 = vst.msk [vmem:[#allocation2 + $0xf8] sm:$0xff] %vm212_vm0, %v5942_v3  ;;  %v355_v34 = vld [vmem:[%s9548_s0 + $0x108] sm:$0xff]  ;;  %v356_v35 = vld [vmem:[%s9548_s0 + $0x110] sm:$0xff] }
  0x24   : > { %246 = vst.msk [vmem:[#allocation2 + $0x100] sm:$0x3] %vm215_vm1, %v5942_v3  ;;  %249 = vst.msk [vmem:[#allocation2 + $0x118] sm:$0x3] %vm215_vm1, %v5942_v3  ;;  %v357_v36 = vld [vmem:[%s9548_s0 + $0x118] sm:$0xff]  ;;  %v358_v37 = vld [vmem:[%s9548_s0 + $0x120] sm:$0xff] }
  0x25   : > { %247 = vst.msk [vmem:[#allocation2 + $0x108] sm:$0xff] %vm212_vm0, %v5942_v3  ;;  %248 = vst.msk [vmem:[#allocation2 + $0x110] sm:$0xff] %vm212_vm0, %v5942_v3  ;;  %v359_v38 = vld [vmem:[%s9548_s0 + $0x128] sm:$0xff]  ;;  %v360_v39 = vld [vmem:[%s9548_s0 + $0x130] sm:$0xff] }
  0x26   : > { %250 = vst.msk [vmem:[#allocation2 + $0x120] sm:$0xff] %vm212_vm0, %v5942_v3  ;;  %251 = vst.msk [vmem:[#allocation2 + $0x128] sm:$0xff] %vm212_vm0, %v5942_v3  ;;  %v361_v40 = vld [vmem:[%s9548_s0 + $0x138] sm:$0xff]  ;;  %v362_v41 = vld [vmem:[%s9548_s0 + $0x140] sm:$0xff] }
  0x27   : > { %252 = vst.msk [vmem:[#allocation2 + $0x130] sm:$0x3] %vm215_vm1, %v5942_v3  ;;  %255 = vst.msk [vmem:[#allocation2 + $0x148] sm:$0x3] %vm215_vm1, %v5942_v3  ;;  %v363_v42 = vld [vmem:[%s9548_s0 + $0x148] sm:$0xff]  ;;  %v364_v43 = vld [vmem:[%s9548_s0 + $0x150] sm:$0xff] }
  0x28   : > { %253 = vst.msk [vmem:[#allocation2 + $0x138] sm:$0xff] %vm212_vm0, %v5942_v3  ;;  %254 = vst.msk [vmem:[#allocation2 + $0x140] sm:$0xff] %vm212_vm0, %v5942_v3  ;;  %v365_v44 = vld [vmem:[%s9548_s0 + $0x158] sm:$0xff]  ;;  %v366_v45 = vld [vmem:[%s9548_s0 + $0x160] sm:$0xff] }
  0x29   : > { %256 = vst.msk [vmem:[#allocation2 + $0x150] sm:$0xff] %vm212_vm0, %v5942_v3  ;;  %257 = vst.msk [vmem:[#allocation2 + $0x158] sm:$0xff] %vm212_vm0, %v5942_v3  ;;  %v367_v46 = vld [vmem:[%s9548_s0 + $0x168] sm:$0xff]  ;;  %v368_v47 = vld [vmem:[%s9548_s0 + $0x170] sm:$0xff] }
  0x2a   : > { %258 = vst.msk [vmem:[#allocation2 + $0x160] sm:$0x3] %vm215_vm1, %v5942_v3  ;;  %261 = vst.msk [vmem:[#allocation2 + $0x178] sm:$0x3] %vm215_vm1, %v5942_v3  ;;  %v369_v48 = vld [vmem:[%s9548_s0 + $0x178] sm:$0xff]  ;;  %v370_v49 = vld [vmem:[%s9548_s0 + $0x180] sm:$0xff] }
  0x2b   : > { %259 = vst.msk [vmem:[#allocation2 + $0x168] sm:$0xff] %vm212_vm0, %v5942_v3  ;;  %260 = vst.msk [vmem:[#allocation2 + $0x170] sm:$0xff] %vm212_vm0, %v5942_v3  ;;  %v371_v50 = vld [vmem:[%s9548_s0 + $0x188] sm:$0xff]  ;;  %v372_v51 = vld [vmem:[%s9548_s0 + $0x190] sm:$0xff] }
  0x2c   : > { %262 = vst.msk [vmem:[#allocation2 + $0x180] sm:$0xff] %vm212_vm0, %v5942_v3  ;;  %263 = vst.msk [vmem:[#allocation2 + $0x188] sm:$0xff] %vm212_vm0, %v5942_v3  ;;  %v373_v52 = vld [vmem:[%s9548_s0 + $0x198] sm:$0xff]  ;;  %v374_v53 = vld [vmem:[%s9548_s0 + $0x1a0] sm:$0xff] }
  0x2d   : > { %264 = vst.msk [vmem:[#allocation2 + $0x190] sm:$0x3] %vm215_vm1, %v5942_v3  ;;  %267 = vst.msk [vmem:[#allocation2 + $0x1a8] sm:$0x3] %vm215_vm1, %v5942_v3  ;;  %v375_v54 = vld [vmem:[%s9548_s0 + $0x1a8] sm:$0xff]  ;;  %v376_v55 = vld [vmem:[%s9548_s0 + $0x1b0] sm:$0xff] }
  0x2e   : > { %265 = vst.msk [vmem:[#allocation2 + $0x198] sm:$0xff] %vm212_vm0, %v5942_v3  ;;  %266 = vst.msk [vmem:[#allocation2 + $0x1a0] sm:$0xff] %vm212_vm0, %v5942_v3  ;;  %v377_v56 = vld [vmem:[%s9548_s0 + $0x1b8] sm:$0xff]  ;;  %v378_v57 = vld [vmem:[%s9548_s0 + $0x1c0] sm:$0xff] }
  0x2f   : > { %268 = vst.msk [vmem:[#allocation2 + $0x1b0] sm:$0xff] %vm212_vm0, %v5942_v3  ;;  %269 = vst.msk [vmem:[#allocation2 + $0x1b8] sm:$0xff] %vm212_vm0, %v5942_v3  ;;  %v379_v58 = vld [vmem:[%s9548_s0 + $0x1c8] sm:$0xff]  ;;  %v380_v59 = vld [vmem:[%s9548_s0 + $0x1d0] sm:$0xff] }
  0x30   : > { %270 = vst.msk [vmem:[#allocation2 + $0x1c0] sm:$0x3] %vm215_vm1, %v5942_v3  ;;  %273 = vst.msk [vmem:[#allocation2 + $0x1d8] sm:$0x3] %vm215_vm1, %v5942_v3  ;;  %v381_v60 = vld [vmem:[%s9548_s0 + $0x1d8] sm:$0xff]  ;;  %v382_v61 = vld [vmem:[%s9548_s0 + $0x1e0] sm:$0xff] }
  0x31   : > { %271 = vst.msk [vmem:[#allocation2 + $0x1c8] sm:$0xff] %vm212_vm0, %v5942_v3  ;;  %272 = vst.msk [vmem:[#allocation2 + $0x1d0] sm:$0xff] %vm212_vm0, %v5942_v3  ;;  %v383_v62 = vld [vmem:[%s9548_s0 + $0x1e8] sm:$0xff]  ;;  %v384_v63 = vld [vmem:[%s9548_s0 + $0x1f0] sm:$0xff] }
  0x32   : > { %274 = vst.msk [vmem:[#allocation2 + $0x1e0] sm:$0xff] %vm212_vm0, %v5942_v3  ;;  %275 = vst.msk [vmem:[#allocation2 + $0x1e8] sm:$0xff] %vm212_vm0, %v5942_v3 }
  0x33   : > { %276 = vst.msk [vmem:[#allocation2 + $0x1f0] sm:$0x3] %vm215_vm1, %v5942_v3  ;;  %279 = vst.msk [vmem:[#allocation2 + $0x208] sm:$0x3] %vm215_vm1, %v5942_v3 }
  0x34   : > { %277 = vst.msk [vmem:[#allocation2 + $0x1f8] sm:$0xff] %vm212_vm0, %v5942_v3  ;;  %278 = vst.msk [vmem:[#allocation2 + $0x200] sm:$0xff] %vm212_vm0, %v5942_v3 }
  0x35   : > { %280 = vst.msk [vmem:[#allocation2 + $0x210] sm:$0xff] %vm212_vm0, %v5942_v3  ;;  %281 = vst.msk [vmem:[#allocation2 + $0x218] sm:$0xff] %vm212_vm0, %v5942_v3 }
  0x36   : > { %282 = vst.msk [vmem:[#allocation2 + $0x220] sm:$0x3] %vm215_vm1, %v5942_v3  ;;  %285 = vst.msk [vmem:[#allocation2 + $0x238] sm:$0x3] %vm215_vm1, %v5942_v3 }
  0x37   : > { %283 = vst.msk [vmem:[#allocation2 + $0x228] sm:$0xff] %vm212_vm0, %v5942_v3  ;;  %284 = vst.msk [vmem:[#allocation2 + $0x230] sm:$0xff] %vm212_vm0, %v5942_v3 }
  0x38   : > { %286 = vst.msk [vmem:[#allocation2 + $0x240] sm:$0xff] %vm212_vm0, %v5942_v3  ;;  %287 = vst.msk [vmem:[#allocation2 + $0x248] sm:$0xff] %vm212_vm0, %v5942_v3 }
  0x39   : > { %288 = vst.msk [vmem:[#allocation2 + $0x250] sm:$0x3] %vm215_vm1, %v5942_v3  ;;  %291 = vst.msk [vmem:[#allocation2 + $0x268] sm:$0x3] %vm215_vm1, %v5942_v3 }
  0x3a   : > { %289 = vst.msk [vmem:[#allocation2 + $0x258] sm:$0xff] %vm212_vm0, %v5942_v3  ;;  %290 = vst.msk [vmem:[#allocation2 + $0x260] sm:$0xff] %vm212_vm0, %v5942_v3 }
  0x3b   : > { %292 = vst.msk [vmem:[#allocation2 + $0x270] sm:$0xff] %vm212_vm0, %v5942_v3  ;;  %293 = vst.msk [vmem:[#allocation2 + $0x278] sm:$0xff] %vm212_vm0, %v5942_v3 }
  0x3c   : > { %294 = vst.msk [vmem:[#allocation2 + $0x280] sm:$0x3] %vm215_vm1, %v5942_v3  ;;  %297 = vst.msk [vmem:[#allocation2 + $0x298] sm:$0x3] %vm215_vm1, %v5942_v3 }
  0x3d   : > { %295 = vst.msk [vmem:[#allocation2 + $0x288] sm:$0xff] %vm212_vm0, %v5942_v3  ;;  %296 = vst.msk [vmem:[#allocation2 + $0x290] sm:$0xff] %vm212_vm0, %v5942_v3 }
  0x3e   : > { %298 = vst.msk [vmem:[#allocation2 + $0x2a0] sm:$0xff] %vm212_vm0, %v5942_v3  ;;  %299 = vst.msk [vmem:[#allocation2 + $0x2a8] sm:$0xff] %vm212_vm0, %v5942_v3 }
  0x3f   : > { %300 = vst.msk [vmem:[#allocation2 + $0x2b0] sm:$0x3] %vm215_vm1, %v5942_v3  ;;  %303 = vst.msk [vmem:[#allocation2 + $0x2c8] sm:$0x3] %vm215_vm1, %v5942_v3 }
  0x40   : > { %301 = vst.msk [vmem:[#allocation2 + $0x2b8] sm:$0xff] %vm212_vm0, %v5942_v3  ;;  %302 = vst.msk [vmem:[#allocation2 + $0x2c0] sm:$0xff] %vm212_vm0, %v5942_v3 }
  0x41   : > { %304 = vst.msk [vmem:[#allocation2 + $0x2d0] sm:$0xff] %vm212_vm0, %v5942_v3  ;;  %305 = vst.msk [vmem:[#allocation2 + $0x2d8] sm:$0xff] %vm212_vm0, %v5942_v3 }
  0x42   : > { %306 = vst.msk [vmem:[#allocation2 + $0x2e0] sm:$0x3] %vm215_vm1, %v5942_v3  ;;  %309 = vst.msk [vmem:[#allocation2 + $0x2f8] sm:$0x3] %vm215_vm1, %v5942_v3 }
  0x43   : > { %307 = vst.msk [vmem:[#allocation2 + $0x2e8] sm:$0xff] %vm212_vm0, %v5942_v3  ;;  %308 = vst.msk [vmem:[#allocation2 + $0x2f0] sm:$0xff] %vm212_vm0, %v5942_v3 }
  0x44   : > { %310 = vst.msk [vmem:[#allocation2 + $0x300] sm:$0xff] %vm212_vm0, %v5942_v3  ;;  %311 = vst.msk [vmem:[#allocation2 + $0x308] sm:$0xff] %vm212_vm0, %v5942_v3 }
  0x45   : > { %312 = vst.msk [vmem:[#allocation2 + $0x310] sm:$0x3] %vm215_vm1, %v5942_v3  ;;  %315 = vst.msk [vmem:[#allocation2 + $0x328] sm:$0x3] %vm215_vm1, %v5942_v3 }
  0x46   : > { %313 = vst.msk [vmem:[#allocation2 + $0x318] sm:$0xff] %vm212_vm0, %v5942_v3  ;;  %314 = vst.msk [vmem:[#allocation2 + $0x320] sm:$0xff] %vm212_vm0, %v5942_v3 }
  0x47   : > { %316 = vst.msk [vmem:[#allocation2 + $0x330] sm:$0xff] %vm212_vm0, %v5942_v3  ;;  %317 = vst.msk [vmem:[#allocation2 + $0x338] sm:$0xff] %vm212_vm0, %v5942_v3 }
  0x48   : > { %318 = vst.msk [vmem:[#allocation2 + $0x340] sm:$0x3] %vm215_vm1, %v5942_v3  ;;  %321 = vst.msk [vmem:[#allocation2 + $0x358] sm:$0x3] %vm215_vm1, %v5942_v3 }
  0x49   : > { %319 = vst.msk [vmem:[#allocation2 + $0x348] sm:$0xff] %vm212_vm0, %v5942_v3  ;;  %320 = vst.msk [vmem:[#allocation2 + $0x350] sm:$0xff] %vm212_vm0, %v5942_v3 }
  0x4a   : > { %387 = vst.msk [vmem:[#allocation2 + $0x19] sm:$0xff] %vm212_vm0, %v6018_v0  ;;  %388 = vst.msk [vmem:[#allocation2 + $0x21] sm:$0xff] %vm212_vm0, %v6023_v1  ;;  %v385_v0 = vld [vmem:[%s9548_s0 + $0x1f8] sm:$0xff] }
  0x4b   : > { %389 = vst.msk [vmem:[#allocation2 + $0x31] sm:$0xff] %vm212_vm0, %v6028_v2  ;;  %390 = vst.msk [vmem:[#allocation2 + $0x39] sm:$0xff] %vm212_vm0, %v325_v4 }
  0x4c   : > { %391 = vst.msk [vmem:[#allocation2 + $0x49] sm:$0xff] %vm212_vm0, %v326_v5  ;;  %392 = vst.msk [vmem:[#allocation2 + $0x51] sm:$0xff] %vm212_vm0, %v327_v6 }
  0x4d   : > { %393 = vst.msk [vmem:[#allocation2 + $0x61] sm:$0xff] %vm212_vm0, %v328_v7  ;;  %394 = vst.msk [vmem:[#allocation2 + $0x69] sm:$0xff] %vm212_vm0, %v329_v8 }
  0x4e   : > { %395 = vst.msk [vmem:[#allocation2 + $0x79] sm:$0xff] %vm212_vm0, %v330_v9  ;;  %396 = vst.msk [vmem:[#allocation2 + $0x81] sm:$0xff] %vm212_vm0, %v331_v10 }
  0x4f   : > { %397 = vst.msk [vmem:[#allocation2 + $0x91] sm:$0xff] %vm212_vm0, %v332_v11  ;;  %398 = vst.msk [vmem:[#allocation2 + $0x99] sm:$0xff] %vm212_vm0, %v333_v12 }
  0x50   : > { %399 = vst.msk [vmem:[#allocation2 + $0xa9] sm:$0xff] %vm212_vm0, %v334_v13  ;;  %400 = vst.msk [vmem:[#allocation2 + $0xb1] sm:$0xff] %vm212_vm0, %v335_v14 }
  0x51   : > { %401 = vst.msk [vmem:[#allocation2 + $0xc1] sm:$0xff] %vm212_vm0, %v336_v15  ;;  %402 = vst.msk [vmem:[#allocation2 + $0xc9] sm:$0xff] %vm212_vm0, %v337_v16 }
  0x52   : > { %403 = vst.msk [vmem:[#allocation2 + $0xd9] sm:$0xff] %vm212_vm0, %v338_v17  ;;  %404 = vst.msk [vmem:[#allocation2 + $0xe1] sm:$0xff] %vm212_vm0, %v339_v18 }
  0x53   : > { %405 = vst.msk [vmem:[#allocation2 + $0xf1] sm:$0xff] %vm212_vm0, %v340_v19  ;;  %406 = vst.msk [vmem:[#allocation2 + $0xf9] sm:$0xff] %vm212_vm0, %v341_v20 }
  0x54   : > { %407 = vst.msk [vmem:[#allocation2 + $0x109] sm:$0xff] %vm212_vm0, %v342_v21  ;;  %408 = vst.msk [vmem:[#allocation2 + $0x111] sm:$0xff] %vm212_vm0, %v343_v22 }
  0x55   : > { %409 = vst.msk [vmem:[#allocation2 + $0x121] sm:$0xff] %vm212_vm0, %v344_v23  ;;  %410 = vst.msk [vmem:[#allocation2 + $0x129] sm:$0xff] %vm212_vm0, %v345_v24 }
  0x56   : > { %411 = vst.msk [vmem:[#allocation2 + $0x139] sm:$0xff] %vm212_vm0, %v346_v25  ;;  %412 = vst.msk [vmem:[#allocation2 + $0x141] sm:$0xff] %vm212_vm0, %v347_v26 }
  0x57   : > { %413 = vst.msk [vmem:[#allocation2 + $0x151] sm:$0xff] %vm212_vm0, %v348_v27  ;;  %414 = vst.msk [vmem:[#allocation2 + $0x159] sm:$0xff] %vm212_vm0, %v349_v28 }
  0x58   : > { %415 = vst.msk [vmem:[#allocation2 + $0x169] sm:$0xff] %vm212_vm0, %v350_v29  ;;  %416 = vst.msk [vmem:[#allocation2 + $0x171] sm:$0xff] %vm212_vm0, %v351_v30 }
  0x59   : > { %417 = vst.msk [vmem:[#allocation2 + $0x181] sm:$0xff] %vm212_vm0, %v352_v31  ;;  %418 = vst.msk [vmem:[#allocation2 + $0x189] sm:$0xff] %vm212_vm0, %v353_v32 }
  0x5a   : > { %419 = vst.msk [vmem:[#allocation2 + $0x1c9] sm:$0xff] %vm212_vm0, %v354_v33  ;;  %420 = vst.msk [vmem:[#allocation2 + $0x1d1] sm:$0xff] %vm212_vm0, %v355_v34 }
  0x5b   : > { %421 = vst.msk [vmem:[#allocation2 + $0x1e1] sm:$0xff] %vm212_vm0, %v356_v35  ;;  %422 = vst.msk [vmem:[#allocation2 + $0x1e9] sm:$0xff] %vm212_vm0, %v357_v36 }
  0x5c   : > { %423 = vst.msk [vmem:[#allocation2 + $0x1f9] sm:$0xff] %vm212_vm0, %v358_v37  ;;  %424 = vst.msk [vmem:[#allocation2 + $0x201] sm:$0xff] %vm212_vm0, %v359_v38 }
  0x5d   : > { %425 = vst.msk [vmem:[#allocation2 + $0x211] sm:$0xff] %vm212_vm0, %v360_v39  ;;  %426 = vst.msk [vmem:[#allocation2 + $0x219] sm:$0xff] %vm212_vm0, %v361_v40 }
  0x5e   : > { %427 = vst.msk [vmem:[#allocation2 + $0x229] sm:$0xff] %vm212_vm0, %v362_v41  ;;  %428 = vst.msk [vmem:[#allocation2 + $0x231] sm:$0xff] %vm212_vm0, %v363_v42 }
  0x5f   : > { %429 = vst.msk [vmem:[#allocation2 + $0x241] sm:$0xff] %vm212_vm0, %v364_v43  ;;  %430 = vst.msk [vmem:[#allocation2 + $0x249] sm:$0xff] %vm212_vm0, %v365_v44 }
  0x60   : > { %431 = vst.msk [vmem:[#allocation2 + $0x259] sm:$0xff] %vm212_vm0, %v366_v45  ;;  %432 = vst.msk [vmem:[#allocation2 + $0x261] sm:$0xff] %vm212_vm0, %v367_v46 }
  0x61   : > { %433 = vst.msk [vmem:[#allocation2 + $0x271] sm:$0xff] %vm212_vm0, %v368_v47  ;;  %434 = vst.msk [vmem:[#allocation2 + $0x279] sm:$0xff] %vm212_vm0, %v369_v48 }
  0x62   : > { %435 = vst.msk [vmem:[#allocation2 + $0x289] sm:$0xff] %vm212_vm0, %v370_v49  ;;  %436 = vst.msk [vmem:[#allocation2 + $0x291] sm:$0xff] %vm212_vm0, %v371_v50 }
  0x63   : > { %437 = vst.msk [vmem:[#allocation2 + $0x2a1] sm:$0xff] %vm212_vm0, %v372_v51  ;;  %438 = vst.msk [vmem:[#allocation2 + $0x2a9] sm:$0xff] %vm212_vm0, %v373_v52 }
  0x64   : > { %439 = vst.msk [vmem:[#allocation2 + $0x2b9] sm:$0xff] %vm212_vm0, %v374_v53  ;;  %440 = vst.msk [vmem:[#allocation2 + $0x2c1] sm:$0xff] %vm212_vm0, %v375_v54 }
  0x65   : > { %441 = vst.msk [vmem:[#allocation2 + $0x2d1] sm:$0xff] %vm212_vm0, %v376_v55  ;;  %442 = vst.msk [vmem:[#allocation2 + $0x2d9] sm:$0xff] %vm212_vm0, %v377_v56 }
  0x66   : > { %443 = vst.msk [vmem:[#allocation2 + $0x2e9] sm:$0xff] %vm212_vm0, %v378_v57  ;;  %444 = vst.msk [vmem:[#allocation2 + $0x2f1] sm:$0xff] %vm212_vm0, %v379_v58 }
  0x67   : > { %445 = vst.msk [vmem:[#allocation2 + $0x301] sm:$0xff] %vm212_vm0, %v380_v59  ;;  %446 = vst.msk [vmem:[#allocation2 + $0x309] sm:$0xff] %vm212_vm0, %v381_v60 }
  0x68   : > { %447 = vst.msk [vmem:[#allocation2 + $0x319] sm:$0xff] %vm212_vm0, %v382_v61  ;;  %448 = vst.msk [vmem:[#allocation2 + $0x321] sm:$0xff] %vm212_vm0, %v383_v62 }
  0x69   : > { %449 = vst.msk [vmem:[#allocation2 + $0x331] sm:$0xff] %vm212_vm0, %v384_v63  ;;  %450 = vst.msk [vmem:[#allocation2 + $0x339] sm:$0xff] %vm212_vm0, %v385_v0 }
  0x70   : > { %v6500_v1 = vld [vmem:[%s6497_s29 + $0x19] sm:$0xff]  ;;  %v519_v2 = vld [vmem:[%s6497_s29 + $0x1] sm:$0xff]  ;;  %v520_v4 = vld [vmem:[%s6497_s29 + $0x9] sm:$0xff] }
  0x71   : > { %782 = vrot.lane.b32.xlu1 %v6500_v1, %s5943_s30  ;;  %778 = vrot.lane.b32.xlu0 %v519_v2, %s5943_s30  ;;  %v6507_v3 = vld [vmem:[%s6497_s29 + $0x21] sm:$0xff]  ;;  %v6514_v5 = vld [vmem:[%s6497_s29 + $0x39] sm:$0xff] }
  0x72   : > { %v6517_v6 = vld [vmem:[%s6497_s29 + $0x31] sm:$0xff]  ;;  %v6527_v8 = vld [vmem:[%s6497_s29 + $0x49] sm:$0xff]  ;;  %v6537_v10 = vld [vmem:[%s6497_s29 + $0x61] sm:$0xff] }
  0x73   : > { %v6524_v7 = vld [vmem:[%s6497_s29 + $0x51] sm:$0xff]  ;;  %v6534_v9 = vld [vmem:[%s6497_s29 + $0x69] sm:$0xff]  ;;  %v6544_v11 = vld [vmem:[%s6497_s29 + $0x81] sm:$0xff] }
  0x74   : > { %v6547_v12 = vld [vmem:[%s6497_s29 + $0x79] sm:$0xff]  ;;  %v6557_v14 = vld [vmem:[%s6497_s29 + $0x91] sm:$0xff]  ;;  %v6567_v16 = vld [vmem:[%s6497_s29 + $0xa9] sm:$0xff] }
  0x75   : > { %784 = vrot.lane.b32.xlu1 %v6507_v3, %s5943_s30  ;;  %780 = vrot.lane.b32.xlu0 %v520_v4, %s5943_s30  ;;  %v6554_v13 = vld [vmem:[%s6497_s29 + $0x99] sm:$0xff]  ;;  %v6564_v15 = vld [vmem:[%s6497_s29 + $0xb1] sm:$0xff] }
  0x76   : > { %v6574_v17 = vld [vmem:[%s6497_s29 + $0xc9] sm:$0xff]  ;;  %v6577_v18 = vld [vmem:[%s6497_s29 + $0xc1] sm:$0xff]  ;;  %v6587_v20 = vld [vmem:[%s6497_s29 + $0xd9] sm:$0xff] }
  0x77   : > { %v6584_v19 = vld [vmem:[%s6497_s29 + $0xe1] sm:$0xff]  ;;  %v6594_v21 = vld [vmem:[%s6497_s29 + $0xf9] sm:$0xff]  ;;  %v6597_v22 = vld [vmem:[%s6497_s29 + $0xf1] sm:$0xff] }
  0x78   : > { %v6604_v23 = vld [vmem:[%s6497_s29 + $0x111] sm:$0xff]  ;;  %v6607_v24 = vld [vmem:[%s6497_s29 + $0x109] sm:$0xff]  ;;  %v6617_v26 = vld [vmem:[%s6497_s29 + $0x121] sm:$0xff] }
  0x79   : > { %788 = vrot.lane.b32.xlu1 %v6514_v5, %s5943_s30  ;;  %786 = vrot.lane.b32.xlu0 %v6517_v6, %s5943_s30  ;;  %v6614_v25 = vld [vmem:[%s6497_s29 + $0x129] sm:$0xff]  ;;  %v6624_v27 = vld [vmem:[%s6497_s29 + $0x141] sm:$0xff] }
  0x7a   : > { %v6627_v28 = vld [vmem:[%s6497_s29 + $0x139] sm:$0xff]  ;;  %v547_v30 = vld [vmem:[%s6497_s29 + $0x151] sm:$0xff]  ;;  %v549_v32 = vld [vmem:[%s6497_s29 + $0x169] sm:$0xff] }
  0x7b   : > { %v548_v29 = vld [vmem:[%s6497_s29 + $0x159] sm:$0xff]  ;;  %v550_v31 = vld [vmem:[%s6497_s29 + $0x171] sm:$0xff]  ;;  %v553_v36 = vld [vmem:[%s6497_s29 + $0x1c9] sm:$0xff] }
  0x7c   : > { %v552_v33 = vld [vmem:[%s6497_s29 + $0x1b9] sm:$0xff]  ;;  %v551_v34 = vld [vmem:[%s6497_s29 + $0x1b1] sm:$0xff]  ;;  %v556_v37 = vld [vmem:[%s6497_s29 + $0x1e9] sm:$0xff] }
  0x7d   : > { %792 = vrot.lane.b32.xlu1 %v6524_v7, %s5943_s30  ;;  %790 = vrot.lane.b32.xlu0 %v6527_v8, %s5943_s30  ;;  %v554_v35 = vld [vmem:[%s6497_s29 + $0x1d1] sm:$0xff]  ;;  %v555_v38 = vld [vmem:[%s6497_s29 + $0x1e1] sm:$0xff] }
  0x7e   : > { %v558_v39 = vld [vmem:[%s6497_s29 + $0x201] sm:$0xff]  ;;  %v557_v40 = vld [vmem:[%s6497_s29 + $0x1f9] sm:$0xff]  ;;  %v559_v42 = vld [vmem:[%s6497_s29 + $0x211] sm:$0xff] }
  0x7f   : > { %v560_v41 = vld [vmem:[%s6497_s29 + $0x219] sm:$0xff]  ;;  %v562_v43 = vld [vmem:[%s6497_s29 + $0x231] sm:$0xff]  ;;  %v561_v44 = vld [vmem:[%s6497_s29 + $0x229] sm:$0xff] }
  0x80   : > { %v564_v45 = vld [vmem:[%s6497_s29 + $0x249] sm:$0xff]  ;;  %v563_v46 = vld [vmem:[%s6497_s29 + $0x241] sm:$0xff]  ;;  %v565_v48 = vld [vmem:[%s6497_s29 + $0x259] sm:$0xff] }
  0x81   : > { %796 = vrot.lane.b32.xlu1 %v6534_v9, %s5943_s30  ;;  %794 = vrot.lane.b32.xlu0 %v6537_v10, %s5943_s30  ;;  %v566_v47 = vld [vmem:[%s6497_s29 + $0x261] sm:$0xff]  ;;  %v568_v49 = vld [vmem:[%s6497_s29 + $0x279] sm:$0xff] }
  0x82   : > { %v567_v50 = vld [vmem:[%s6497_s29 + $0x271] sm:$0xff]  ;;  %v569_v52 = vld [vmem:[%s6497_s29 + $0x289] sm:$0xff]  ;;  %v571_v54 = vld [vmem:[%s6497_s29 + $0x2a1] sm:$0xff] }
  0x83   : > { %v570_v51 = vld [vmem:[%s6497_s29 + $0x291] sm:$0xff]  ;;  %v572_v53 = vld [vmem:[%s6497_s29 + $0x2a9] sm:$0xff]  ;;  %v574_v55 = vld [vmem:[%s6497_s29 + $0x2c1] sm:$0xff] }
  0x84   : > { %v573_v56 = vld [vmem:[%s6497_s29 + $0x2b9] sm:$0xff]  ;;  %v575_v58 = vld [vmem:[%s6497_s29 + $0x2d1] sm:$0xff]  ;;  %v577_v60 = vld [vmem:[%s6497_s29 + $0x2e9] sm:$0xff] }
  0x85   : > { %800 = vrot.lane.b32.xlu1 %v6544_v11, %s5943_s30  ;;  %798 = vrot.lane.b32.xlu0 %v6547_v12, %s5943_s30  ;;  %v576_v57 = vld [vmem:[%s6497_s29 + $0x2d9] sm:$0xff]  ;;  %v578_v59 = vld [vmem:[%s6497_s29 + $0x2f1] sm:$0xff] }
  0x86   : > { %v580_v63 = vld [vmem:[%s6497_s29 + $0x309] sm:$0xff]  ;;  %v579_v0 = vld [vmem:[%s6497_s29 + $0x301] sm:$0xff] }
  0x89   : > { %804 = vrot.lane.b32.xlu1 %v6554_v13, %s5943_s30  ;;  %802 = vrot.lane.b32.xlu0 %v6557_v14, %s5943_s30 }
  0x8d   : > { %808 = vrot.lane.b32.xlu1 %v6564_v15, %s5943_s30  ;;  %806 = vrot.lane.b32.xlu0 %v6567_v16, %s5943_s30 }
  0x91   : > { %812 = vrot.lane.b32.xlu1 %v6574_v17, %s5943_s30  ;;  %810 = vrot.lane.b32.xlu0 %v6577_v18, %s5943_s30 }
  0x95   : > { %816 = vrot.lane.b32.xlu1 %v6584_v19, %s5943_s30  ;;  %814 = vrot.lane.b32.xlu0 %v6587_v20, %s5943_s30 }
  0x99   : > { %820 = vrot.lane.b32.xlu1 %v6594_v21, %s5943_s30  ;;  %818 = vrot.lane.b32.xlu0 %v6597_v22, %s5943_s30 }
  0x9d   : > { %824 = vrot.lane.b32.xlu1 %v6604_v23, %s5943_s30  ;;  %822 = vrot.lane.b32.xlu0 %v6607_v24, %s5943_s30 }
  0xa1   : > { %828 = vrot.lane.b32.xlu1 %v6614_v25, %s5943_s30  ;;  %826 = vrot.lane.b32.xlu0 %v6617_v26, %s5943_s30 }
  0xa5   : > { %832 = vrot.lane.b32.xlu1 %v6624_v27, %s5943_s30  ;;  %830 = vrot.lane.b32.xlu0 %v6627_v28, %s5943_s30 }
  0xa9   : > { %836 = vrot.lane.b32.xlu1 %v548_v29, %s5943_s30  ;;  %834 = vrot.lane.b32.xlu0 %v547_v30, %s5943_s30  ;;  %v582_v29 = vld [vmem:[%s6497_s29 + $0x321] sm:$0xff]  ;;  %v581_v30 = vld [vmem:[%s6497_s29 + $0x319] sm:$0xff] }
  0xad   : > { %840 = vrot.lane.b32.xlu1 %v550_v31, %s5943_s30  ;;  %838 = vrot.lane.b32.xlu0 %v549_v32, %s5943_s30 }
  0xb1   : > { %844 = vrot.lane.b32.xlu1 %v552_v33, %s5943_s30  ;;  %842 = vrot.lane.b32.xlu0 %v551_v34, %s5943_s30 }
  0xb5   : > { %848 = vrot.lane.b32.xlu1 %v554_v35, %s5943_s30  ;;  %846 = vrot.lane.b32.xlu0 %v553_v36, %s5943_s30  ;;  %v6722_v35 = vld [vmem:[%s6497_s29 + $0x18] sm:$0xff]  ;;  %v6725_v36 = vld [vmem:[%s6497_s29 + $0x20] sm:$0xff] }
  0xb9   : > { %852 = vrot.lane.b32.xlu1 %v556_v37, %s5943_s30  ;;  %850 = vrot.lane.b32.xlu0 %v555_v38, %s5943_s30 }
  0xbd   : > { %856 = vrot.lane.b32.xlu1 %v558_v39, %s5943_s30  ;;  %854 = vrot.lane.b32.xlu0 %v557_v40, %s5943_s30  ;;  %v6736_v39 = vld [vmem:[%s6497_s29 + $0x38] sm:$0xff]  ;;  %v6739_v40 = vld [vmem:[%s6497_s29 + $0x30] sm:$0xff] }
  0xc1   : > { %860 = vrot.lane.b32.xlu1 %v560_v41, %s5943_s30  ;;  %858 = vrot.lane.b32.xlu0 %v559_v42, %s5943_s30 }
  0xc5   : > { %864 = vrot.lane.b32.xlu1 %v562_v43, %s5943_s30  ;;  %862 = vrot.lane.b32.xlu0 %v561_v44, %s5943_s30  ;;  %v6750_v43 = vld [vmem:[%s6497_s29 + $0x50] sm:$0xff]  ;;  %v6753_v44 = vld [vmem:[%s6497_s29 + $0x48] sm:$0xff] }
  0xc9   : > { %868 = vrot.lane.b32.xlu1 %v564_v45, %s5943_s30  ;;  %866 = vrot.lane.b32.xlu0 %v563_v46, %s5943_s30 }
  0xcd   : > { %872 = vrot.lane.b32.xlu1 %v566_v47, %s5943_s30  ;;  %870 = vrot.lane.b32.xlu0 %v565_v48, %s5943_s30  ;;  %v6764_v47 = vld [vmem:[%s6497_s29 + $0x68] sm:$0xff]  ;;  %v6767_v48 = vld [vmem:[%s6497_s29 + $0x60] sm:$0xff] }
  0xd1   : > { %876 = vrot.lane.b32.xlu1 %v568_v49, %s5943_s30  ;;  %874 = vrot.lane.b32.xlu0 %v567_v50, %s5943_s30 }
  0xd5   : > { %880 = vrot.lane.b32.xlu1 %v570_v51, %s5943_s30  ;;  %878 = vrot.lane.b32.xlu0 %v569_v52, %s5943_s30  ;;  %v6778_v51 = vld [vmem:[%s6497_s29 + $0x80] sm:$0xff]  ;;  %v6781_v52 = vld [vmem:[%s6497_s29 + $0x78] sm:$0xff] }
  0xd9   : > { %884 = vrot.lane.b32.xlu1 %v572_v53, %s5943_s30  ;;  %882 = vrot.lane.b32.xlu0 %v571_v54, %s5943_s30 }
  0xdd   : > { %888 = vrot.lane.b32.xlu1 %v574_v55, %s5943_s30  ;;  %886 = vrot.lane.b32.xlu0 %v573_v56, %s5943_s30  ;;  %v6792_v55 = vld [vmem:[%s6497_s29 + $0x98] sm:$0xff]  ;;  %v6795_v56 = vld [vmem:[%s6497_s29 + $0x90] sm:$0xff] }
  0xe1   : > { %892 = vrot.lane.b32.xlu1 %v576_v57, %s5943_s30  ;;  %890 = vrot.lane.b32.xlu0 %v575_v58, %s5943_s30 }
  0xe3   : > { %v6695_v61 = vpop.permute.xlu1 %782  ;;  %v6697_v62 = vpop.permute.xlu0 %778 }
  0xe5   : > { %896 = vrot.lane.b32.xlu1 %v578_v59, %s5943_s30  ;;  %894 = vrot.lane.b32.xlu0 %v577_v60, %s5943_s30  ;;  %v6806_v59 = vld [vmem:[%s6497_s29 + $0xb0] sm:$0xff]  ;;  %v6809_v60 = vld [vmem:[%s6497_s29 + $0xa8] sm:$0xff] }
  0xe6   : > { %9582 = vst [vmem:[#allocation10_spill] sm:$0xff] %v6806_v59  ;;  %9583 = vst [vmem:[#allocation11_spill] sm:$0xff] %v6809_v60 }
  0xe7   : > { %v6703_v2 = vpop.permute.xlu1 %784  ;;  %v6705_v4 = vpop.permute.xlu0 %780 }
  0xe9   : > { %900 = vrot.lane.b32.xlu1 %v580_v63, %s5943_s30  ;;  %898 = vrot.lane.b32.xlu0 %v579_v0, %s5943_s30 }
  0xeb   : > { %v6711_v31 = vpop.permute.xlu1 %788  ;;  %v6713_v32 = vpop.permute.xlu0 %786 }
  0xed   : > { %904 = vrot.lane.b32.xlu1 %v582_v29, %s5943_s30  ;;  %902 = vrot.lane.b32.xlu0 %v581_v30, %s5943_s30  ;;  %v6820_v29 = vld [vmem:[%s6497_s29 + $0xc8] sm:$0xff]  ;;  %v6823_v30 = vld [vmem:[%s6497_s29 + $0xc0] sm:$0xff] }
  0xee   : > { %9586 = vst [vmem:[#allocation14_spill] sm:$0xff] %v6820_v29  ;;  %9587 = vst [vmem:[#allocation15_spill] sm:$0xff] %v6823_v30 }
  0xef   : > { %v6717_v33 = vpop.permute.xlu1 %792  ;;  %v6719_v34 = vpop.permute.xlu0 %790 }
  0xf1   : > { %1036 = vrot.lane.b32.xlu1 %v6725_v36, %s5944_s5  ;;  %1034 = vrot.lane.b32.xlu0 %v6722_v35, %s5944_s5 }
  0xf3   : > { %v6731_v37 = vpop.permute.xlu1 %796  ;;  %v6733_v38 = vpop.permute.xlu0 %794 }
  0xf5   : > { %1040 = vrot.lane.b32.xlu1 %v6736_v39, %s5944_s5  ;;  %1038 = vrot.lane.b32.xlu0 %v6739_v40, %s5944_s5 }
  0xf7   : > { %v6745_v41 = vpop.permute.xlu1 %800  ;;  %v6747_v42 = vpop.permute.xlu0 %798 }
  0xf9   : > { %1044 = vrot.lane.b32.xlu1 %v6750_v43, %s5944_s5  ;;  %1042 = vrot.lane.b32.xlu0 %v6753_v44, %s5944_s5 }
  0xfb   : > { %v6759_v45 = vpop.permute.xlu1 %804  ;;  %v6761_v46 = vpop.permute.xlu0 %802 }
  0xfd   : > { %1048 = vrot.lane.b32.xlu1 %v6764_v47, %s5944_s5  ;;  %1046 = vrot.lane.b32.xlu0 %v6767_v48, %s5944_s5 }
  0xff   : > { %v6773_v49 = vpop.permute.xlu1 %808  ;;  %v6775_v50 = vpop.permute.xlu0 %806 }
 0x100   : > { %9576 = vst [vmem:[#allocation4_spill] sm:$0xff] %v6773_v49  ;;  %9577 = vst [vmem:[#allocation5_spill] sm:$0xff] %v6775_v50  ;;  %v1682_v50 = vld [vmem:[%s7039_s9 + $0x18] sm:$0xff] }
 0x101   : > { %1052 = vrot.lane.b32.xlu1 %v6778_v51, %s5944_s5  ;;  %1050 = vrot.lane.b32.xlu0 %v6781_v52, %s5944_s5 }
 0x103   : > { %v6787_v53 = vpop.permute.xlu1 %812  ;;  %v6789_v54 = vpop.permute.xlu0 %810 }
 0x104   : > { %9578 = vst [vmem:[#allocation6_spill] sm:$0xff] %v6787_v53  ;;  %9579 = vst [vmem:[#allocation7_spill] sm:$0xff] %v6789_v54  ;;  %v6834_v54 = vld [vmem:[%s6497_s29 + $0xe0] sm:$0xff] }
 0x105   : > { %1056 = vrot.lane.b32.xlu1 %v6792_v55, %s5944_s5  ;;  %1054 = vrot.lane.b32.xlu0 %v6795_v56, %s5944_s5  ;;  %9590 = vst [vmem:[#allocation18_spill] sm:$0xff] %v6834_v54 }
 0x107   : > { %v6801_v57 = vpop.permute.xlu1 %816  ;;  %v6803_v58 = vpop.permute.xlu0 %814 }
 0x108   : > { %9580 = vst [vmem:[#allocation8_spill] sm:$0xff] %v6801_v57  ;;  %9581 = vst [vmem:[#allocation9_spill] sm:$0xff] %v6803_v58 }
 0x109   : > { %1060 = vrot.lane.b32.xlu1 %v6806_v59, %s5944_s5  ;;  %1058 = vrot.lane.b32.xlu0 %v6809_v60, %s5944_s5  ;;  %v495_v60 = vld [vmem:[%s6497_s29 + $0x210] sm:$0xff]  ;;  %v513_v59 = vld [vmem:[%s6497_s29 + $0x2e8] sm:$0xff] }
 0x10b   : > { %v6815_v63 = vpop.permute.xlu1 %820  ;;  %v6817_v0 = vpop.permute.xlu0 %818 }
 0x10c   : > { %9584 = vst [vmem:[#allocation12_spill] sm:$0xff] %v6815_v63  ;;  %9585 = vst [vmem:[#allocation13_spill] sm:$0xff] %v6817_v0  ;;  %v6837_v63 = vld [vmem:[%s6497_s29 + $0xd8] sm:$0xff] }
 0x10d   : > { %1064 = vrot.lane.b32.xlu1 %v6820_v29, %s5944_s5  ;;  %1062 = vrot.lane.b32.xlu0 %v6823_v30, %s5944_s5  ;;  %9591 = vst [vmem:[#allocation19_spill] sm:$0xff] %v6837_v63  ;;  %v6848_v29 = vld [vmem:[%s6497_s29 + $0xf8] sm:$0xff] }
 0x10e   : > { %9594 = vst [vmem:[#allocation22_spill] sm:$0xff] %v6848_v29 }
 0x10f   : > { %v6829_v58 = vpop.permute.xlu1 %824  ;;  %v6831_v57 = vpop.permute.xlu0 %822 }
 0x110   : > { %9588 = vst [vmem:[#allocation16_spill] sm:$0xff] %v6829_v58  ;;  %9589 = vst [vmem:[#allocation17_spill] sm:$0xff] %v6831_v57  ;;  %v6851_v58 = vld [vmem:[%s6497_s29 + $0xf0] sm:$0xff] }
 0x111   : > { %1068 = vrot.lane.b32.xlu1 %v6834_v54, %s5944_s5  ;;  %1066 = vrot.lane.b32.xlu0 %v6837_v63, %s5944_s5  ;;  %9595 = vst [vmem:[#allocation23_spill] sm:$0xff] %v6851_v58  ;;  %v6862_v54 = vld [vmem:[%s6497_s29 + $0x110] sm:$0xff] }
 0x112   : > { %9598 = vst [vmem:[#allocation26_spill] sm:$0xff] %v6862_v54 }
 0x113   : > { %v6843_v0 = vpop.permute.xlu1 %828  ;;  %v6845_v30 = vpop.permute.xlu0 %826 }
 0x114   : > { %9592 = vst [vmem:[#allocation20_spill] sm:$0xff] %v6843_v0  ;;  %9593 = vst [vmem:[#allocation21_spill] sm:$0xff] %v6845_v30  ;;  %v6865_v0 = vld [vmem:[%s6497_s29 + $0x108] sm:$0xff] }
 0x115   : > { %1072 = vrot.lane.b32.xlu1 %v6848_v29, %s5944_s5  ;;  %1070 = vrot.lane.b32.xlu0 %v6851_v58, %s5944_s5  ;;  %9599 = vst [vmem:[#allocation27_spill] sm:$0xff] %v6865_v0  ;;  %v6876_v29 = vld [vmem:[%s6497_s29 + $0x128] sm:$0xff] }
 0x116   : > { %9602 = vst [vmem:[#allocation30_spill] sm:$0xff] %v6876_v29 }
 0x117   : > { %v6857_v57 = vpop.permute.xlu1 %832  ;;  %v6859_v63 = vpop.permute.xlu0 %830 }
 0x118   : > { %9596 = vst [vmem:[#allocation24_spill] sm:$0xff] %v6857_v57  ;;  %9597 = vst [vmem:[#allocation25_spill] sm:$0xff] %v6859_v63  ;;  %v6879_v57 = vld [vmem:[%s6497_s29 + $0x120] sm:$0xff] }
 0x119   : > { %1076 = vrot.lane.b32.xlu1 %v6862_v54, %s5944_s5  ;;  %1074 = vrot.lane.b32.xlu0 %v6865_v0, %s5944_s5  ;;  %9603 = vst [vmem:[#allocation31_spill] sm:$0xff] %v6879_v57  ;;  %v6890_v54 = vld [vmem:[%s6497_s29 + $0x140] sm:$0xff] }
 0x11a   : > { %9606 = vst [vmem:[#allocation34_spill] sm:$0xff] %v6890_v54 }
 0x11b   : > { %v6871_v30 = vpop.permute.xlu1 %836  ;;  %v6873_v58 = vpop.permute.xlu0 %834 }
 0x11c   : > { %9600 = vst [vmem:[#allocation28_spill] sm:$0xff] %v6871_v30  ;;  %9601 = vst [vmem:[#allocation29_spill] sm:$0xff] %v6873_v58  ;;  %v6893_v58 = vld [vmem:[%s6497_s29 + $0x138] sm:$0xff] }
 0x11d   : > { %1080 = vrot.lane.b32.xlu1 %v6876_v29, %s5944_s5  ;;  %1078 = vrot.lane.b32.xlu0 %v6879_v57, %s5944_s5  ;;  %9607 = vst [vmem:[#allocation35_spill] sm:$0xff] %v6893_v58  ;;  %v6904_v29 = vld [vmem:[%s6497_s29 + $0x158] sm:$0xff] }
 0x11e   : > { %9610 = vst [vmem:[#allocation38_spill] sm:$0xff] %v6904_v29 }
 0x11f   : > { %v6885_v63 = vpop.permute.xlu1 %840  ;;  %v6887_v0 = vpop.permute.xlu0 %838 }
 0x120   : > { %9604 = vst [vmem:[#allocation32_spill] sm:$0xff] %v6885_v63  ;;  %9605 = vst [vmem:[#allocation33_spill] sm:$0xff] %v6887_v0  ;;  %v6907_v63 = vld [vmem:[%s6497_s29 + $0x150] sm:$0xff] }
 0x121   : > { %1084 = vrot.lane.b32.xlu1 %v6890_v54, %s5944_s5  ;;  %1082 = vrot.lane.b32.xlu0 %v6893_v58, %s5944_s5  ;;  %9611 = vst [vmem:[#allocation39_spill] sm:$0xff] %v6907_v63  ;;  %v6918_v58 = vld [vmem:[%s6497_s29 + $0x170] sm:$0xff] }
 0x122   : > { %9614 = vst [vmem:[#allocation42_spill] sm:$0xff] %v6918_v58 }
 0x123   : > { %v6899_v30 = vpop.permute.xlu1 %844  ;;  %v6901_v57 = vpop.permute.xlu0 %842 }
 0x124   : > { %9608 = vst [vmem:[#allocation36_spill] sm:$0xff] %v6899_v30  ;;  %9609 = vst [vmem:[#allocation37_spill] sm:$0xff] %v6901_v57  ;;  %v6921_v30 = vld [vmem:[%s6497_s29 + $0x168] sm:$0xff] }
 0x125   : > { %1088 = vrot.lane.b32.xlu1 %v6904_v29, %s5944_s5  ;;  %1086 = vrot.lane.b32.xlu0 %v6907_v63, %s5944_s5  ;;  %9615 = vst [vmem:[#allocation43_spill] sm:$0xff] %v6921_v30  ;;  %v5060_v57 = vld [vmem:[%s6497_s29 + $0x188] sm:$0xff]  ;;  %v5059_v29 = vld [vmem:[%s6497_s29 + $0x180] sm:$0xff] }
 0x127   : > { %v6913_v0 = vpop.permute.xlu1 %848  ;;  %v6915_v54 = vpop.permute.xlu0 %846 }
 0x128   : > { %9612 = vst [vmem:[#allocation40_spill] sm:$0xff] %v6913_v0  ;;  %9613 = vst [vmem:[#allocation41_spill] sm:$0xff] %v6915_v54 }
 0x129   : > { %1092 = vrot.lane.b32.xlu1 %v6918_v58, %s5944_s5  ;;  %1090 = vrot.lane.b32.xlu0 %v6921_v30, %s5944_s5  ;;  %v6940_v58 = vld [vmem:[%s6497_s29 + $0x1d0] sm:$0xff]  ;;  %v6943_v30 = vld [vmem:[%s6497_s29 + $0x1c8] sm:$0xff] }
 0x12a   : > { %9620 = vst [vmem:[#allocation48_spill] sm:$0xff] %v6940_v58  ;;  %9621 = vst [vmem:[#allocation49_spill] sm:$0xff] %v6943_v30 }
 0x12b   : > { %v6929_v63 = vpop.permute.xlu1 %852  ;;  %v6931_v53 = vpop.permute.xlu0 %850 }
 0x12c   : > { %9616 = vst [vmem:[#allocation44_spill] sm:$0xff] %v6929_v63  ;;  %9617 = vst [vmem:[#allocation45_spill] sm:$0xff] %v6931_v53  ;;  %v6954_v53 = vld [vmem:[%s6497_s29 + $0x1e8] sm:$0xff] }
 0x12d   : > { %1096 = vrot.lane.b32.xlu1 %v5060_v57, %s5944_s5  ;;  %1094 = vrot.lane.b32.xlu0 %v5059_v29, %s5944_s5  ;;  %9624 = vst [vmem:[#allocation52_spill] sm:$0xff] %v6954_v53 }
 0x12f   : > { %v6935_v54 = vpop.permute.xlu1 %856  ;;  %v6937_v0 = vpop.permute.xlu0 %854 }
 0x130   : > { %9618 = vst [vmem:[#allocation46_spill] sm:$0xff] %v6935_v54  ;;  %9619 = vst [vmem:[#allocation47_spill] sm:$0xff] %v6937_v0  ;;  %v6957_v54 = vld [vmem:[%s6497_s29 + $0x1e0] sm:$0xff] }
 0x131   : > { %1100 = vrot.lane.b32.xlu1 %v6940_v58, %s5944_s5  ;;  %1098 = vrot.lane.b32.xlu0 %v6943_v30, %s5944_s5  ;;  %9625 = vst [vmem:[#allocation53_spill] sm:$0xff] %v6957_v54  ;;  %v494_v30 = vld [vmem:[%s6497_s29 + $0x200] sm:$0xff]  ;;  %v496_v58 = vld [vmem:[%s6497_s29 + $0x218] sm:$0xff] }
 0x133   : > { %v6949_v57 = vpop.permute.xlu1 %860  ;;  %v6951_v29 = vpop.permute.xlu0 %858 }
 0x134   : > { %9622 = vst [vmem:[#allocation50_spill] sm:$0xff] %v6949_v57  ;;  %9623 = vst [vmem:[#allocation51_spill] sm:$0xff] %v6951_v29  ;;  %v493_v57 = vld [vmem:[%s6497_s29 + $0x1f8] sm:$0xff] }
 0x135   : > { %1104 = vrot.lane.b32.xlu1 %v6954_v53, %s5944_s5  ;;  %1102 = vrot.lane.b32.xlu0 %v6957_v54, %s5944_s5  ;;  %v497_v54 = vld [vmem:[%s6497_s29 + $0x228] sm:$0xff] }
 0x137   : > { %v6963_v0 = vpop.permute.xlu1 %864  ;;  %v6965_v63 = vpop.permute.xlu0 %862 }
 0x138   : > { %9626 = vst [vmem:[#allocation54_spill] sm:$0xff] %v6963_v0  ;;  %9627 = vst [vmem:[#allocation55_spill] sm:$0xff] %v6965_v63 }
 0x139   : > { %1108 = vrot.lane.b32.xlu1 %v494_v30, %s5944_s5  ;;  %1106 = vrot.lane.b32.xlu0 %v493_v57, %s5944_s5  ;;  %v498_v30 = vld [vmem:[%s6497_s29 + $0x230] sm:$0xff] }
 0x13b   : > { %v6971_v29 = vpop.permute.xlu1 %868  ;;  %v6973_v53 = vpop.permute.xlu0 %866 }
 0x13c   : > { %9628 = vst [vmem:[#allocation56_spill] sm:$0xff] %v6971_v29  ;;  %9629 = vst [vmem:[#allocation57_spill] sm:$0xff] %v6973_v53  ;;  %v499_v29 = vld [vmem:[%s6497_s29 + $0x240] sm:$0xff] }
 0x13d   : > { %1112 = vrot.lane.b32.xlu1 %v496_v58, %s5944_s5  ;;  %1110 = vrot.lane.b32.xlu0 %v495_v60, %s5944_s5  ;;  %v500_v58 = vld [vmem:[%s6497_s29 + $0x248] sm:$0xff] }
 0x13f   : > { %v6979_v63 = vpop.permute.xlu1 %872  ;;  %v6981_v0 = vpop.permute.xlu0 %870 }
 0x140   : > { %9630 = vst [vmem:[#allocation58_spill] sm:$0xff] %v6979_v63  ;;  %9631 = vst [vmem:[#allocation59_spill] sm:$0xff] %v6981_v0  ;;  %v501_v63 = vld [vmem:[%s6497_s29 + $0x258] sm:$0xff] }
 0x141   : > { %1116 = vrot.lane.b32.xlu1 %v498_v30, %s5944_s5  ;;  %1114 = vrot.lane.b32.xlu0 %v497_v54, %s5944_s5  ;;  %v502_v30 = vld [vmem:[%s6497_s29 + $0x260] sm:$0xff] }
 0x143   : > { %v6987_v57 = vpop.permute.xlu1 %876  ;;  %v6989_v53 = vpop.permute.xlu0 %874 }
 0x144   : > { %9632 = vst [vmem:[#allocation60_spill] sm:$0xff] %v6987_v57  ;;  %9633 = vst [vmem:[#allocation61_spill] sm:$0xff] %v6989_v53  ;;  %v503_v57 = vld [vmem:[%s6497_s29 + $0x270] sm:$0xff] }
 0x145   : > { %1120 = vrot.lane.b32.xlu1 %v500_v58, %s5944_s5  ;;  %1118 = vrot.lane.b32.xlu0 %v499_v29, %s5944_s5  ;;  %v504_v58 = vld [vmem:[%s6497_s29 + $0x278] sm:$0xff] }
 0x147   : > { %v6995_v60 = vpop.permute.xlu1 %880  ;;  %v6997_v0 = vpop.permute.xlu0 %878 }
 0x148   : > { %9634 = vst [vmem:[#allocation62_spill] sm:$0xff] %v6995_v60  ;;  %9635 = vst [vmem:[#allocation63_spill] sm:$0xff] %v6997_v0  ;;  %v507_v60 = vld [vmem:[%s6497_s29 + $0x2a0] sm:$0xff] }
 0x149   : > { %1124 = vrot.lane.b32.xlu1 %v502_v30, %s5944_s5  ;;  %1122 = vrot.lane.b32.xlu0 %v501_v63, %s5944_s5  ;;  %v506_v30 = vld [vmem:[%s6497_s29 + $0x290] sm:$0xff]  ;;  %v505_v63 = vld [vmem:[%s6497_s29 + $0x288] sm:$0xff] }
 0x14b   : > { %v7003_v54 = vpop.permute.xlu1 %884  ;;  %v7005_v53 = vpop.permute.xlu0 %882 }
 0x14c   : > { %9636 = vst [vmem:[#allocation64_spill] sm:$0xff] %v7003_v54  ;;  %9637 = vst [vmem:[#allocation65_spill] sm:$0xff] %v7005_v53 }
 0x14d   : > { %1128 = vrot.lane.b32.xlu1 %v504_v58, %s5944_s5  ;;  %1126 = vrot.lane.b32.xlu0 %v503_v57, %s5944_s5  ;;  %v508_v58 = vld [vmem:[%s6497_s29 + $0x2a8] sm:$0xff] }
 0x14f   : > { %v7011_v29 = vpop.permute.xlu1 %888  ;;  %v7013_v0 = vpop.permute.xlu0 %886 }
 0x150   : > { %9638 = vst [vmem:[#allocation66_spill] sm:$0xff] %v7011_v29  ;;  %9639 = vst [vmem:[#allocation67_spill] sm:$0xff] %v7013_v0  ;;  %v510_v29 = vld [vmem:[%s6497_s29 + $0x2c0] sm:$0xff] }
 0x151   : > { %1132 = vrot.lane.b32.xlu1 %v506_v30, %s5944_s5  ;;  %1130 = vrot.lane.b32.xlu0 %v505_v63, %s5944_s5  ;;  %v509_v30 = vld [vmem:[%s6497_s29 + $0x2b8] sm:$0xff] }
 0x153   : > { %v7019_v53 = vpop.permute.xlu1 %892  ;;  %v7021_v54 = vpop.permute.xlu0 %890 }
 0x154   : > { %9640 = vst [vmem:[#allocation68_spill] sm:$0xff] %v7019_v53  ;;  %9641 = vst [vmem:[#allocation69_spill] sm:$0xff] %v7021_v54 }
 0x155   : > { %1136 = vrot.lane.b32.xlu1 %v508_v58, %s5944_s5  ;;  %1134 = vrot.lane.b32.xlu0 %v507_v60, %s5944_s5  ;;  %v1679_v58 = vld [vmem:[%s7039_s9] sm:$0xff] }
 0x157   : > { %v7027_v57 = vpop.permute.xlu1 %896  ;;  %v7029_v0 = vpop.permute.xlu0 %894 }
 0x158   : > { %9642 = vst [vmem:[#allocation70_spill] sm:$0xff] %v7027_v57  ;;  %9643 = vst [vmem:[#allocation71_spill] sm:$0xff] %v7029_v0  ;;  %v512_v0 = vld [vmem:[%s6497_s29 + $0x2d8] sm:$0xff] }
 0x159   : > { %1140 = vrot.lane.b32.xlu1 %v510_v29, %s5944_s5  ;;  %1138 = vrot.lane.b32.xlu0 %v509_v30, %s5944_s5  ;;  %v1680_v29 = vld [vmem:[%s7039_s9 + $0x8] sm:$0xff]  ;;  %v511_v30 = vld [vmem:[%s6497_s29 + $0x2d0] sm:$0xff] }
 0x15a   : > { %v5711_v57 = vpack.c.bf16 %v1680_v29, %v1679_v58  ;;  %v515_v29 = vld [vmem:[%s6497_s29 + $0x300] sm:$0xff] }
 0x15b   : > { %v7041_v60 = vpop.permute.xlu1 %900  ;;  %v7043_v63 = vpop.permute.xlu0 %898 }
 0x15c   : > { %9644 = vst [vmem:[#allocation72_spill] sm:$0xff] %v7041_v60  ;;  %9645 = vst [vmem:[#allocation73_spill] sm:$0xff] %v7043_v63  ;;  %5712 = vmatprep.subr.bf16.mxu0 %v5711_v57  ;;  %v1681_v60 = vld [vmem:[%s7039_s9 + $0x10] sm:$0xff] }
 0x15d   : > { %1144 = vrot.lane.b32.xlu1 %v512_v0, %s5944_s5  ;;  %1142 = vrot.lane.b32.xlu0 %v511_v30, %s5944_s5  ;;  %v514_v63 = vld [vmem:[%s6497_s29 + $0x2f0] sm:$0xff]  ;;  %v5715_v49 = vpack.c.bf16 %v1682_v50, %v1681_v60  ;;  %v518_v60 = vld [vmem:[%s6497_s29 + $0x320] sm:$0xff] }
 0x15e   : > { %5714 = vmatpush3.bf16.msra.mxu0 %v5711_v57  ;;  %v516_v57 = vld [vmem:[%s6497_s29 + $0x308] sm:$0xff] }
 0x15f   : > { %v7051_v54 = vpop.permute.xlu1 %904  ;;  %v7053_v53 = vpop.permute.xlu0 %902  ;;  %5716 = vmatprep.subr.bf16.mxu0 %v5715_v49 }
 0x160   : > { %9646 = vst [vmem:[#allocation74_spill] sm:$0xff] %v7051_v54  ;;  %9647 = vst [vmem:[#allocation75_spill] sm:$0xff] %v7053_v53  ;;  %v5091_v53 = vld [vmem:[%s6497_s29 + $0x330] sm:$0xff] }
 0x161   : > { %1148 = vrot.lane.b32.xlu1 %v514_v63, %s5944_s5  ;;  %1146 = vrot.lane.b32.xlu0 %v513_v59, %s5944_s5  ;;  %v517_v63 = vld [vmem:[%s6497_s29 + $0x318] sm:$0xff] }
 0x162   : > { %5718 = vmatpush3.bf16.msra.mxu0 %v5715_v49  ;;  %v5092_v59 = vld [vmem:[%s6497_s29 + $0x338] sm:$0xff] }
 0x163   : > { %v7061_v0 = vpop.permute.xlu1 %1036  ;;  %v7063_v58 = vpop.permute.xlu0 %1034 }
 0x165   : > { %1152 = vrot.lane.b32.xlu1 %v516_v57, %s5944_s5  ;;  %1150 = vrot.lane.b32.xlu0 %v515_v29, %s5944_s5 }
 0x167   : > { %v7069_v30 = vpop.permute.xlu1 %1040  ;;  %v7071_v50 = vpop.permute.xlu0 %1038 }
 0x169   : > { %1156 = vrot.lane.b32.xlu1 %v518_v60, %s5944_s5  ;;  %1154 = vrot.lane.b32.xlu0 %v517_v63, %s5944_s5 }
 0x16b   : > { %v7079_v54 = vpop.permute.xlu1 %1044  ;;  %v7081_v49 = vpop.permute.xlu0 %1042 }
 0x16d   : > { %1160 = vrot.lane.b32.xlu1 %v5092_v59, %s5944_s5  ;;  %1158 = vrot.lane.b32.xlu0 %v5091_v53, %s5944_s5 }
 0x16f   : > { %v7085_v57 = vpop.permute.xlu1 %1048  ;;  %v7087_v29 = vpop.permute.xlu0 %1046 }
 0x171   : > { %1292 = vrot.lane.b32.xlu1 %v6507_v3, %s5945_s10  ;;  %1290 = vrot.lane.b32.xlu0 %v6500_v1, %s5945_s10 }
 0x173   : > { %v7093_v60 = vpop.permute.xlu1 %1052  ;;  %v7095_v63 = vpop.permute.xlu0 %1050 }
 0x175   : > { %1296 = vrot.lane.b32.xlu1 %v6514_v5, %s5945_s10  ;;  %1294 = vrot.lane.b32.xlu0 %v6517_v6, %s5945_s10 }
 0x177   : > { %v7101_v53 = vpop.permute.xlu1 %1056  ;;  %v7103_v59 = vpop.permute.xlu0 %1054 }
 0x179   : > { %1300 = vrot.lane.b32.xlu1 %v6524_v7, %s5945_s10  ;;  %1298 = vrot.lane.b32.xlu0 %v6527_v8, %s5945_s10 }
 0x17b   : > { %v7109_v1 = vpop.permute.xlu1 %1060  ;;  %v7111_v3 = vpop.permute.xlu0 %1058 }
 0x17d   : > { %1304 = vrot.lane.b32.xlu1 %v6534_v9, %s5945_s10  ;;  %1302 = vrot.lane.b32.xlu0 %v6537_v10, %s5945_s10 }
 0x17f   : > { %v7117_v5 = vpop.permute.xlu1 %1064  ;;  %v7119_v6 = vpop.permute.xlu0 %1062 }
 0x181   : > { %1308 = vrot.lane.b32.xlu1 %v6544_v11, %s5945_s10  ;;  %1306 = vrot.lane.b32.xlu0 %v6547_v12, %s5945_s10 }
 0x183   : > { %v7125_v7 = vpop.permute.xlu1 %1068  ;;  %v7127_v8 = vpop.permute.xlu0 %1066 }
 0x185   : > { %1312 = vrot.lane.b32.xlu1 %v6554_v13, %s5945_s10  ;;  %1310 = vrot.lane.b32.xlu0 %v6557_v14, %s5945_s10 }
 0x187   : > { %v7133_v9 = vpop.permute.xlu1 %1072  ;;  %v7135_v10 = vpop.permute.xlu0 %1070 }
 0x189   : > { %1316 = vrot.lane.b32.xlu1 %v6564_v15, %s5945_s10  ;;  %1314 = vrot.lane.b32.xlu0 %v6567_v16, %s5945_s10 }
 0x18b   : > { %v7141_v11 = vpop.permute.xlu1 %1076  ;;  %v7143_v12 = vpop.permute.xlu0 %1074 }
 0x18d   : > { %1320 = vrot.lane.b32.xlu1 %v6574_v17, %s5945_s10  ;;  %1318 = vrot.lane.b32.xlu0 %v6577_v18, %s5945_s10 }
 0x18f   : > { %v7149_v13 = vpop.permute.xlu1 %1080  ;;  %v7151_v14 = vpop.permute.xlu0 %1078 }
 0x191   : > { %1324 = vrot.lane.b32.xlu1 %v6584_v19, %s5945_s10  ;;  %1322 = vrot.lane.b32.xlu0 %v6587_v20, %s5945_s10 }
 0x193   : > { %v7157_v15 = vpop.permute.xlu1 %1084  ;;  %v7159_v16 = vpop.permute.xlu0 %1082 }
 0x195   : > { %1328 = vrot.lane.b32.xlu1 %v6594_v21, %s5945_s10  ;;  %1326 = vrot.lane.b32.xlu0 %v6597_v22, %s5945_s10 }
 0x197   : > { %v7165_v17 = vpop.permute.xlu1 %1088  ;;  %v7167_v18 = vpop.permute.xlu0 %1086 }
 0x198   : > { %9648 = vst [vmem:[#allocation76_spill] sm:$0xff] %v7167_v18 }
 0x199   : > { %1332 = vrot.lane.b32.xlu1 %v6604_v23, %s5945_s10  ;;  %1330 = vrot.lane.b32.xlu0 %v6607_v24, %s5945_s10  ;;  %v5120_v23 = vld [vmem:[%s6497_s29 + $0x159] sm:$0xff]  ;;  %v5119_v24 = vld [vmem:[%s6497_s29 + $0x151] sm:$0xff] }
 0x19b   : > { %v7173_v19 = vpop.permute.xlu1 %1092  ;;  %v7175_v20 = vpop.permute.xlu0 %1090 }
 0x19c   : > { %9649 = vst [vmem:[#allocation77_spill] sm:$0xff] %v7173_v19  ;;  %9650 = vst [vmem:[#allocation78_spill] sm:$0xff] %v7175_v20  ;;  %v455_v19 = vld [vmem:[%s6497_s29] sm:$0xff] }
 0x19d   : > { %1336 = vrot.lane.b32.xlu1 %v6614_v25, %s5945_s10  ;;  %1334 = vrot.lane.b32.xlu0 %v6617_v26, %s5945_s10  ;;  %v5122_v26 = vld [vmem:[%s6497_s29 + $0x171] sm:$0xff] }
 0x19f   : > { %v7181_v21 = vpop.permute.xlu1 %1096  ;;  %v7183_v22 = vpop.permute.xlu0 %1094 }
 0x1a0   : > { %9651 = vst [vmem:[#allocation79_spill] sm:$0xff] %v7181_v21  ;;  %9652 = vst [vmem:[#allocation80_spill] sm:$0xff] %v7183_v22  ;;  %v5121_v22 = vld [vmem:[%s6497_s29 + $0x169] sm:$0xff] }
 0x1a1   : > { %1340 = vrot.lane.b32.xlu1 %v6624_v27, %s5945_s10  ;;  %1338 = vrot.lane.b32.xlu0 %v6627_v28, %s5945_s10  ;;  %v5124_v28 = vld [vmem:[%s6497_s29 + $0x189] sm:$0xff] }
 0x1a3   : > { %v7191_v20 = vpop.permute.xlu1 %1100  ;;  %v7193_v25 = vpop.permute.xlu0 %1098 }
 0x1a4   : > { %9653 = vst [vmem:[#allocation81_spill] sm:$0xff] %v7191_v20  ;;  %9654 = vst [vmem:[#allocation82_spill] sm:$0xff] %v7193_v25  ;;  %v5123_v20 = vld [vmem:[%s6497_s29 + $0x181] sm:$0xff] }
 0x1a5   : > { %1344 = vrot.lane.b32.xlu1 %v5120_v23, %s5945_s10  ;;  %1342 = vrot.lane.b32.xlu0 %v5119_v24, %s5945_s10  ;;  %v5126_v24 = vld [vmem:[%s6497_s29 + $0x1d1] sm:$0xff] }
 0x1a7   : > { %v7199_v21 = vpop.permute.xlu1 %1104  ;;  %v7201_v27 = vpop.permute.xlu0 %1102 }
 0x1a8   : > { %9655 = vst [vmem:[#allocation83_spill] sm:$0xff] %v7199_v21  ;;  %9656 = vst [vmem:[#allocation84_spill] sm:$0xff] %v7201_v27  ;;  %v5125_v21 = vld [vmem:[%s6497_s29 + $0x1c9] sm:$0xff] }
 0x1a9   : > { %1348 = vrot.lane.b32.xlu1 %v5122_v26, %s5945_s10  ;;  %1346 = vrot.lane.b32.xlu0 %v5121_v22, %s5945_s10  ;;  %v5128_v22 = vld [vmem:[%s6497_s29 + $0x1e9] sm:$0xff] }
 0x1ab   : > { %v7207_v25 = vpop.permute.xlu1 %1108  ;;  %v7209_v23 = vpop.permute.xlu0 %1106 }
 0x1ac   : > { %9657 = vst [vmem:[#allocation85_spill] sm:$0xff] %v7207_v25  ;;  %9658 = vst [vmem:[#allocation86_spill] sm:$0xff] %v7209_v23  ;;  %v5127_v25 = vld [vmem:[%s6497_s29 + $0x1e1] sm:$0xff] }
 0x1ad   : > { %1352 = vrot.lane.b32.xlu1 %v5124_v28, %s5945_s10  ;;  %1350 = vrot.lane.b32.xlu0 %v5123_v20, %s5945_s10  ;;  %v5130_v20 = vld [vmem:[%s6497_s29 + $0x201] sm:$0xff] }
 0x1af   : > { %v7215_v27 = vpop.permute.xlu1 %1112  ;;  %v7217_v26 = vpop.permute.xlu0 %1110 }
 0x1b0   : > { %9659 = vst [vmem:[#allocation87_spill] sm:$0xff] %v7215_v27  ;;  %9660 = vst [vmem:[#allocation88_spill] sm:$0xff] %v7217_v26  ;;  %v5129_v27 = vld [vmem:[%s6497_s29 + $0x1f9] sm:$0xff] }
 0x1b1   : > { %1356 = vrot.lane.b32.xlu1 %v5126_v24, %s5945_s10  ;;  %1354 = vrot.lane.b32.xlu0 %v5125_v21, %s5945_s10  ;;  %v5132_v21 = vld [vmem:[%s6497_s29 + $0x219] sm:$0xff] }
 0x1b3   : > { %v7223_v23 = vpop.permute.xlu1 %1116  ;;  %v7225_v28 = vpop.permute.xlu0 %1114 }
 0x1b4   : > { %9661 = vst [vmem:[#allocation89_spill] sm:$0xff] %v7223_v23  ;;  %9662 = vst [vmem:[#allocation90_spill] sm:$0xff] %v7225_v28  ;;  %v5131_v23 = vld [vmem:[%s6497_s29 + $0x211] sm:$0xff] }
 0x1b5   : > { %1360 = vrot.lane.b32.xlu1 %v5128_v22, %s5945_s10  ;;  %1358 = vrot.lane.b32.xlu0 %v5127_v25, %s5945_s10  ;;  %v5134_v25 = vld [vmem:[%s6497_s29 + $0x231] sm:$0xff] }
 0x1b7   : > { %v7231_v26 = vpop.permute.xlu1 %1120  ;;  %v7233_v24 = vpop.permute.xlu0 %1118 }
 0x1b8   : > { %9663 = vst [vmem:[#allocation91_spill] sm:$0xff] %v7231_v26  ;;  %9664 = vst [vmem:[#allocation92_spill] sm:$0xff] %v7233_v24  ;;  %v5133_v26 = vld [vmem:[%s6497_s29 + $0x229] sm:$0xff] }
 0x1b9   : > { %1364 = vrot.lane.b32.xlu1 %v5130_v20, %s5945_s10  ;;  %1362 = vrot.lane.b32.xlu0 %v5129_v27, %s5945_s10  ;;  %v5136_v27 = vld [vmem:[%s6497_s29 + $0x249] sm:$0xff] }
 0x1bb   : > { %v7239_v28 = vpop.permute.xlu1 %1124  ;;  %v7241_v22 = vpop.permute.xlu0 %1122 }
 0x1bc   : > { %9665 = vst [vmem:[#allocation93_spill] sm:$0xff] %v7239_v28  ;;  %9666 = vst [vmem:[#allocation94_spill] sm:$0xff] %v7241_v22  ;;  %v5135_v28 = vld [vmem:[%s6497_s29 + $0x241] sm:$0xff] }
 0x1bd   : > { %1368 = vrot.lane.b32.xlu1 %v5132_v21, %s5945_s10  ;;  %1366 = vrot.lane.b32.xlu0 %v5131_v23, %s5945_s10  ;;  %v5138_v23 = vld [vmem:[%s6497_s29 + $0x261] sm:$0xff] }
 0x1bf   : > { %v7247_v24 = vpop.permute.xlu1 %1128  ;;  %v7249_v20 = vpop.permute.xlu0 %1126 }
 0x1c0   : > { %9667 = vst [vmem:[#allocation95_spill] sm:$0xff] %v7247_v24  ;;  %9668 = vst [vmem:[#allocation96_spill] sm:$0xff] %v7249_v20  ;;  %v5137_v24 = vld [vmem:[%s6497_s29 + $0x259] sm:$0xff] }
 0x1c1   : > { %1372 = vrot.lane.b32.xlu1 %v5134_v25, %s5945_s10  ;;  %1370 = vrot.lane.b32.xlu0 %v5133_v26, %s5945_s10  ;;  %v5140_v26 = vld [vmem:[%s6497_s29 + $0x279] sm:$0xff] }
 0x1c3   : > { %v7255_v22 = vpop.permute.xlu1 %1132  ;;  %v7257_v21 = vpop.permute.xlu0 %1130 }
 0x1c4   : > { %9669 = vst [vmem:[#allocation97_spill] sm:$0xff] %v7255_v22  ;;  %9670 = vst [vmem:[#allocation98_spill] sm:$0xff] %v7257_v21  ;;  %v5139_v22 = vld [vmem:[%s6497_s29 + $0x271] sm:$0xff] }
 0x1c5   : > { %1376 = vrot.lane.b32.xlu1 %v5136_v27, %s5945_s10  ;;  %1374 = vrot.lane.b32.xlu0 %v5135_v28, %s5945_s10  ;;  %v5142_v28 = vld [vmem:[%s6497_s29 + $0x291] sm:$0xff] }
 0x1c7   : > { %v7263_v20 = vpop.permute.xlu1 %1136  ;;  %v7265_v25 = vpop.permute.xlu0 %1134 }
 0x1c8   : > { %9671 = vst [vmem:[#allocation99_spill] sm:$0xff] %v7263_v20  ;;  %9672 = vst [vmem:[#allocation100_spill] sm:$0xff] %v7265_v25  ;;  %v5141_v20 = vld [vmem:[%s6497_s29 + $0x289] sm:$0xff] }
 0x1c9   : > { %1380 = vrot.lane.b32.xlu1 %v5138_v23, %s5945_s10  ;;  %1378 = vrot.lane.b32.xlu0 %v5137_v24, %s5945_s10  ;;  %v5144_v24 = vld [vmem:[%s6497_s29 + $0x2a9] sm:$0xff] }
 0x1cb   : > { %v7271_v21 = vpop.permute.xlu1 %1140  ;;  %v7273_v27 = vpop.permute.xlu0 %1138 }
 0x1cc   : > { %9673 = vst [vmem:[#allocation101_spill] sm:$0xff] %v7271_v21  ;;  %9674 = vst [vmem:[#allocation102_spill] sm:$0xff] %v7273_v27  ;;  %v5143_v21 = vld [vmem:[%s6497_s29 + $0x2a1] sm:$0xff] }
 0x1cd   : > { %1384 = vrot.lane.b32.xlu1 %v5140_v26, %s5945_s10  ;;  %1382 = vrot.lane.b32.xlu0 %v5139_v22, %s5945_s10  ;;  %v5146_v22 = vld [vmem:[%s6497_s29 + $0x2c1] sm:$0xff] }
 0x1cf   : > { %v7279_v25 = vpop.permute.xlu1 %1144  ;;  %v7281_v23 = vpop.permute.xlu0 %1142 }
 0x1d0   : > { %9675 = vst [vmem:[#allocation103_spill] sm:$0xff] %v7279_v25  ;;  %9676 = vst [vmem:[#allocation104_spill] sm:$0xff] %v7281_v23  ;;  %v5145_v23 = vld [vmem:[%s6497_s29 + $0x2b9] sm:$0xff] }
 0x1d1   : > { %1388 = vrot.lane.b32.xlu1 %v5142_v28, %s5945_s10  ;;  %1386 = vrot.lane.b32.xlu0 %v5141_v20, %s5945_s10  ;;  %v5148_v20 = vld [vmem:[%s6497_s29 + $0x2d9] sm:$0xff] }
 0x1d3   : > { %v7287_v27 = vpop.permute.xlu1 %1148  ;;  %v7289_v26 = vpop.permute.xlu0 %1146 }
 0x1d4   : > { %9677 = vst [vmem:[#allocation105_spill] sm:$0xff] %v7287_v27  ;;  %9678 = vst [vmem:[#allocation106_spill] sm:$0xff] %v7289_v26  ;;  %v5147_v27 = vld [vmem:[%s6497_s29 + $0x2d1] sm:$0xff] }
 0x1d5   : > { %1392 = vrot.lane.b32.xlu1 %v5144_v24, %s5945_s10  ;;  %1390 = vrot.lane.b32.xlu0 %v5143_v21, %s5945_s10  ;;  %v5150_v21 = vld [vmem:[%s6497_s29 + $0x2f1] sm:$0xff] }
 0x1d7   : > { %v7295_v25 = vpop.permute.xlu1 %1152  ;;  %v7297_v28 = vpop.permute.xlu0 %1150 }
 0x1d8   : > { %9679 = vst [vmem:[#allocation107_spill] sm:$0xff] %v7295_v25  ;;  %9680 = vst [vmem:[#allocation108_spill] sm:$0xff] %v7297_v28  ;;  %v5149_v25 = vld [vmem:[%s6497_s29 + $0x2e9] sm:$0xff] }
 0x1d9   : > { %1396 = vrot.lane.b32.xlu1 %v5146_v22, %s5945_s10  ;;  %1394 = vrot.lane.b32.xlu0 %v5145_v23, %s5945_s10  ;;  %v456_v28 = vld [vmem:[%s6497_s29 + $0x8] sm:$0xff]  ;;  %v1482_v23 = vsel %vm212_vm0, %v455_v19, %v6697_v62 }
 0x1db   : > { %v7303_v26 = vpop.permute.xlu1 %1156  ;;  %v7305_v24 = vpop.permute.xlu0 %1154 }
 0x1dc   : > { %9681 = vst [vmem:[#allocation109_spill] sm:$0xff] %v7303_v26  ;;  %9682 = vst [vmem:[#allocation110_spill] sm:$0xff] %v7305_v24  ;;  %v5151_v24 = vld [vmem:[%s6497_s29 + $0x301] sm:$0xff] }
 0x1dd   : > { %1400 = vrot.lane.b32.xlu1 %v5148_v20, %s5945_s10  ;;  %1398 = vrot.lane.b32.xlu0 %v5147_v27, %s5945_s10  ;;  %v1483_v27 = vsel %vm212_vm0, %v456_v28, %v6705_v4  ;;  %v5152_v20 = vld [vmem:[%s6497_s29 + $0x309] sm:$0xff]  ;;  %v1484_v4 = vsel %vm212_vm0, %v6722_v35, %v6695_v61 }
 0x1df   : > { %v7313_v18 = vpop.permute.xlu1 %1160  ;;  %v7315_v22 = vpop.permute.xlu0 %1158 }
 0x1e0   : > { %9683 = vst [vmem:[#allocation111_spill] sm:$0xff] %v7313_v18  ;;  %9684 = vst [vmem:[#allocation112_spill] sm:$0xff] %v7315_v22  ;;  %v1548_v18 = vsel %vm1546_vm2, %v1483_v27, %v7061_v0  ;;  %v1547_v22 = vsel %vm1546_vm2, %v1482_v23, %v7063_v58  ;;  %v1485_v0 = vsel %vm212_vm0, %v6725_v36, %v6703_v2  ;;  %v5154_v58 = vld [vmem:[%s6497_s29 + $0x321] sm:$0xff] }
 0x1e1   : > { %1404 = vrot.lane.b32.xlu1 %v5150_v21, %s5945_s10  ;;  %1402 = vrot.lane.b32.xlu0 %v5149_v25, %s5945_s10  ;;  %v1550_v19 = vsel %vm1546_vm2, %v1485_v0, %v7069_v30  ;;  %v1487_v36 = vsel %vm212_vm0, %v6736_v39, %v6711_v31  ;;  %v1486_v30 = vsel %vm212_vm0, %v6739_v40, %v6713_v32 }
 0x1e2   : > { %v1551_v23 = vsel %vm1546_vm2, %v1486_v30, %v7081_v49  ;;  %v1489_v40 = vsel %vm212_vm0, %v6750_v43, %v6717_v33  ;;  %v2466_v49 = vld [vmem:[%s6497_s29 + $0xa] sm:$0xff]  ;;  %v9685_v30 = vld [vmem:[#allocation4_spill] sm:$0xff] }
 0x1e3   : > { %v1293_v21 = vpop.permute.xlu1 %1292  ;;  %v1291_v26 = vpop.permute.xlu0 %1290 }
 0x1e4   : > { %v1613_v25 = vsel %vm1611_vm3, %v1548_v18, %v1293_v21  ;;  %v1612_v62 = vsel %vm1611_vm3, %v1547_v22, %v1291_v26  ;;  %v5153_v18 = vld [vmem:[%s6497_s29 + $0x319] sm:$0xff]  ;;  %v1549_v26 = vsel %vm1546_vm2, %v1484_v4, %v7071_v50  ;;  %v1552_v22 = vsel %vm1546_vm2, %v1487_v36, %v7079_v54 }
 0x1e5   : > { %1408 = vrot.lane.b32.xlu1 %v5152_v20, %s5945_s10  ;;  %1406 = vrot.lane.b32.xlu0 %v5151_v24, %s5945_s10  ;;  %v5156_v50 = vld [vmem:[%s6497_s29 + $0x339] sm:$0xff]  ;;  %v5155_v24 = vld [vmem:[%s6497_s29 + $0x331] sm:$0xff]  ;;  %v1488_v54 = vsel %vm212_vm0, %v6753_v44, %v6719_v34  ;;  %v1554_v21 = vsel %vm1546_vm2, %v1489_v40, %v7085_v57  ;;  %v1491_v44 = vsel %vm212_vm0, %v6764_v47, %v6731_v37 }
 0x1e6   : > { %5511 = vmatprep.mubr.msk.f32.mxu0 %vm1683_vm4, %v1612_v62  ;;  %v2465_v20 = vld [vmem:[%s6497_s29 + $0x2] sm:$0xff]  ;;  %v1490_v57 = vsel %vm212_vm0, %v6767_v48, %v6733_v38  ;;  %v7398_v4 = vld [vmem:[%s6497_s29 + $0x1a] sm:$0xff]  ;;  %v1556_v0 = vsel %vm1546_vm2, %v1491_v44, %v7093_v60  ;;  %v1493_v60 = vsel %vm212_vm0, %v6778_v51, %v6745_v41 }
 0x1e7   : > { %5512 = vmatmul.mubr.msk.f32.vlgmr.msra.gmra.mrb[0].mxu0 %vm1683_vm4, %v1613_v25  ;;  %v1297_v28 = vpop.permute.xlu1 %1296  ;;  %v1295_v61 = vpop.permute.xlu0 %1294  ;;  %v1553_v25 = vsel %vm1546_vm2, %v1488_v54, %v7087_v29  ;;  %v7395_v29 = vld [vmem:[%s6497_s29 + $0x22] sm:$0xff] }
 0x1e8   : > { %v1615_v35 = vsel %vm1611_vm3, %v1550_v19, %v1297_v28  ;;  %v1614_v2 = vsel %vm1611_vm3, %v1549_v26, %v1295_v61  ;;  %v7422_v19 = vld [vmem:[%s6497_s29 + $0x32] sm:$0xff]  ;;  %v1558_v26 = vsel %vm1546_vm2, %v1493_v60, %v7101_v53  ;;  %v1495_v53 = vsel %vm212_vm0, %v6792_v55, %v6759_v45 }
 0x1e9   : > { %1412 = vrot.lane.b32.xlu1 %v5154_v58, %s5945_s10  ;;  %1410 = vrot.lane.b32.xlu0 %v5153_v18, %s5945_s10  ;;  %v1555_v58 = vsel %vm1546_vm2, %v1490_v57, %v7095_v63  ;;  %v1492_v63 = vsel %vm212_vm0, %v6781_v52, %v6747_v42  ;;  %v7419_v18 = vld [vmem:[%s6497_s29 + $0x3a] sm:$0xff]  ;;  %v7443_v61 = vld [vmem:[%s6497_s29 + $0x52] sm:$0xff] }
 0x1ea   : > { %5514 = vmatprep.mubr.msk.f32.mxu0 %vm1683_vm4, %v1614_v2  ;;  %v1557_v28 = vsel %vm1546_vm2, %v1492_v63, %v7103_v59  ;;  %v1494_v59 = vsel %vm212_vm0, %v6795_v56, %v6761_v46  ;;  %v1560_v2 = vsel %vm1546_vm2, %v1495_v53, %v7109_v1  ;;  %v7515_v63 = vld [vmem:[%s6497_s29 + $0x9a] sm:$0xff] }
 0x1eb   : > { %5515 = vmatmul.mubr.msk.f32.gmra.mrb[2].mxu0 %vm1683_vm4, %v1615_v35  ;;  %v1301_v27 = vpop.permute.xlu1 %1300  ;;  %v1299_v31 = vpop.permute.xlu0 %1298  ;;  %v7446_v35 = vld [vmem:[%s6497_s29 + $0x4a] sm:$0xff]  ;;  %v1559_v36 = vsel %vm1546_vm2, %v1494_v59, %v7111_v3  ;;  %v9688_v3 = vld [vmem:[#allocation11_spill] sm:$0xff]  ;;  %v9697_v59 = vld [vmem:[#allocation12_spill] sm:$0xff] }
 0x1ec   : > { %v1617_v39 = vsel %vm1611_vm3, %v1552_v22, %v1301_v27  ;;  %v1616_v32 = vsel %vm1611_vm3, %v1551_v23, %v1299_v31  ;;  %v7467_v23 = vld [vmem:[%s6497_s29 + $0x6a] sm:$0xff]  ;;  %v7470_v27 = vld [vmem:[%s6497_s29 + $0x62] sm:$0xff] }
 0x1ed   : > { %1416 = vrot.lane.b32.xlu1 %v5156_v50, %s5945_s10  ;;  %1414 = vrot.lane.b32.xlu0 %v5155_v24, %s5945_s10  ;;  %v9686_v50 = vld [vmem:[#allocation10_spill] sm:$0xff]  ;;  %v9687_v24 = vld [vmem:[#allocation5_spill] sm:$0xff] }
 0x1ee   : > { %5517 = vmatprep.mubr.msk.f32.mxu0 %vm1683_vm4, %v1616_v32  ;;  %v1497_v1 = vsel %vm212_vm0, %v9686_v50, %v9685_v30  ;;  %v1496_v22 = vsel %vm212_vm0, %v9688_v3, %v9687_v24 }
 0x1ef   : > { %5518 = vmatmul.mubr.msk.f32.gmra.mrb[4].mxu0 %vm1683_vm4, %v1617_v39  ;;  %v1305_v62 = vpop.permute.xlu1 %1304  ;;  %v1303_v33 = vpop.permute.xlu0 %1302  ;;  %v1562_v31 = vsel %vm1546_vm2, %v1497_v1, %v7117_v5  ;;  %v1561_v39 = vsel %vm1546_vm2, %v1496_v22, %v7119_v6  ;;  %v9692_v6 = vld [vmem:[#allocation15_spill] sm:$0xff]  ;;  %v9701_v22 = vld [vmem:[#allocation16_spill] sm:$0xff] }
 0x1f0   : > { %v1619_v43 = vsel %vm1611_vm3, %v1554_v21, %v1305_v62  ;;  %v1618_v34 = vsel %vm1611_vm3, %v1553_v25, %v1303_v33  ;;  %v9690_v21 = vld [vmem:[#allocation14_spill] sm:$0xff]  ;;  %v9691_v25 = vld [vmem:[#allocation7_spill] sm:$0xff]  ;;  %v7491_v33 = vld [vmem:[%s6497_s29 + $0x82] sm:$0xff] }
 0x1f1   : > { %2659 = vrot.lane.b32.xlu1 %v2466_v49, %s5943_s30  ;;  %2657 = vrot.lane.b32.xlu0 %v2465_v20, %s5943_s30  ;;  %v9689_v20 = vld [vmem:[#allocation6_spill] sm:$0xff]  ;;  %v1498_v62 = vsel %vm212_vm0, %v9692_v6, %v9691_v25 }
 0x1f2   : > { %5520 = vmatprep.mubr.msk.f32.mxu0 %vm1683_vm4, %v1618_v34  ;;  %v1499_v5 = vsel %vm212_vm0, %v9690_v21, %v9689_v20  ;;  %v1563_v44 = vsel %vm1546_vm2, %v1498_v62, %v7127_v8  ;;  %v9696_v8 = vld [vmem:[#allocation19_spill] sm:$0xff]  ;;  %v9706_v62 = vld [vmem:[#allocation30_spill] sm:$0xff] }
 0x1f3   : > { %5521 = vmatmul.mubr.msk.f32.gmra.mrb[6].mxu0 %vm1683_vm4, %v1619_v43  ;;  %v1309_v37 = vpop.permute.xlu1 %1308  ;;  %v1307_v47 = vpop.permute.xlu0 %1306  ;;  %v7494_v43 = vld [vmem:[%s6497_s29 + $0x7a] sm:$0xff]  ;;  %v1564_v34 = vsel %vm1546_vm2, %v1499_v5, %v7125_v7 }
 0x1f4   : > { %v1621_v38 = vsel %vm1611_vm3, %v1556_v0, %v1309_v37  ;;  %v1620_v48 = vsel %vm1611_vm3, %v1555_v58, %v1307_v47  ;;  %v9693_v47 = vld [vmem:[#allocation8_spill] sm:$0xff] }
 0x1f5   : > { %2663 = vrot.lane.b32.xlu1 %v7395_v29, %s5943_s30  ;;  %2661 = vrot.lane.b32.xlu0 %v7398_v4, %s5943_s30 }
 0x1f6   : > { %5523 = vmatprep.mubr.msk.f32.mxu0 %vm1683_vm4, %v1620_v48  ;;  %v9695_v48 = vld [vmem:[#allocation9_spill] sm:$0xff] }
 0x1f7   : > { %5524 = vmatmul.mubr.msk.f32.gmra.mrb[8].mxu0 %vm1683_vm4, %v1621_v38  ;;  %v1313_v41 = vpop.permute.xlu1 %1312  ;;  %v1311_v51 = vpop.permute.xlu0 %1310  ;;  %v9694_v38 = vld [vmem:[#allocation18_spill] sm:$0xff]  ;;  %v1500_v60 = vsel %vm212_vm0, %v9696_v8, %v9695_v48  ;;  %v5291_v48 = vld [vmem:[%s7039_s9 + $0x20] sm:$0xff]  ;;  %v5292_v8 = vld [vmem:[%s7039_s9 + $0x28] sm:$0xff] }
 0x1f8   : > { %v1623_v42 = vsel %vm1611_vm3, %v1558_v26, %v1313_v41  ;;  %v1622_v52 = vsel %vm1611_vm3, %v1557_v28, %v1311_v51  ;;  %v1501_v7 = vsel %vm212_vm0, %v9694_v38, %v9693_v47  ;;  %v7518_v26 = vld [vmem:[%s6497_s29 + $0x92] sm:$0xff]  ;;  %v1565_v41 = vsel %vm1546_vm2, %v1500_v60, %v7135_v10 }
 0x1f9   : > { %2667 = vrot.lane.b32.xlu1 %v7419_v18, %s5943_s30  ;;  %2665 = vrot.lane.b32.xlu0 %v7422_v19, %s5943_s30  ;;  %v1566_v28 = vsel %vm1546_vm2, %v1501_v7, %v7133_v9  ;;  %v9700_v10 = vld [vmem:[#allocation23_spill] sm:$0xff] }
 0x1fa   : > { %5526 = vmatprep.mubr.msk.f32.mxu0 %vm1683_vm4, %v1622_v52 }
 0x1fb   : > { %5527 = vmatmul.mubr.msk.f32.gmra.mrb[10].mxu0 %vm1683_vm4, %v1623_v42  ;;  %v1317_v45 = vpop.permute.xlu1 %1316  ;;  %v1315_v55 = vpop.permute.xlu0 %1314 }
 0x1fc   : > { %v1625_v46 = vsel %vm1611_vm3, %v1560_v2, %v1317_v45  ;;  %v1624_v56 = vsel %vm1611_vm3, %v1559_v36, %v1315_v55  ;;  %v9698_v2 = vld [vmem:[#allocation22_spill] sm:$0xff]  ;;  %v9699_v36 = vld [vmem:[#allocation13_spill] sm:$0xff] }
 0x1fd   : > { %2671 = vrot.lane.b32.xlu1 %v7443_v61, %s5943_s30  ;;  %2669 = vrot.lane.b32.xlu0 %v7446_v35, %s5943_s30  ;;  %v1503_v9 = vsel %vm212_vm0, %v9698_v2, %v9697_v59  ;;  %v1502_v45 = vsel %vm212_vm0, %v9700_v10, %v9699_v36  ;;  %v7539_v55 = vld [vmem:[%s6497_s29 + $0xb2] sm:$0xff]  ;;  %v7613_v59 = vld [vmem:[%s6497_s29 + $0xfa] sm:$0xff] }
 0x1fe   : > { %5529 = vmatprep.mubr.msk.f32.mxu0 %vm1683_vm4, %v1624_v56  ;;  %v1568_v56 = vsel %vm1546_vm2, %v1503_v9, %v7141_v11  ;;  %v1567_v30 = vsel %vm1546_vm2, %v1502_v45, %v7143_v12  ;;  %v9704_v12 = vld [vmem:[#allocation27_spill] sm:$0xff]  ;;  %v9713_v36 = vld [vmem:[#allocation76_spill] sm:$0xff] }
 0x1ff   : > { %5530 = vmatmul.mubr.msk.f32.gmra.mrb[12].mxu0 %vm1683_vm4, %v1625_v46  ;;  %v1321_v32 = vpop.permute.xlu1 %1320  ;;  %v1319_v40 = vpop.permute.xlu0 %1318  ;;  %v7542_v46 = vld [vmem:[%s6497_s29 + $0xaa] sm:$0xff]  ;;  %v7616_v2 = vld [vmem:[%s6497_s29 + $0xf2] sm:$0xff] }
 0x200   : > { %v1627_v54 = vsel %vm1611_vm3, %v1562_v31, %v1321_v32  ;;  %v1626_v49 = vsel %vm1611_vm3, %v1561_v39, %v1319_v40  ;;  %v9702_v31 = vld [vmem:[#allocation26_spill] sm:$0xff]  ;;  %v9703_v39 = vld [vmem:[#allocation17_spill] sm:$0xff] }
 0x201   : > { %2675 = vrot.lane.b32.xlu1 %v7467_v23, %s5943_s30  ;;  %2673 = vrot.lane.b32.xlu0 %v7470_v27, %s5943_s30  ;;  %v1505_v11 = vsel %vm212_vm0, %v9702_v31, %v9701_v22  ;;  %v1504_v32 = vsel %vm212_vm0, %v9704_v12, %v9703_v39  ;;  %v7563_v40 = vld [vmem:[%s6497_s29 + $0xca] sm:$0xff]  ;;  %v9717_v39 = vld [vmem:[#allocation39_spill] sm:$0xff] }
 0x202   : > { %5532 = vmatprep.mubr.msk.f32.mxu0 %vm1683_vm4, %v1626_v49  ;;  %v1570_v49 = vsel %vm1546_vm2, %v1505_v11, %v7149_v13  ;;  %v1569_v20 = vsel %vm1546_vm2, %v1504_v32, %v7151_v14  ;;  %v9705_v13 = vld [vmem:[#allocation20_spill] sm:$0xff]  ;;  %v9715_v22 = vld [vmem:[#allocation38_spill] sm:$0xff]  ;;  %v9716_v11 = vld [vmem:[#allocation29_spill] sm:$0xff] }
 0x203   : > { %5533 = vmatmul.mubr.msk.f32.gmra.mrb[14].mxu0 %vm1683_vm4, %v1627_v54  ;;  %v1325_v57 = vpop.permute.xlu1 %1324  ;;  %v1323_v0 = vpop.permute.xlu0 %1322  ;;  %v7566_v54 = vld [vmem:[%s6497_s29 + $0xc2] sm:$0xff]  ;;  %v1507_v14 = vsel %vm212_vm0, %v9706_v62, %v9705_v13  ;;  %v1510_v12 = vsel %vm212_vm0, %v9717_v39, %v9716_v11  ;;  %v7639_v32 = vld [vmem:[%s6497_s29 + $0x112] sm:$0xff] }
 0x204   : > { %v1629_v58 = vsel %vm1611_vm3, %v1564_v34, %v1325_v57  ;;  %v1628_v37 = vsel %vm1611_vm3, %v1563_v44, %v1323_v0  ;;  %v9707_v34 = vld [vmem:[#allocation21_spill] sm:$0xff]  ;;  %v9708_v44 = vld [vmem:[#allocation31_spill] sm:$0xff]  ;;  %v9730_v11 = vld [vmem:[#allocation40_spill] sm:$0xff] }
 0x205   : > { %2679 = vrot.lane.b32.xlu1 %v7491_v33, %s5943_s30  ;;  %2677 = vrot.lane.b32.xlu0 %v7494_v43, %s5943_s30  ;;  %v1506_v57 = vsel %vm212_vm0, %v9708_v44, %v9707_v34  ;;  %v7587_v0 = vld [vmem:[%s6497_s29 + $0xe2] sm:$0xff]  ;;  %v9721_v44 = vld [vmem:[#allocation42_spill] sm:$0xff] }
 0x206   : > { %5535 = vmatprep.mubr.msk.f32.mxu0 %vm1683_vm4, %v1628_v37  ;;  %v1572_v37 = vsel %vm1546_vm2, %v1507_v14, %v7157_v15  ;;  %v1571_v47 = vsel %vm1546_vm2, %v1506_v57, %v7159_v16  ;;  %v9709_v15 = vld [vmem:[#allocation24_spill] sm:$0xff]  ;;  %v9710_v16 = vld [vmem:[#allocation34_spill] sm:$0xff] }
 0x207   : > { %5536 = vmatmul.mubr.msk.f32.gmra.mrb[16].mxu0 %vm1683_vm4, %v1629_v58  ;;  %v1329_v51 = vpop.permute.xlu1 %1328  ;;  %v1327_v42 = vpop.permute.xlu0 %1326  ;;  %v7590_v58 = vld [vmem:[%s6497_s29 + $0xda] sm:$0xff] }
 0x208   : > { %v1631_v52 = vsel %vm1611_vm3, %v1566_v28, %v1329_v51  ;;  %v1630_v53 = vsel %vm1611_vm3, %v1565_v41, %v1327_v42  ;;  %v5719_v41 = vpack.c.bf16 %v5292_v8, %v5291_v48  ;;  %v1509_v51 = vsel %vm212_vm0, %v9710_v16, %v9709_v15  ;;  %v9711_v42 = vld [vmem:[#allocation25_spill] sm:$0xff]  ;;  %v9720_v34 = vld [vmem:[#allocation32_spill] sm:$0xff]  ;;  %v488_v48 = vld [vmem:[%s6497_s29 + $0x1b8] sm:$0xff] }
 0x209   : > { %2683 = vrot.lane.b32.xlu1 %v7515_v63, %s5943_s30  ;;  %2681 = vrot.lane.b32.xlu0 %v7518_v26, %s5943_s30  ;;  %v1574_v9 = vsel %vm1546_vm2, %v1509_v51, %v7165_v17  ;;  %v9714_v17 = vld [vmem:[#allocation28_spill] sm:$0xff]  ;;  %v1513_v57 = vsel %vm212_vm0, %v9721_v44, %v9720_v34  ;;  %v487_v8 = vld [vmem:[%s6497_s29 + $0x1b0] sm:$0xff] }
 0x20a   : > { %5538 = vmatprep.mubr.msk.f32.mxu0 %vm1683_vm4, %v1630_v53  ;;  %5720 = vmatprep.subr.bf16.mxu1 %v5719_v41  ;;  %v1511_v31 = vsel %vm212_vm0, %v9715_v22, %v9714_v17  ;;  %v9731_v39 = vld [vmem:[#allocation48_spill] sm:$0xff] }
 0x20b   : > { %5539 = vmatmul.mubr.msk.f32.gmra.mrb[18].mxu0 %vm1683_vm4, %v1631_v52  ;;  %v1333_v50 = vpop.permute.xlu1 %1332  ;;  %v1331_v1 = vpop.permute.xlu0 %1330  ;;  %v9712_v52 = vld [vmem:[#allocation35_spill] sm:$0xff]  ;;  %5722 = vmatpush3.bf16.msra.mxu1 %v5719_v41  ;;  %v9725_v41 = vld [vmem:[#allocation80_spill] sm:$0xff] }
 0x20c   : > { %v1633_v24 = vsel %vm1611_vm3, %v1568_v56, %v1333_v50  ;;  %v1632_v3 = vsel %vm1611_vm3, %v1567_v30, %v1331_v1  ;;  %v1508_v53 = vsel %vm212_vm0, %v9712_v52, %v9711_v42  ;;  %v5293_v30 = vld [vmem:[%s7039_s9 + $0x30] sm:$0xff]  ;;  %v5294_v50 = vld [vmem:[%s7039_s9 + $0x38] sm:$0xff] }
 0x20d   : > { %2687 = vrot.lane.b32.xlu1 %v7539_v55, %s5943_s30  ;;  %2685 = vrot.lane.b32.xlu0 %v7542_v46, %s5943_s30  ;;  %v1573_v10 = vsel %vm1546_vm2, %v1508_v53, %v9713_v36  ;;  %v7675_v53 = vld [vmem:[%s6497_s29 + $0x19] sm:$0xff] }
 0x20e   : > { %5541 = vmatprep.mubr.msk.f32.mxu0 %vm1683_vm4, %v1632_v3  ;;  %v5723_v3 = vpack.c.bf16 %v5294_v50, %v5293_v30  ;;  %v9729_v50 = vld [vmem:[#allocation82_spill] sm:$0xff] }
 0x20f   : > { %5542 = vmatmul.mubr.msk.f32.gmra.mrb[20].mxu0 %vm1683_vm4, %v1633_v24  ;;  %v1337_v21 = vpop.permute.xlu1 %1336  ;;  %v1335_v5 = vpop.permute.xlu0 %1334 }
 0x210   : > { %v1635_v25 = vsel %vm1611_vm3, %v1570_v49, %v1337_v21  ;;  %v1634_v6 = vsel %vm1611_vm3, %v1569_v20, %v1335_v5  ;;  %v7642_v49 = vld [vmem:[%s6497_s29 + $0x10a] sm:$0xff]  ;;  %5724 = vmatprep.subr.bf16.mxu1 %v5723_v3 }
 0x211   : > { %2691 = vrot.lane.b32.xlu1 %v7563_v40, %s5943_s30  ;;  %2689 = vrot.lane.b32.xlu0 %v7566_v54, %s5943_s30  ;;  %v9718_v20 = vld [vmem:[#allocation77_spill] sm:$0xff]  ;;  %v9719_v5 = vld [vmem:[#allocation78_spill] sm:$0xff] }
 0x212   : > { %5544 = vmatprep.mubr.msk.f32.mxu0 %vm1683_vm4, %v1634_v6  ;;  %v1576_v21 = vsel %vm1546_vm2, %v1511_v31, %v9718_v20  ;;  %5726 = vmatpush3.bf16.msra.mxu1 %v5723_v3  ;;  %v7696_v31 = vld [vmem:[%s6497_s29 + $0x21] sm:$0xff] }
 0x213   : > { %5545 = vmatmul.mubr.msk.f32.gmra.mrb[22].mxu0 %vm1683_vm4, %v1635_v25  ;;  %v1341_v38 = vpop.permute.xlu1 %1340  ;;  %v1339_v7 = vpop.permute.xlu0 %1338  ;;  %v1575_v25 = vsel %vm1546_vm2, %v1510_v12, %v9719_v5  ;;  %v1517_v12 = vsel %vm212_vm0, %v9731_v39, %v9730_v11  ;;  %v9732_v20 = vld [vmem:[#allocation41_spill] sm:$0xff] }
 0x214   : > { %v1637_v60 = vsel %vm1611_vm3, %v1572_v37, %v1341_v38  ;;  %v1636_v28 = vsel %vm1611_vm3, %v1571_v47, %v1339_v7  ;;  %v9722_v37 = vld [vmem:[#allocation33_spill] sm:$0xff]  ;;  %v9723_v47 = vld [vmem:[#allocation43_spill] sm:$0xff] }
 0x215   : > { %2695 = vrot.lane.b32.xlu1 %v7587_v0, %s5943_s30  ;;  %2693 = vrot.lane.b32.xlu0 %v7590_v58, %s5943_s30  ;;  %v1512_v38 = vsel %vm212_vm0, %v9723_v47, %v9722_v37  ;;  %v7663_v7 = vld [vmem:[%s6497_s29 + $0x122] sm:$0xff] }
 0x216   : > { %5547 = vmatprep.mubr.msk.f32.mxu0 %vm1683_vm4, %v1636_v28  ;;  %v1577_v15 = vsel %vm1546_vm2, %v1512_v38, %v9725_v41  ;;  %v9736_v37 = vld [vmem:[#allocation44_spill] sm:$0xff] }
 0x217   : > { %5548 = vmatmul.mubr.msk.f32.gmra.mrb[24].mxu0 %vm1683_vm4, %v1637_v60  ;;  %v1345_v45 = vpop.permute.xlu1 %1344  ;;  %v1343_v56 = vpop.permute.xlu0 %1342  ;;  %v9724_v60 = vld [vmem:[#allocation79_spill] sm:$0xff]  ;;  %v9737_v47 = vld [vmem:[#allocation52_spill] sm:$0xff] }
 0x218   : > { %v1639_v1 = vsel %vm1611_vm3, %v1574_v9, %v1345_v45  ;;  %v1638_v24 = vsel %vm1611_vm3, %v1573_v10, %v1343_v56  ;;  %v1578_v28 = vsel %vm1546_vm2, %v1513_v57, %v9724_v60  ;;  %v9726_v9 = vld [vmem:[#allocation36_spill] sm:$0xff]  ;;  %v9727_v10 = vld [vmem:[#allocation37_spill] sm:$0xff]  ;;  %v7715_v57 = vld [vmem:[%s6497_s29 + $0x31] sm:$0xff]  ;;  %v1519_v38 = vsel %vm212_vm0, %v9737_v47, %v9736_v37 }
 0x219   : > { %2699 = vrot.lane.b32.xlu1 %v7613_v59, %s5943_s30  ;;  %2697 = vrot.lane.b32.xlu0 %v7616_v2, %s5943_s30  ;;  %v1515_v36 = vsel %vm212_vm0, %v488_v48, %v9726_v9  ;;  %v1514_v45 = vsel %vm212_vm0, %v487_v8, %v9727_v10  ;;  %v9728_v56 = vld [vmem:[#allocation81_spill] sm:$0xff]  ;;  %v7738_v9 = vld [vmem:[%s6497_s29 + $0x39] sm:$0xff]  ;;  %v9742_v10 = vld [vmem:[#allocation46_spill] sm:$0xff] }
 0x21a   : > { %5550 = vmatprep.mubr.msk.f32.mxu0 %vm1683_vm4, %v1638_v24  ;;  %v1580_v30 = vsel %vm1546_vm2, %v1515_v36, %v9728_v56  ;;  %v9738_v48 = vld [vmem:[#allocation45_spill] sm:$0xff]  ;;  %v5776_v36 = vld [vmem:[%s6497_s29 + $0x200] sm:$0xff]  ;;  %v5777_v56 = vld [vmem:[%s6497_s29 + $0x1f8] sm:$0xff] }
 0x21b   : > { %5551 = vmatmul.mubr.msk.f32.gmra.mrb[26].mxu0 %vm1683_vm4, %v1639_v1  ;;  %v1349_v6 = vpop.permute.xlu1 %1348  ;;  %v1347_v13 = vpop.permute.xlu0 %1346  ;;  %v1579_v1 = vsel %vm1546_vm2, %v1514_v45, %v9729_v50  ;;  %v9739_v8 = vld [vmem:[#allocation53_spill] sm:$0xff]  ;;  %v1521_v45 = vsel %vm212_vm0, %v5776_v36, %v9742_v10 }
 0x21c   : > { %v1641_v62 = vsel %vm1611_vm3, %v1576_v21, %v1349_v6  ;;  %v1640_v14 = vsel %vm1611_vm3, %v1575_v25, %v1347_v13  ;;  %v9733_v21 = vld [vmem:[#allocation49_spill] sm:$0xff]  ;;  %v9734_v25 = vld [vmem:[#allocation83_spill] sm:$0xff]  ;;  %v9735_v13 = vld [vmem:[#allocation84_spill] sm:$0xff]  ;;  %v1518_v60 = vsel %vm212_vm0, %v9739_v8, %v9738_v48 }
 0x21d   : > { %2703 = vrot.lane.b32.xlu1 %v7639_v32, %s5943_s30  ;;  %2701 = vrot.lane.b32.xlu0 %v7642_v49, %s5943_s30  ;;  %v1516_v5 = vsel %vm212_vm0, %v9733_v21, %v9732_v20  ;;  %v1582_v6 = vsel %vm1546_vm2, %v1517_v12, %v9734_v25  ;;  %v7757_v12 = vld [vmem:[%s6497_s29 + $0x49] sm:$0xff]  ;;  %v5779_v20 = vld [vmem:[%s6497_s29 + $0x218] sm:$0xff] }
 0x21e   : > { %5553 = vmatprep.mubr.msk.f32.mxu0 %vm1683_vm4, %v1640_v14  ;;  %v9746_v21 = vld [vmem:[#allocation50_spill] sm:$0xff] }
 0x21f   : > { %5554 = vmatmul.mubr.msk.f32.gmra.mrb[28].mxu0 %vm1683_vm4, %v1641_v62  ;;  %v1353_v16 = vpop.permute.xlu1 %1352  ;;  %v1351_v51 = vpop.permute.xlu0 %1350  ;;  %v5780_v25 = vld [vmem:[%s6497_s29 + $0x210] sm:$0xff] }
 0x220   : > { %v1643_v42 = vsel %vm1611_vm3, %v1578_v28, %v1353_v16  ;;  %v1642_v52 = vsel %vm1611_vm3, %v1577_v15, %v1351_v51  ;;  %v9740_v28 = vld [vmem:[#allocation85_spill] sm:$0xff]  ;;  %v9741_v15 = vld [vmem:[#allocation86_spill] sm:$0xff] }
 0x221   : > { %2849 = vrot.lane.b32.xlu1 %v7675_v53, %s5944_s5  ;;  %2705 = vrot.lane.b32.xlu0 %v7663_v7, %s5943_s30  ;;  %v1584_v41 = vsel %vm1546_vm2, %v1519_v38, %v9740_v28  ;;  %v1583_v16 = vsel %vm1546_vm2, %v1518_v60, %v9741_v15  ;;  %v7780_v38 = vld [vmem:[%s6497_s29 + $0x51] sm:$0xff]  ;;  %v5783_v28 = vld [vmem:[%s6497_s29 + $0x228] sm:$0xff] }
 0x222   : > { %5556 = vmatprep.mubr.msk.f32.mxu0 %vm1683_vm4, %v1642_v52  ;;  %v5782_v48 = vld [vmem:[%s6497_s29 + $0x230] sm:$0xff] }
 0x223   : > { %5557 = vmatmul.mubr.msk.f32.gmra.mrb[30].mxu0 %vm1683_vm4, %v1643_v42  ;;  %v1357_v24 = vpop.permute.xlu1 %1356  ;;  %v1355_v3 = vpop.permute.xlu0 %1354  ;;  %v9750_v8 = vld [vmem:[#allocation54_spill] sm:$0xff] }
 0x224   : > { %v1645_v17 = vsel %vm1611_vm3, %v1580_v30, %v1357_v24  ;;  %v1644_v22 = vsel %vm1611_vm3, %v1579_v1, %v1355_v3  ;;  %v9743_v30 = vld [vmem:[#allocation47_spill] sm:$0xff]  ;;  %v9745_v24 = vld [vmem:[#allocation88_spill] sm:$0xff]  ;;  %v1525_v60 = vsel %vm212_vm0, %v5782_v48, %v9750_v8 }
 0x225   : > { %3105 = vrot.lane.b32.xlu1 %v7398_v4, %s5945_s10  ;;  %2851 = vrot.lane.b32.xlu0 %v7696_v31, %s5944_s5  ;;  %v1581_v4 = vsel %vm1546_vm2, %v1516_v5, %v9735_v13  ;;  %v1520_v50 = vsel %vm212_vm0, %v5777_v56, %v9743_v30  ;;  %v9744_v1 = vld [vmem:[#allocation87_spill] sm:$0xff]  ;;  %v1523_v5 = vsel %vm212_vm0, %v5779_v20, %v9746_v21  ;;  %v5785_v56 = vld [vmem:[%s6497_s29 + $0x248] sm:$0xff]  ;;  %v9754_v30 = vld [vmem:[#allocation56_spill] sm:$0xff] }
 0x226   : > { %5559 = vmatprep.mubr.msk.f32.mxu0 %vm1683_vm4, %v1644_v22  ;;  %v1585_v3 = vsel %vm1546_vm2, %v1520_v50, %v9745_v24  ;;  %v1527_v50 = vsel %vm212_vm0, %v5785_v56, %v9754_v30 }
 0x227   : > { %5560 = vmatmul.mubr.msk.f32.gmra.mrb[32].mxu0 %vm1683_vm4, %v1645_v17  ;;  %v1361_v62 = vpop.permute.xlu1 %1360  ;;  %v1359_v14 = vpop.permute.xlu0 %1358 }
 0x228   : > { %v1647_v34 = vsel %vm1611_vm3, %v1582_v6, %v1361_v62  ;;  %v1646_v44 = vsel %vm1611_vm3, %v1581_v4, %v1359_v14  ;;  %v9747_v6 = vld [vmem:[#allocation51_spill] sm:$0xff]  ;;  %v9748_v4 = vld [vmem:[#allocation89_spill] sm:$0xff]  ;;  %v9749_v14 = vld [vmem:[#allocation90_spill] sm:$0xff] }
 0x229   : > { %2853 = vrot.lane.b32.xlu1 %v7715_v57, %s5944_s5  ;;  %3107 = vrot.lane.b32.xlu0 %v7395_v29, %s5945_s10  ;;  %v1522_v13 = vsel %vm212_vm0, %v5780_v25, %v9747_v6  ;;  %v1588_v62 = vsel %vm1546_vm2, %v1523_v5, %v9748_v4  ;;  %v7822_v5 = vld [vmem:[%s6497_s29 + $0x69] sm:$0xff]  ;;  %v5788_v25 = vld [vmem:[%s6497_s29 + $0x260] sm:$0xff] }
 0x22a   : > { %5562 = vmatprep.mubr.msk.f32.mxu0 %vm1683_vm4, %v1646_v44  ;;  %v9758_v6 = vld [vmem:[#allocation58_spill] sm:$0xff]  ;;  %v5789_v4 = vld [vmem:[%s6497_s29 + $0x258] sm:$0xff] }
 0x22b   : > { %5563 = vmatmul.mubr.msk.f32.gmra.mrb[34].mxu0 %vm1683_vm4, %v1647_v34  ;;  %v1365_v29 = vpop.permute.xlu1 %1364  ;;  %v1363_v51 = vpop.permute.xlu0 %1362  ;;  %v1587_v34 = vsel %vm1546_vm2, %v1522_v13, %v9749_v14  ;;  %v1529_v13 = vsel %vm212_vm0, %v5788_v25, %v9758_v6 }
 0x22c   : > { %v1649_v42 = vsel %vm1611_vm3, %v1584_v41, %v1365_v29  ;;  %v1648_v52 = vsel %vm1611_vm3, %v1583_v16, %v1363_v51  ;;  %v9751_v41 = vld [vmem:[#allocation55_spill] sm:$0xff]  ;;  %v9753_v29 = vld [vmem:[#allocation92_spill] sm:$0xff] }
 0x22d   : > { %3109 = vrot.lane.b32.xlu1 %v7422_v19, %s5945_s10  ;;  %2855 = vrot.lane.b32.xlu0 %v7738_v9, %s5944_s5  ;;  %v1586_v19 = vsel %vm1546_vm2, %v1521_v45, %v9744_v1  ;;  %v1524_v15 = vsel %vm212_vm0, %v5783_v28, %v9751_v41  ;;  %v9752_v16 = vld [vmem:[#allocation91_spill] sm:$0xff]  ;;  %v7799_v45 = vld [vmem:[%s6497_s29 + $0x61] sm:$0xff] }
 0x22e   : > { %5565 = vmatprep.mubr.msk.f32.mxu0 %vm1683_vm4, %v1648_v52  ;;  %v1589_v51 = vsel %vm1546_vm2, %v1524_v15, %v9753_v29  ;;  %v5786_v1 = vld [vmem:[%s6497_s29 + $0x240] sm:$0xff]  ;;  %v5791_v28 = vld [vmem:[%s6497_s29 + $0x278] sm:$0xff] }
 0x22f   : > { %5566 = vmatmul.mubr.msk.f32.gmra.mrb[36].mxu0 %vm1683_vm4, %v1649_v42  ;;  %v1369_v17 = vpop.permute.xlu1 %1368  ;;  %v1367_v22 = vpop.permute.xlu0 %1366  ;;  %v9762_v41 = vld [vmem:[#allocation60_spill] sm:$0xff] }
 0x230   : > { %v1651_v11 = vsel %vm1611_vm3, %v1586_v19, %v1369_v17  ;;  %v1650_v39 = vsel %vm1611_vm3, %v1585_v3, %v1367_v22  ;;  %v9755_v19 = vld [vmem:[#allocation57_spill] sm:$0xff]  ;;  %v9757_v22 = vld [vmem:[#allocation94_spill] sm:$0xff]  ;;  %v1531_v15 = vsel %vm212_vm0, %v5791_v28, %v9762_v41 }
 0x231   : > { %2857 = vrot.lane.b32.xlu1 %v7757_v12, %s5944_s5  ;;  %3111 = vrot.lane.b32.xlu0 %v7419_v18, %s5945_s10  ;;  %v1526_v24 = vsel %vm212_vm0, %v5786_v1, %v9755_v19  ;;  %v9756_v3 = vld [vmem:[#allocation93_spill] sm:$0xff]  ;;  %v5794_v1 = vld [vmem:[%s6497_s29 + $0x290] sm:$0xff] }
 0x232   : > { %5568 = vmatprep.mubr.msk.f32.mxu0 %vm1683_vm4, %v1650_v39  ;;  %v1592_v17 = vsel %vm1546_vm2, %v1527_v50, %v9756_v3  ;;  %v7864_v50 = vld [vmem:[%s6497_s29 + $0x81] sm:$0xff]  ;;  %v9766_v19 = vld [vmem:[#allocation62_spill] sm:$0xff] }
 0x233   : > { %5569 = vmatmul.mubr.msk.f32.gmra.mrb[38].mxu0 %vm1683_vm4, %v1651_v11  ;;  %v1373_v18 = vpop.permute.xlu1 %1372  ;;  %v1371_v44 = vpop.permute.xlu0 %1370  ;;  %v1591_v11 = vsel %vm1546_vm2, %v1526_v24, %v9757_v22  ;;  %v1533_v24 = vsel %vm212_vm0, %v5794_v1, %v9766_v19  ;;  %v5795_v3 = vld [vmem:[%s6497_s29 + $0x288] sm:$0xff] }
 0x234   : > { %v1653_v37 = vsel %vm1611_vm3, %v1588_v62, %v1373_v18  ;;  %v1652_v47 = vsel %vm1611_vm3, %v1587_v34, %v1371_v44  ;;  %v9759_v62 = vld [vmem:[#allocation59_spill] sm:$0xff]  ;;  %v9761_v18 = vld [vmem:[#allocation96_spill] sm:$0xff] }
 0x235   : > { %3113 = vrot.lane.b32.xlu1 %v7446_v35, %s5945_s10  ;;  %2859 = vrot.lane.b32.xlu0 %v7780_v38, %s5944_s5  ;;  %v1590_v35 = vsel %vm1546_vm2, %v1525_v60, %v9752_v16  ;;  %v1528_v14 = vsel %vm212_vm0, %v5789_v4, %v9759_v62  ;;  %v9760_v34 = vld [vmem:[#allocation95_spill] sm:$0xff]  ;;  %v5792_v16 = vld [vmem:[%s6497_s29 + $0x270] sm:$0xff]  ;;  %v5797_v4 = vld [vmem:[%s6497_s29 + $0x2a8] sm:$0xff] }
 0x236   : > { %5571 = vmatprep.mubr.msk.f32.mxu0 %vm1683_vm4, %v1652_v47  ;;  %v1593_v44 = vsel %vm1546_vm2, %v1528_v14, %v9761_v18  ;;  %v7841_v60 = vld [vmem:[%s6497_s29 + $0x79] sm:$0xff] }
 0x237   : > { %5572 = vmatmul.mubr.msk.f32.gmra.mrb[40].mxu0 %vm1683_vm4, %v1653_v37  ;;  %v1377_v42 = vpop.permute.xlu1 %1376  ;;  %v1375_v52 = vpop.permute.xlu0 %1374  ;;  %v9770_v62 = vld [vmem:[#allocation64_spill] sm:$0xff] }
 0x238   : > { %v1655_v36 = vsel %vm1611_vm3, %v1590_v35, %v1377_v42  ;;  %v1654_v10 = vsel %vm1611_vm3, %v1589_v51, %v1375_v52  ;;  %v9763_v35 = vld [vmem:[#allocation61_spill] sm:$0xff]  ;;  %v9765_v52 = vld [vmem:[#allocation98_spill] sm:$0xff]  ;;  %v1535_v14 = vsel %vm212_vm0, %v5797_v4, %v9770_v62 }
 0x239   : > { %2861 = vrot.lane.b32.xlu1 %v7799_v45, %s5944_s5  ;;  %3115 = vrot.lane.b32.xlu0 %v7443_v61, %s5945_s10  ;;  %v1530_v29 = vsel %vm212_vm0, %v5792_v16, %v9763_v35  ;;  %v9764_v51 = vld [vmem:[#allocation97_spill] sm:$0xff]  ;;  %v5800_v16 = vld [vmem:[%s6497_s29 + $0x2c0] sm:$0xff]  ;;  %v9774_v35 = vld [vmem:[#allocation66_spill] sm:$0xff] }
 0x23a   : > { %5574 = vmatprep.mubr.msk.f32.mxu0 %vm1683_vm4, %v1654_v10  ;;  %v1596_v42 = vsel %vm1546_vm2, %v1531_v15, %v9764_v51  ;;  %v7906_v15 = vld [vmem:[%s6497_s29 + $0x99] sm:$0xff] }
 0x23b   : > { %5575 = vmatmul.mubr.msk.f32.gmra.mrb[42].mxu0 %vm1683_vm4, %v1655_v36  ;;  %v1381_v61 = vpop.permute.xlu1 %1380  ;;  %v1379_v39 = vpop.permute.xlu0 %1378  ;;  %v1595_v36 = vsel %vm1546_vm2, %v1530_v29, %v9765_v52  ;;  %v1537_v29 = vsel %vm212_vm0, %v5800_v16, %v9774_v35  ;;  %v5801_v51 = vld [vmem:[%s6497_s29 + $0x2b8] sm:$0xff] }
 0x23c   : > { %v1657_v20 = vsel %vm1611_vm3, %v1592_v17, %v1381_v61  ;;  %v1656_v21 = vsel %vm1611_vm3, %v1591_v11, %v1379_v39  ;;  %v9767_v17 = vld [vmem:[#allocation63_spill] sm:$0xff]  ;;  %v9769_v61 = vld [vmem:[#allocation100_spill] sm:$0xff] }
 0x23d   : > { %3117 = vrot.lane.b32.xlu1 %v7470_v27, %s5945_s10  ;;  %2863 = vrot.lane.b32.xlu0 %v7822_v5, %s5944_s5  ;;  %v1594_v27 = vsel %vm1546_vm2, %v1529_v13, %v9760_v34  ;;  %v1532_v22 = vsel %vm212_vm0, %v5795_v3, %v9767_v17  ;;  %v9768_v11 = vld [vmem:[#allocation99_spill] sm:$0xff]  ;;  %v5798_v34 = vld [vmem:[%s6497_s29 + $0x2a0] sm:$0xff] }
 0x23e   : > { %5577 = vmatprep.mubr.msk.f32.mxu0 %vm1683_vm4, %v1656_v21  ;;  %v1597_v39 = vsel %vm1546_vm2, %v1532_v22, %v9769_v61  ;;  %v7883_v13 = vld [vmem:[%s6497_s29 + $0x91] sm:$0xff]  ;;  %v9778_v17 = vld [vmem:[#allocation68_spill] sm:$0xff] }
 0x23f   : > { %5578 = vmatmul.mubr.msk.f32.gmra.mrb[44].mxu0 %vm1683_vm4, %v1657_v20  ;;  %v1385_v37 = vpop.permute.xlu1 %1384  ;;  %v1383_v47 = vpop.permute.xlu0 %1382  ;;  %v5803_v3 = vld [vmem:[%s6497_s29 + $0x2d8] sm:$0xff] }
 0x240   : > { %v1659_v48 = vsel %vm1611_vm3, %v1594_v27, %v1385_v37  ;;  %v1658_v8 = vsel %vm1611_vm3, %v1593_v44, %v1383_v47  ;;  %v9771_v27 = vld [vmem:[#allocation65_spill] sm:$0xff]  ;;  %v9773_v47 = vld [vmem:[#allocation102_spill] sm:$0xff]  ;;  %v1539_v22 = vsel %vm212_vm0, %v5803_v3, %v9778_v17 }
 0x241   : > { %2865 = vrot.lane.b32.xlu1 %v7841_v60, %s5944_s5  ;;  %3119 = vrot.lane.b32.xlu0 %v7467_v23, %s5945_s10  ;;  %v1534_v18 = vsel %vm212_vm0, %v5798_v34, %v9771_v27  ;;  %v9772_v44 = vld [vmem:[#allocation101_spill] sm:$0xff]  ;;  %v5806_v34 = vld [vmem:[%s6497_s29 + $0x2f0] sm:$0xff] }
 0x242   : > { %5580 = vmatprep.mubr.msk.f32.mxu0 %vm1683_vm4, %v1658_v8  ;;  %v1600_v37 = vsel %vm1546_vm2, %v1535_v14, %v9772_v44  ;;  %v7948_v14 = vld [vmem:[%s6497_s29 + $0xb1] sm:$0xff]  ;;  %v5807_v44 = vld [vmem:[%s6497_s29 + $0x2e8] sm:$0xff] }
 0x243   : > { %5581 = vmatmul.mubr.msk.f32.gmra.mrb[46].mxu0 %vm1683_vm4, %v1659_v48  ;;  %v1389_v23 = vpop.permute.xlu1 %1388  ;;  %v1387_v10 = vpop.permute.xlu0 %1386  ;;  %v1599_v48 = vsel %vm1546_vm2, %v1534_v18, %v9773_v47  ;;  %v9782_v27 = vld [vmem:[#allocation70_spill] sm:$0xff] }
 0x244   : > { %v1661_v56 = vsel %vm1611_vm3, %v1596_v42, %v1389_v23  ;;  %v1660_v30 = vsel %vm1611_vm3, %v1595_v36, %v1387_v10  ;;  %v9775_v42 = vld [vmem:[#allocation67_spill] sm:$0xff]  ;;  %v9777_v23 = vld [vmem:[#allocation104_spill] sm:$0xff]  ;;  %v1541_v18 = vsel %vm212_vm0, %v5806_v34, %v9782_v27 }
 0x245   : > { %3121 = vrot.lane.b32.xlu1 %v7494_v43, %s5945_s10  ;;  %2867 = vrot.lane.b32.xlu0 %v7864_v50, %s5944_s5  ;;  %v1598_v43 = vsel %vm1546_vm2, %v1533_v24, %v9768_v11  ;;  %v1536_v52 = vsel %vm212_vm0, %v5801_v51, %v9775_v42  ;;  %v9776_v36 = vld [vmem:[#allocation103_spill] sm:$0xff]  ;;  %v7925_v24 = vld [vmem:[%s6497_s29 + $0xa9] sm:$0xff]  ;;  %v9786_v42 = vld [vmem:[#allocation72_spill] sm:$0xff] }
 0x246   : > { %5583 = vmatprep.mubr.msk.f32.mxu0 %vm1683_vm4, %v1660_v30  ;;  %v1601_v10 = vsel %vm1546_vm2, %v1536_v52, %v9777_v23  ;;  %v5804_v11 = vld [vmem:[%s6497_s29 + $0x2d0] sm:$0xff]  ;;  %v5809_v51 = vld [vmem:[%s6497_s29 + $0x308] sm:$0xff] }
 0x247   : > { %5584 = vmatmul.mubr.msk.f32.gmra.mrb[48].mxu0 %vm1683_vm4, %v1661_v56  ;;  %v1393_v20 = vpop.permute.xlu1 %1392  ;;  %v1391_v21 = vpop.permute.xlu0 %1390  ;;  %v1543_v52 = vsel %vm212_vm0, %v5809_v51, %v9786_v42 }
 0x248   : > { %v1663_v25 = vsel %vm1611_vm3, %v1598_v43, %v1393_v20  ;;  %v1662_v6 = vsel %vm1611_vm3, %v1597_v39, %v1391_v21  ;;  %v9779_v43 = vld [vmem:[#allocation69_spill] sm:$0xff]  ;;  %v9781_v21 = vld [vmem:[#allocation106_spill] sm:$0xff] }
 0x249   : > { %2869 = vrot.lane.b32.xlu1 %v7883_v13, %s5944_s5  ;;  %3123 = vrot.lane.b32.xlu0 %v7491_v33, %s5945_s10  ;;  %v1538_v61 = vsel %vm212_vm0, %v5804_v11, %v9779_v43  ;;  %v9780_v39 = vld [vmem:[#allocation105_spill] sm:$0xff]  ;;  %v5812_v11 = vld [vmem:[%s6497_s29 + $0x320] sm:$0xff]  ;;  %v9790_v43 = vld [vmem:[#allocation74_spill] sm:$0xff] }
 0x24a   : > { %5586 = vmatprep.mubr.msk.f32.mxu0 %vm1683_vm4, %v1662_v6  ;;  %v1604_v20 = vsel %vm1546_vm2, %v1539_v22, %v9780_v39  ;;  %v7990_v22 = vld [vmem:[%s6497_s29 + $0xc9] sm:$0xff]  ;;  %v5813_v39 = vld [vmem:[%s6497_s29 + $0x318] sm:$0xff] }
 0x24b   : > { %5587 = vmatmul.mubr.msk.f32.gmra.mrb[50].mxu0 %vm1683_vm4, %v1663_v25  ;;  %v1397_v33 = vpop.permute.xlu1 %1396  ;;  %v1395_v8 = vpop.permute.xlu0 %1394  ;;  %v1603_v25 = vsel %vm1546_vm2, %v1538_v61, %v9781_v21  ;;  %v1545_v61 = vsel %vm212_vm0, %v5812_v11, %v9790_v43 }
 0x24c   : > { %v1665_v28 = vsel %vm1611_vm3, %v1600_v37, %v1397_v33  ;;  %v1664_v41 = vsel %vm1611_vm3, %v1599_v48, %v1395_v8  ;;  %v9783_v37 = vld [vmem:[#allocation71_spill] sm:$0xff]  ;;  %v9785_v33 = vld [vmem:[#allocation108_spill] sm:$0xff] }
 0x24d   : > { %3125 = vrot.lane.b32.xlu1 %v7518_v26, %s5945_s10  ;;  %2871 = vrot.lane.b32.xlu0 %v7906_v15, %s5944_s5  ;;  %v1602_v26 = vsel %vm1546_vm2, %v1537_v29, %v9776_v36  ;;  %v1540_v47 = vsel %vm212_vm0, %v5807_v44, %v9783_v37  ;;  %v9784_v48 = vld [vmem:[#allocation107_spill] sm:$0xff]  ;;  %v7967_v29 = vld [vmem:[%s6497_s29 + $0xc1] sm:$0xff] }
 0x24e   : > { %5589 = vmatprep.mubr.msk.f32.mxu0 %vm1683_vm4, %v1664_v41  ;;  %v1605_v8 = vsel %vm1546_vm2, %v1540_v47, %v9785_v33  ;;  %v5810_v36 = vld [vmem:[%s6497_s29 + $0x300] sm:$0xff] }
 0x24f   : > { %5590 = vmatmul.mubr.msk.f32.gmra.mrb[52].mxu0 %vm1683_vm4, %v1665_v28  ;;  %v1401_v56 = vpop.permute.xlu1 %1400  ;;  %v1399_v30 = vpop.permute.xlu0 %1398  ;;  %v8024_v47 = vld [vmem:[%s6497_s29 + $0xe1] sm:$0xff] }
 0x250   : > { %v1667_v1 = vsel %vm1611_vm3, %v1602_v26, %v1401_v56  ;;  %v1666_v19 = vsel %vm1611_vm3, %v1601_v10, %v1399_v30  ;;  %v9787_v26 = vld [vmem:[#allocation73_spill] sm:$0xff]  ;;  %v9789_v30 = vld [vmem:[#allocation110_spill] sm:$0xff] }
 0x251   : > { %2873 = vrot.lane.b32.xlu1 %v7925_v24, %s5944_s5  ;;  %3127 = vrot.lane.b32.xlu0 %v7515_v63, %s5945_s10  ;;  %v1542_v23 = vsel %vm212_vm0, %v5810_v36, %v9787_v26  ;;  %v9788_v10 = vld [vmem:[#allocation109_spill] sm:$0xff] }
 0x252   : > { %5592 = vmatprep.mubr.msk.f32.mxu0 %vm1683_vm4, %v1666_v19  ;;  %v1608_v56 = vsel %vm1546_vm2, %v1543_v52, %v9788_v10  ;;  %v8077_v52 = vld [vmem:[%s6497_s29 + $0x121] sm:$0xff]  ;;  %v8090_v36 = vld [vmem:[%s6497_s29 + $0x129] sm:$0xff] }
 0x253   : > { %5593 = vmatmul.mubr.msk.f32.gmra.mrb[54].mxu0 %vm1683_vm4, %v1667_v1  ;;  %v1405_v63 = vpop.permute.xlu1 %1404  ;;  %v1403_v6 = vpop.permute.xlu0 %1402  ;;  %v1607_v1 = vsel %vm1546_vm2, %v1542_v23, %v9789_v30  ;;  %v2490_v26 = vld [vmem:[%s6497_s29 + $0x12a] sm:$0xff]  ;;  %v8106_v30 = vld [vmem:[%s6497_s29 + $0x141] sm:$0xff] }
 0x254   : > { %v1669_v4 = vsel %vm1611_vm3, %v1604_v20, %v1405_v63  ;;  %v1668_v62 = vsel %vm1611_vm3, %v1603_v25, %v1403_v6  ;;  %v9791_v20 = vld [vmem:[#allocation75_spill] sm:$0xff] }
 0x255   : > { %3129 = vrot.lane.b32.xlu1 %v7542_v46, %s5945_s10  ;;  %2875 = vrot.lane.b32.xlu0 %v7948_v14, %s5944_s5  ;;  %v1606_v46 = vsel %vm1546_vm2, %v1541_v18, %v9784_v48  ;;  %v1544_v21 = vsel %vm212_vm0, %v5813_v39, %v9791_v20  ;;  %v9792_v25 = vld [vmem:[#allocation111_spill] sm:$0xff] }
 0x256   : > { %5595 = vmatprep.mubr.msk.f32.mxu0 %vm1683_vm4, %v1668_v62  ;;  %v1610_v63 = vsel %vm1546_vm2, %v1545_v61, %v9792_v25  ;;  %v8009_v18 = vld [vmem:[%s6497_s29 + $0xd9] sm:$0xff]  ;;  %v5825_v20 = vld [vmem:[%s6497_s29 + $0x151] sm:$0xff] }
 0x257   : > { %5596 = vmatmul.mubr.msk.f32.gmra.mrb[56].mxu0 %vm1683_vm4, %v1669_v4  ;;  %v1409_v28 = vpop.permute.xlu1 %1408  ;;  %v1407_v41 = vpop.permute.xlu0 %1406  ;;  %v5824_v39 = vld [vmem:[%s6497_s29 + $0x159] sm:$0xff] }
 0x258   : > { %v1671_v16 = vsel %vm1611_vm3, %v1606_v46, %v1409_v28  ;;  %v1670_v35 = vsel %vm1611_vm3, %v1605_v8, %v1407_v41  ;;  %v8033_v46 = vld [vmem:[%s6497_s29 + $0xf1] sm:$0xff]  ;;  %v8046_v8 = vld [vmem:[%s6497_s29 + $0xf9] sm:$0xff] }
 0x259   : > { %2877 = vrot.lane.b32.xlu1 %v7967_v29, %s5944_s5  ;;  %3131 = vrot.lane.b32.xlu0 %v7539_v55, %s5945_s10  ;;  %v5251_v25 = vld [vmem:[%s6497_s29 + $0x152] sm:$0xff] }
 0x25a   : > { %5598 = vmatprep.mubr.msk.f32.mxu0 %vm1683_vm4, %v1670_v35  ;;  %v8068_v35 = vld [vmem:[%s6497_s29 + $0x111] sm:$0xff] }
 0x25b   : > { %5599 = vmatmul.mubr.msk.f32.gmra.mrb[58].mxu0 %vm1683_vm4, %v1671_v16  ;;  %v1413_v55 = vpop.permute.xlu1 %1412  ;;  %v1411_v19 = vpop.permute.xlu0 %1410  ;;  %v8055_v16 = vld [vmem:[%s6497_s29 + $0x109] sm:$0xff] }
 0x25c   : > { %v1673_v3 = vsel %vm1611_vm3, %v1608_v56, %v1413_v55  ;;  %v1672_v17 = vsel %vm1611_vm3, %v1607_v1, %v1411_v19  ;;  %v5250_v1 = vld [vmem:[%s6497_s29 + $0x142] sm:$0xff]  ;;  %v5249_v55 = vld [vmem:[%s6497_s29 + $0x13a] sm:$0xff] }
 0x25d   : > { %3133 = vrot.lane.b32.xlu1 %v7566_v54, %s5945_s10  ;;  %2879 = vrot.lane.b32.xlu0 %v7990_v22, %s5944_s5  ;;  %v9793_v54 = vld [vmem:[#allocation112_spill] sm:$0xff] }
 0x25e   : > { %5601 = vmatprep.mubr.msk.f32.mxu0 %vm1683_vm4, %v1672_v17  ;;  %v1609_v6 = vsel %vm1546_vm2, %v1544_v21, %v9793_v54  ;;  %v5252_v21 = vld [vmem:[%s6497_s29 + $0x15a] sm:$0xff] }
 0x25f   : > { %5602 = vmatmul.mubr.msk.f32.gmra.mrb[60].mxu0 %vm1683_vm4, %v1673_v3  ;;  %v1417_v4 = vpop.permute.xlu1 %1416  ;;  %v1415_v62 = vpop.permute.xlu0 %1414 }
 0x260   : > { %v1675_v34 = vsel %vm1611_vm3, %v1610_v63, %v1417_v4  ;;  %v1674_v27 = vsel %vm1611_vm3, %v1609_v6, %v1415_v62  ;;  %v5826_v6 = vld [vmem:[%s6497_s29 + $0x1] sm:$0xff] }
 0x261   : > { %2881 = vrot.lane.b32.xlu1 %v8009_v18, %s5944_s5  ;;  %3135 = vrot.lane.b32.xlu0 %v7563_v40, %s5945_s10 }
 0x262   : > { %5604 = vmatprep.mubr.msk.f32.mxu0 %vm1683_vm4, %v1674_v27 }
 0x263   : > { %5605 = vmatmul.mubr.msk.f32.gmra.mrb[62].mxu0 %vm1683_vm4, %v1675_v34  ;;  %v8017_v44 = vpop.permute.xlu1 %2659  ;;  %v8019_v37 = vpop.permute.xlu0 %2657 }
 0x264   : > { %v3297_v4 = vsel %vm212_vm0, %v5826_v6, %v8019_v37  ;;  %v5828_v6 = vld [vmem:[%s6497_s29 + $0x171] sm:$0xff] }
 0x265   : > { %3137 = vrot.lane.b32.xlu1 %v7590_v58, %s5945_s10  ;;  %2883 = vrot.lane.b32.xlu0 %v8024_v47, %s5944_s5 }
 0x267   : > { %v8028_v48 = vpop.permute.xlu1 %2663  ;;  %v8030_v40 = vpop.permute.xlu0 %2661 }
 0x269   : > { %2885 = vrot.lane.b32.xlu1 %v8033_v46, %s5944_s5  ;;  %3139 = vrot.lane.b32.xlu0 %v7587_v0, %s5945_s10 }
 0x26b   : > { %v8039_v33 = vpop.permute.xlu1 %2667  ;;  %v8041_v58 = vpop.permute.xlu0 %2665 }
 0x26d   : > { %3141 = vrot.lane.b32.xlu1 %v7616_v2, %s5945_s10  ;;  %2887 = vrot.lane.b32.xlu0 %v8046_v8, %s5944_s5 }
 0x26f   : > { %v8050_v28 = vpop.permute.xlu1 %2671  ;;  %v8052_v41 = vpop.permute.xlu0 %2669 }
 0x271   : > { %2889 = vrot.lane.b32.xlu1 %v8055_v16, %s5944_s5  ;;  %3143 = vrot.lane.b32.xlu0 %v7613_v59, %s5945_s10 }
 0x273   : > { %v8061_v0 = vpop.permute.xlu1 %2675  ;;  %v8063_v2 = vpop.permute.xlu0 %2673 }
 0x275   : > { %3145 = vrot.lane.b32.xlu1 %v7642_v49, %s5945_s10  ;;  %2891 = vrot.lane.b32.xlu0 %v8068_v35, %s5944_s5 }
 0x277   : > { %v8072_v51 = vpop.permute.xlu1 %2679  ;;  %v8074_v42 = vpop.permute.xlu0 %2677 }
 0x279   : > { %2893 = vrot.lane.b32.xlu1 %v8077_v52, %s5944_s5  ;;  %3147 = vrot.lane.b32.xlu0 %v7639_v32, %s5945_s10 }
 0x27b   : > { %v8083_v59 = vpop.permute.xlu1 %2683  ;;  %v8085_v49 = vpop.permute.xlu0 %2681 }
 0x27d   : > { %3149 = vrot.lane.b32.xlu1 %v7663_v7, %s5945_s10  ;;  %2895 = vrot.lane.b32.xlu0 %v8090_v36, %s5944_s5  ;;  %v8111_v7 = vld [vmem:[%s6497_s29 + $0x139] sm:$0xff] }
 0x27f   : > { %v8095_v23 = vpop.permute.xlu1 %2687  ;;  %v8097_v10 = vpop.permute.xlu0 %2685 }
 0x281   : > { %2707 = vrot.lane.b32.xlu1 %v2490_v26, %s5943_s30  ;;  %3151 = vrot.lane.b32.xlu0 %v2490_v26, %s5945_s10 }
 0x283   : > { %v8101_v32 = vpop.permute.xlu1 %2691  ;;  %v8103_v56 = vpop.permute.xlu0 %2689 }
 0x285   : > { %2899 = vrot.lane.b32.xlu1 %v8106_v30, %s5944_s5  ;;  %2897 = vrot.lane.b32.xlu0 %v8111_v7, %s5944_s5 }
 0x287   : > { %v8117_v19 = vpop.permute.xlu1 %2695  ;;  %v8119_v3 = vpop.permute.xlu0 %2693 }
 0x289   : > { %3155 = vrot.lane.b32.xlu1 %v5250_v1, %s5945_s10  ;;  %3153 = vrot.lane.b32.xlu0 %v5249_v55, %s5945_s10 }
 0x28b   : > { %v8123_v17 = vpop.permute.xlu1 %2699  ;;  %v8125_v11 = vpop.permute.xlu0 %2697 }
 0x28d   : > { %2711 = vrot.lane.b32.xlu1 %v5250_v1, %s5943_s30  ;;  %2709 = vrot.lane.b32.xlu0 %v5249_v55, %s5943_s30  ;;  %v5827_v1 = vld [vmem:[%s6497_s29 + $0x9] sm:$0xff] }
 0x28e   : > { %v3298_v55 = vsel %vm212_vm0, %v5827_v1, %v8017_v44  ;;  %v5254_v44 = vld [vmem:[%s6497_s29 + $0x172] sm:$0xff]  ;;  %v3300_v1 = vsel %vm212_vm0, %v7696_v31, %v8028_v48 }
 0x28f   : > { %v8129_v43 = vpop.permute.xlu1 %2703  ;;  %v8131_v61 = vpop.permute.xlu0 %2701 }
 0x291   : > { %2903 = vrot.lane.b32.xlu1 %v5824_v39, %s5944_s5  ;;  %2901 = vrot.lane.b32.xlu0 %v5825_v20, %s5944_s5 }
 0x293   : > { %v2850_v63 = vpop.permute.xlu1 %2849  ;;  %v8139_v54 = vpop.permute.xlu0 %2705 }
 0x294   : > { %v3361_v62 = vsel %vm1546_vm2, %v3297_v4, %v2850_v63  ;;  %v5829_v4 = vld [vmem:[%s6497_s29 + $0x169] sm:$0xff] }
 0x295   : > { %3159 = vrot.lane.b32.xlu1 %v5252_v21, %s5945_s10  ;;  %3157 = vrot.lane.b32.xlu0 %v5251_v25, %s5945_s10 }
 0x297   : > { %v3106_v34 = vpop.permute.xlu1 %3105  ;;  %v2852_v27 = vpop.permute.xlu0 %2851 }
 0x298   : > { %v3425_v26 = vsel %vm1611_vm3, %v3361_v62, %v3106_v34  ;;  %v3362_v37 = vsel %vm1546_vm2, %v3298_v55, %v2852_v27 }
 0x299   : > { %2715 = vrot.lane.b32.xlu1 %v5252_v21, %s5943_s30  ;;  %2713 = vrot.lane.b32.xlu0 %v5251_v25, %s5943_s30  ;;  %v3299_v21 = vsel %vm212_vm0, %v7675_v53, %v8030_v40  ;;  %v5253_v25 = vld [vmem:[%s6497_s29 + $0x16a] sm:$0xff] }
 0x29a   : > { %5615 = vmatprep.mubr.msk.f32.mxu1 %vm1683_vm4, %v3425_v26 }
 0x29b   : > { %v2854_v39 = vpop.permute.xlu1 %2853  ;;  %v3108_v20 = vpop.permute.xlu0 %3107 }
 0x29c   : > { %v3426_v63 = vsel %vm1611_vm3, %v3362_v37, %v3108_v20  ;;  %v3363_v62 = vsel %vm1546_vm2, %v3299_v21, %v2854_v39  ;;  %v3301_v39 = vsel %vm212_vm0, %v7715_v57, %v8041_v58  ;;  %v3302_v57 = vsel %vm212_vm0, %v7738_v9, %v8039_v33  ;;  %v5256_v58 = vld [vmem:[%s6497_s29 + $0x18a] sm:$0xff]  ;;  %v5255_v21 = vld [vmem:[%s6497_s29 + $0x182] sm:$0xff]  ;;  %v2498_v9 = vld [vmem:[%s6497_s29 + $0x1ba] sm:$0xff] }
 0x29d   : > { %2907 = vrot.lane.b32.xlu1 %v5828_v6, %s5944_s5  ;;  %2905 = vrot.lane.b32.xlu0 %v5829_v4, %s5944_s5  ;;  %v5830_v6 = vld [vmem:[%s6497_s29 + $0x189] sm:$0xff]  ;;  %v5831_v4 = vld [vmem:[%s6497_s29 + $0x181] sm:$0xff] }
 0x29e   : > { %5616 = vmatmul.mubr.msk.f32.vlgmr.msra.gmra.mrb[0].mxu1 %vm1683_vm4, %v3426_v63  ;;  %v2497_v33 = vld [vmem:[%s6497_s29 + $0x1b2] sm:$0xff] }
 0x29f   : > { %v3110_v34 = vpop.permute.xlu1 %3109  ;;  %v2856_v27 = vpop.permute.xlu0 %2855 }
 0x2a0   : > { %v3427_v26 = vsel %vm1611_vm3, %v3363_v62, %v3110_v34  ;;  %v3364_v53 = vsel %vm1546_vm2, %v3300_v1, %v2856_v27  ;;  %v3303_v27 = vsel %vm212_vm0, %v7757_v12, %v8052_v41  ;;  %v3304_v12 = vsel %vm212_vm0, %v7780_v38, %v8050_v28  ;;  %v5258_v38 = vld [vmem:[%s6497_s29 + $0x1d2] sm:$0xff]  ;;  %v5257_v28 = vld [vmem:[%s6497_s29 + $0x1ca] sm:$0xff] }
 0x2a1   : > { %3163 = vrot.lane.b32.xlu1 %v5254_v44, %s5945_s10  ;;  %3161 = vrot.lane.b32.xlu0 %v5253_v25, %s5945_s10 }
 0x2a2   : > { %5618 = vmatprep.mubr.msk.f32.mxu1 %vm1683_vm4, %v3427_v26 }
 0x2a3   : > { %v2858_v40 = vpop.permute.xlu1 %2857  ;;  %v3112_v55 = vpop.permute.xlu0 %3111 }
 0x2a4   : > { %v3428_v37 = vsel %vm1611_vm3, %v3364_v53, %v3112_v55  ;;  %v3365_v31 = vsel %vm1546_vm2, %v3301_v39, %v2858_v40 }
 0x2a5   : > { %2719 = vrot.lane.b32.xlu1 %v5254_v44, %s5943_s30  ;;  %2717 = vrot.lane.b32.xlu0 %v5253_v25, %s5943_s30 }
 0x2a6   : > { %5619 = vmatmul.mubr.msk.f32.gmra.mrb[2].mxu1 %vm1683_vm4, %v3428_v37 }
 0x2a7   : > { %v3114_v48 = vpop.permute.xlu1 %3113  ;;  %v2860_v20 = vpop.permute.xlu0 %2859 }
 0x2a8   : > { %v3429_v63 = vsel %vm1611_vm3, %v3365_v31, %v3114_v48  ;;  %v3366_v44 = vsel %vm1546_vm2, %v3302_v57, %v2860_v20  ;;  %v5832_v31 = vld [vmem:[%s6497_s29 + $0x1d1] sm:$0xff]  ;;  %v5833_v48 = vld [vmem:[%s6497_s29 + $0x1c9] sm:$0xff]  ;;  %v3305_v20 = vsel %vm212_vm0, %v7799_v45, %v8063_v2  ;;  %v3306_v45 = vsel %vm212_vm0, %v7822_v5, %v8061_v0 }
 0x2a9   : > { %2911 = vrot.lane.b32.xlu1 %v5830_v6, %s5944_s5  ;;  %2909 = vrot.lane.b32.xlu0 %v5831_v4, %s5944_s5  ;;  %v3307_v5 = vsel %vm212_vm0, %v7841_v60, %v8074_v42  ;;  %v5260_v60 = vld [vmem:[%s6497_s29 + $0x1ea] sm:$0xff]  ;;  %v5259_v42 = vld [vmem:[%s6497_s29 + $0x1e2] sm:$0xff] }
 0x2aa   : > { %5621 = vmatprep.mubr.msk.f32.mxu1 %vm1683_vm4, %v3429_v63 }
 0x2ab   : > { %v2862_v25 = vpop.permute.xlu1 %2861  ;;  %v3116_v62 = vpop.permute.xlu0 %3115 }
 0x2ac   : > { %v3430_v34 = vsel %vm1611_vm3, %v3366_v44, %v3116_v62  ;;  %v3367_v26 = vsel %vm1546_vm2, %v3303_v27, %v2862_v25 }
 0x2ad   : > { %3167 = vrot.lane.b32.xlu1 %v5256_v58, %s5945_s10  ;;  %3165 = vrot.lane.b32.xlu0 %v5255_v21, %s5945_s10 }
 0x2ae   : > { %5622 = vmatmul.mubr.msk.f32.gmra.mrb[4].mxu1 %vm1683_vm4, %v3430_v34 }
 0x2af   : > { %v3118_v1 = vpop.permute.xlu1 %3117  ;;  %v2864_v53 = vpop.permute.xlu0 %2863 }
 0x2b0   : > { %v3431_v40 = vsel %vm1611_vm3, %v3367_v26, %v3118_v1  ;;  %v3368_v41 = vsel %vm1546_vm2, %v3304_v12, %v2864_v53  ;;  %v5834_v1 = vld [vmem:[%s6497_s29 + $0x1e9] sm:$0xff]  ;;  %v5835_v53 = vld [vmem:[%s6497_s29 + $0x1e1] sm:$0xff]  ;;  %v3308_v12 = vsel %vm212_vm0, %v7864_v50, %v8072_v51 }
 0x2b1   : > { %2723 = vrot.lane.b32.xlu1 %v2498_v9, %s5943_s30  ;;  %2721 = vrot.lane.b32.xlu0 %v2497_v33, %s5943_s30 }
 0x2b2   : > { %5624 = vmatprep.mubr.msk.f32.mxu1 %vm1683_vm4, %v3431_v40 }
 0x2b3   : > { %v2866_v55 = vpop.permute.xlu1 %2865  ;;  %v3120_v37 = vpop.permute.xlu0 %3119 }
 0x2b4   : > { %v3432_v39 = vsel %vm1611_vm3, %v3368_v41, %v3120_v37  ;;  %v3369_v63 = vsel %vm1546_vm2, %v3305_v20, %v2866_v55 }
 0x2b5   : > { %2915 = vrot.lane.b32.xlu1 %v5832_v31, %s5944_s5  ;;  %2913 = vrot.lane.b32.xlu0 %v5833_v48, %s5944_s5  ;;  %v3309_v48 = vsel %vm212_vm0, %v7883_v13, %v8085_v49  ;;  %v3310_v49 = vsel %vm212_vm0, %v7906_v15, %v8083_v59  ;;  %v5262_v15 = vld [vmem:[%s6497_s29 + $0x202] sm:$0xff]  ;;  %v5261_v59 = vld [vmem:[%s6497_s29 + $0x1fa] sm:$0xff] }
 0x2b6   : > { %5625 = vmatmul.mubr.msk.f32.gmra.mrb[6].mxu1 %vm1683_vm4, %v3432_v39 }
 0x2b7   : > { %v3122_v6 = vpop.permute.xlu1 %3121  ;;  %v2868_v4 = vpop.permute.xlu0 %2867 }
 0x2b8   : > { %v3433_v57 = vsel %vm1611_vm3, %v3369_v63, %v3122_v6  ;;  %v3370_v44 = vsel %vm1546_vm2, %v3306_v45, %v2868_v4 }
 0x2b9   : > { %3171 = vrot.lane.b32.xlu1 %v5258_v38, %s5945_s10  ;;  %3169 = vrot.lane.b32.xlu0 %v5257_v28, %s5945_s10 }
 0x2ba   : > { %v8228_v58 = vpop.f32.mrb[0].mxu0  ;;  %5627 = vmatprep.mubr.msk.f32.mxu1 %vm1683_vm4, %v3433_v57 }
 0x2bb   : > { %v8234_v2 = vpop.f32.mrb[1].mxu0  ;;  %v2870_v21 = vpop.permute.xlu1 %2869 }
 0x2bc   : > { %v3124_v25 = vpop.permute.xlu0 %3123  ;;  %v3371_v34 = vsel %vm1546_vm2, %v3307_v5, %v2870_v21 }
 0x2bd   : > { %v3434_v62 = vsel %vm1611_vm3, %v3370_v44, %v3124_v25  ;;  %2727 = vrot.lane.b32.xlu1 %v5258_v38, %s5943_s30  ;;  %2725 = vrot.lane.b32.xlu0 %v5257_v28, %s5943_s30  ;;  %v5836_v44 = vld [vmem:[%s6497_s29 + $0x201] sm:$0xff]  ;;  %v5837_v25 = vld [vmem:[%s6497_s29 + $0x1f9] sm:$0xff] }
 0x2be   : > { %v8243_v0 = vpop.f32.mrb[2].mxu0  ;;  %5628 = vmatmul.mubr.msk.f32.gmra.mrb[8].mxu1 %vm1683_vm4, %v3434_v62  ;;  %v3311_v62 = vsel %vm212_vm0, %v7925_v24, %v8097_v10  ;;  %v3312_v24 = vsel %vm212_vm0, %v7948_v14, %v8095_v23  ;;  %v3313_v14 = vsel %vm212_vm0, %v7967_v29, %v8103_v56  ;;  %v5264_v29 = vld [vmem:[%s6497_s29 + $0x21a] sm:$0xff]  ;;  %v5263_v56 = vld [vmem:[%s6497_s29 + $0x212] sm:$0xff] }
 0x2bf   : > { %v8247_v27 = vpop.f32.mrb[3].mxu0  ;;  %v3126_v9 = vpop.permute.xlu1 %3125 }
 0x2c0   : > { %v3435_v33 = vsel %vm1611_vm3, %v3371_v34, %v3126_v9  ;;  %v2872_v26 = vpop.permute.xlu0 %2871 }
 0x2c1   : > { %2919 = vrot.lane.b32.xlu1 %v5834_v1, %s5944_s5  ;;  %2917 = vrot.lane.b32.xlu0 %v5835_v53, %s5944_s5  ;;  %v3372_v37 = vsel %vm1546_vm2, %v3308_v12, %v2872_v26 }
 0x2c2   : > { %v8254_v40 = vpop.f32.mrb[4].mxu0  ;;  %5630 = vmatprep.mubr.msk.f32.mxu1 %vm1683_vm4, %v3435_v33 }
 0x2c3   : > { %v8262_v41 = vpop.f32.mrb[5].mxu0  ;;  %v2874_v55 = vpop.permute.xlu1 %2873 }
 0x2c4   : > { %v3128_v39 = vpop.permute.xlu0 %3127  ;;  %v3373_v50 = vsel %vm1546_vm2, %v3309_v48, %v2874_v55 }
 0x2c5   : > { %v3436_v31 = vsel %vm1611_vm3, %v3372_v37, %v3128_v39  ;;  %3175 = vrot.lane.b32.xlu1 %v5260_v60, %s5945_s10  ;;  %3173 = vrot.lane.b32.xlu0 %v5259_v42, %s5945_s10 }
 0x2c6   : > { %v8271_v20 = vpop.f32.mrb[6].mxu0  ;;  %5631 = vmatmul.mubr.msk.f32.gmra.mrb[10].mxu1 %vm1683_vm4, %v3436_v31 }
 0x2c7   : > { %v8275_v51 = vpop.f32.mrb[7].mxu0  ;;  %v3130_v38 = vpop.permute.xlu1 %3129 }
 0x2c8   : > { %v3437_v28 = vsel %vm1611_vm3, %v3373_v50, %v3130_v38  ;;  %v2876_v63 = vpop.permute.xlu0 %2875  ;;  %v5838_v38 = vld [vmem:[%s6497_s29 + $0x219] sm:$0xff] }
 0x2c9   : > { %2731 = vrot.lane.b32.xlu1 %v5260_v60, %s5943_s30  ;;  %2729 = vrot.lane.b32.xlu0 %v5259_v42, %s5943_s30  ;;  %v3374_v57 = vsel %vm1546_vm2, %v3310_v49, %v2876_v63  ;;  %v3314_v49 = vsel %vm212_vm0, %v7990_v22, %v8101_v32 }
 0x2ca   : > { %v8280_v13 = vpop.f32.mrb[8].mxu0  ;;  %5633 = vmatprep.mubr.msk.f32.mxu1 %vm1683_vm4, %v3437_v28  ;;  %v5839_v28 = vld [vmem:[%s6497_s29 + $0x211] sm:$0xff] }
 0x2cb   : > { %v8286_v6 = vpop.f32.mrb[9].mxu0  ;;  %v2878_v4 = vpop.permute.xlu1 %2877 }
 0x2cc   : > { %v3132_v45 = vpop.permute.xlu0 %3131  ;;  %v3375_v34 = vsel %vm1546_vm2, %v3311_v62, %v2878_v4 }
 0x2cd   : > { %v3438_v21 = vsel %vm1611_vm3, %v3374_v57, %v3132_v45  ;;  %2923 = vrot.lane.b32.xlu1 %v5836_v44, %s5944_s5  ;;  %2921 = vrot.lane.b32.xlu0 %v5837_v25, %s5944_s5  ;;  %v3315_v25 = vsel %vm212_vm0, %v8009_v18, %v8119_v3  ;;  %v3316_v3 = vsel %vm212_vm0, %v8024_v47, %v8117_v19  ;;  %v5266_v47 = vld [vmem:[%s6497_s29 + $0x232] sm:$0xff]  ;;  %v5265_v19 = vld [vmem:[%s6497_s29 + $0x22a] sm:$0xff] }
 0x2ce   : > { %v8297_v5 = vpop.f32.mrb[10].mxu0  ;;  %5634 = vmatmul.mubr.msk.f32.gmra.mrb[12].mxu1 %vm1683_vm4, %v3438_v21 }
 0x2cf   : > { %v8303_v9 = vpop.f32.mrb[11].mxu0  ;;  %v3134_v33 = vpop.permute.xlu1 %3133 }
 0x2d0   : > { %v3439_v26 = vsel %vm1611_vm3, %v3375_v34, %v3134_v33  ;;  %v2880_v1 = vpop.permute.xlu0 %2879 }
 0x2d1   : > { %3179 = vrot.lane.b32.xlu1 %v5262_v15, %s5945_s10  ;;  %3177 = vrot.lane.b32.xlu0 %v5261_v59, %s5945_s10  ;;  %v3376_v42 = vsel %vm1546_vm2, %v3312_v24, %v2880_v1 }
 0x2d2   : > { %v8308_v53 = vpop.f32.mrb[12].mxu0  ;;  %5636 = vmatprep.mubr.msk.f32.mxu1 %vm1683_vm4, %v3439_v26 }
 0x2d3   : > { %v8314_v10 = vpop.f32.mrb[13].mxu0  ;;  %v2882_v60 = vpop.permute.xlu1 %2881 }
 0x2d4   : > { %v3136_v12 = vpop.permute.xlu0 %3135  ;;  %v3377_v37 = vsel %vm1546_vm2, %v3313_v14, %v2882_v60 }
 0x2d5   : > { %v3440_v55 = vsel %vm1611_vm3, %v3376_v42, %v3136_v12  ;;  %2735 = vrot.lane.b32.xlu1 %v5262_v15, %s5943_s30  ;;  %2733 = vrot.lane.b32.xlu0 %v5261_v59, %s5943_s30  ;;  %v5840_v42 = vld [vmem:[%s6497_s29 + $0x231] sm:$0xff]  ;;  %v5841_v12 = vld [vmem:[%s6497_s29 + $0x229] sm:$0xff] }
 0x2d6   : > { %v8323_v23 = vpop.f32.mrb[14].mxu0  ;;  %5637 = vmatmul.mubr.msk.f32.gmra.mrb[14].mxu1 %vm1683_vm4, %v3440_v55  ;;  %v3317_v55 = vsel %vm212_vm0, %v8033_v46, %v8125_v11  ;;  %v3318_v46 = vsel %vm212_vm0, %v8046_v8, %v8123_v17  ;;  %v3319_v8 = vsel %vm212_vm0, %v8055_v16, %v8131_v61  ;;  %v5268_v16 = vld [vmem:[%s6497_s29 + $0x24a] sm:$0xff]  ;;  %v5267_v61 = vld [vmem:[%s6497_s29 + $0x242] sm:$0xff] }
 0x2d7   : > { %v8327_v39 = vpop.f32.mrb[15].mxu0  ;;  %v3138_v31 = vpop.permute.xlu1 %3137 }
 0x2d8   : > { %v3441_v48 = vsel %vm1611_vm3, %v3377_v37, %v3138_v31  ;;  %v2884_v50 = vpop.permute.xlu0 %2883 }
 0x2d9   : > { %2927 = vrot.lane.b32.xlu1 %v5838_v38, %s5944_s5  ;;  %2925 = vrot.lane.b32.xlu0 %v5839_v28, %s5944_s5  ;;  %v3378_v45 = vsel %vm1546_vm2, %v3314_v49, %v2884_v50 }
 0x2da   : > { %v8334_v63 = vpop.f32.mrb[16].mxu0  ;;  %5639 = vmatprep.mubr.msk.f32.mxu1 %vm1683_vm4, %v3441_v48 }
 0x2db   : > { %v8342_v4 = vpop.f32.mrb[17].mxu0  ;;  %v2886_v57 = vpop.permute.xlu1 %2885 }
 0x2dc   : > { %v3140_v21 = vpop.permute.xlu0 %3139  ;;  %v3379_v22 = vsel %vm1546_vm2, %v3315_v25, %v2886_v57 }
 0x2dd   : > { %v3442_v44 = vsel %vm1611_vm3, %v3378_v45, %v3140_v21  ;;  %3183 = vrot.lane.b32.xlu1 %v5264_v29, %s5945_s10  ;;  %3181 = vrot.lane.b32.xlu0 %v5263_v56, %s5945_s10 }
 0x2de   : > { %v8351_v62 = vpop.f32.mrb[18].mxu0  ;;  %5640 = vmatmul.mubr.msk.f32.gmra.mrb[16].mxu1 %vm1683_vm4, %v3442_v44 }
 0x2df   : > { %v8355_v32 = vpop.f32.mrb[19].mxu0  ;;  %v3142_v15 = vpop.permute.xlu1 %3141 }
 0x2e0   : > { %v3443_v59 = vsel %vm1611_vm3, %v3379_v22, %v3142_v15  ;;  %v2888_v34 = vpop.permute.xlu0 %2887  ;;  %v5842_v15 = vld [vmem:[%s6497_s29 + $0x249] sm:$0xff] }
 0x2e1   : > { %2739 = vrot.lane.b32.xlu1 %v5264_v29, %s5943_s30  ;;  %2737 = vrot.lane.b32.xlu0 %v5263_v56, %s5943_s30  ;;  %v3380_v1 = vsel %vm1546_vm2, %v3316_v3, %v2888_v34  ;;  %v3320_v3 = vsel %vm212_vm0, %v8068_v35, %v8129_v43 }
 0x2e2   : > { %v8360_v18 = vpop.f32.mrb[20].mxu0  ;;  %5642 = vmatprep.mubr.msk.f32.mxu1 %vm1683_vm4, %v3443_v59  ;;  %v5843_v59 = vld [vmem:[%s6497_s29 + $0x241] sm:$0xff] }
 0x2e3   : > { %v8366_v33 = vpop.f32.mrb[21].mxu0  ;;  %v2890_v26 = vpop.permute.xlu1 %2889 }
 0x2e4   : > { %v3144_v24 = vpop.permute.xlu0 %3143  ;;  %v3381_v37 = vsel %vm1546_vm2, %v3317_v55, %v2890_v26 }
 0x2e5   : > { %v3444_v60 = vsel %vm1611_vm3, %v3380_v1, %v3144_v24  ;;  %2931 = vrot.lane.b32.xlu1 %v5840_v42, %s5944_s5  ;;  %2929 = vrot.lane.b32.xlu0 %v5841_v12, %s5944_s5 }
 0x2e6   : > { %v8377_v14 = vpop.f32.mrb[22].mxu0  ;;  %5643 = vmatmul.mubr.msk.f32.gmra.mrb[18].mxu1 %vm1683_vm4, %v3444_v60 }
 0x2e7   : > { %v8383_v31 = vpop.f32.mrb[23].mxu0  ;;  %v3146_v48 = vpop.permute.xlu1 %3145 }
 0x2e8   : > { %v3445_v50 = vsel %vm1611_vm3, %v3381_v37, %v3146_v48  ;;  %v2892_v38 = vpop.permute.xlu0 %2891  ;;  %v3321_v37 = vsel %vm212_vm0, %v8077_v52, %v8139_v54  ;;  %v5270_v52 = vld [vmem:[%s6497_s29 + $0x262] sm:$0xff]  ;;  %v5269_v54 = vld [vmem:[%s6497_s29 + $0x25a] sm:$0xff] }
 0x2e9   : > { %3187 = vrot.lane.b32.xlu1 %v5266_v47, %s5945_s10  ;;  %3185 = vrot.lane.b32.xlu0 %v5265_v19, %s5945_s10  ;;  %v3382_v56 = vsel %vm1546_vm2, %v3318_v46, %v2892_v38 }
 0x2ea   : > { %v8388_v28 = vpop.f32.mrb[24].mxu0  ;;  %5645 = vmatprep.mubr.msk.f32.mxu1 %vm1683_vm4, %v3445_v50 }
 0x2eb   : > { %v8394_v11 = vpop.f32.mrb[25].mxu0  ;;  %v2894_v29 = vpop.permute.xlu1 %2893 }
 0x2ec   : > { %v3148_v49 = vpop.permute.xlu0 %3147  ;;  %v3383_v45 = vsel %vm1546_vm2, %v3319_v8, %v2894_v29 }
 0x2ed   : > { %v3446_v57 = vsel %vm1611_vm3, %v3382_v56, %v3148_v49  ;;  %2743 = vrot.lane.b32.xlu1 %v5266_v47, %s5943_s30  ;;  %2741 = vrot.lane.b32.xlu0 %v5265_v19, %s5943_s30  ;;  %v5844_v49 = vld [vmem:[%s6497_s29 + $0x261] sm:$0xff] }
 0x2ee   : > { %v8403_v17 = vpop.f32.mrb[26].mxu0  ;;  %5646 = vmatmul.mubr.msk.f32.gmra.mrb[20].mxu1 %vm1683_vm4, %v3446_v57  ;;  %v5845_v57 = vld [vmem:[%s6497_s29 + $0x259] sm:$0xff] }
 0x2ef   : > { %v8407_v21 = vpop.f32.mrb[27].mxu0  ;;  %v3150_v44 = vpop.permute.xlu1 %3149 }
 0x2f0   : > { %v3447_v25 = vsel %vm1611_vm3, %v3383_v45, %v3150_v44  ;;  %v2896_v22 = vpop.permute.xlu0 %2895 }
 0x2f1   : > { %2935 = vrot.lane.b32.xlu1 %v5842_v15, %s5944_s5  ;;  %2933 = vrot.lane.b32.xlu0 %v5843_v59, %s5944_s5  ;;  %v3384_v24 = vsel %vm1546_vm2, %v3320_v3, %v2896_v22 }
 0x2f2   : > { %v8414_v34 = vpop.f32.mrb[28].mxu0  ;;  %5648 = vmatprep.mubr.msk.f32.mxu1 %vm1683_vm4, %v3447_v25 }
 0x2f3   : > { %v8422_v26 = vpop.f32.mrb[29].mxu0  ;;  %v2708_v1 = vpop.permute.xlu1 %2707 }
 0x2f4   : > { %v3152_v60 = vpop.permute.xlu0 %3151  ;;  %v3322_v47 = vsel %vm212_vm0, %v8090_v36, %v2708_v1 }
 0x2f5   : > { %v3448_v42 = vsel %vm1611_vm3, %v3384_v24, %v3152_v60  ;;  %3191 = vrot.lane.b32.xlu1 %v5268_v16, %s5945_s10  ;;  %3189 = vrot.lane.b32.xlu0 %v5267_v61, %s5945_s10 }
 0x2f6   : > { %v8428_v12 = vpop.f32.mrb[30].mxu0  ;;  %5649 = vmatmul.mubr.msk.f32.gmra.mrb[22].mxu1 %vm1683_vm4, %v3448_v42 }
 0x2f7   : > { %v8431_v55 = vpop.f32.mrb[31].mxu0  ;;  %v2900_v35 = vpop.permute.xlu1 %2899 }
 0x2f8   : > { %v2898_v43 = vpop.permute.xlu0 %2897  ;;  %v3386_v48 = vsel %vm1546_vm2, %v3322_v47, %v2900_v35 }
 0x2f9   : > { %2747 = vrot.lane.b32.xlu1 %v5268_v16, %s5943_s30  ;;  %2745 = vrot.lane.b32.xlu0 %v5267_v61, %s5943_s30  ;;  %v3385_v46 = vsel %vm1546_vm2, %v3321_v37, %v2898_v43 }
 0x2fa   : > { %v8437_v19 = vpop.f32.mrb[32].mxu0 }
 0x2fb   : > { %v8443_v50 = vpop.f32.mrb[33].mxu0  ;;  %v3156_v38 = vpop.permute.xlu1 %3155 }
 0x2fc   : > { %v3450_v29 = vsel %vm1611_vm3, %v3386_v48, %v3156_v38  ;;  %v3154_v56 = vpop.permute.xlu0 %3153  ;;  %v5847_v48 = vld [vmem:[%s6497_s29 + $0x271] sm:$0xff] }
 0x2fd   : > { %v3449_v36 = vsel %vm1611_vm3, %v3385_v46, %v3154_v56  ;;  %2939 = vrot.lane.b32.xlu1 %v5844_v49, %s5944_s5  ;;  %2937 = vrot.lane.b32.xlu0 %v5845_v57, %s5944_s5  ;;  %v5271_v46 = vld [vmem:[%s6497_s29 + $0x272] sm:$0xff] }
 0x2fe   : > { %v8452_v8 = vpop.f32.mrb[34].mxu0  ;;  %5651 = vmatprep.mubr.msk.f32.mxu1 %vm1683_vm4, %v3449_v36 }
 0x2ff   : > { %v8457_v45 = vpop.f32.mrb[35].mxu0  ;;  %5652 = vmatmul.mubr.msk.f32.gmra.mrb[24].mxu1 %vm1683_vm4, %v3450_v29  ;;  %v2712_v44 = vpop.permute.xlu1 %2711 }
 0x300   : > { %v2710_v25 = vpop.permute.xlu0 %2709  ;;  %v3324_v61 = vsel %vm212_vm0, %v8106_v30, %v2712_v44  ;;  %v5846_v30 = vld [vmem:[%s6497_s29 + $0x279] sm:$0xff] }
 0x301   : > { %3195 = vrot.lane.b32.xlu1 %v5270_v52, %s5945_s10  ;;  %3193 = vrot.lane.b32.xlu0 %v5269_v54, %s5945_s10  ;;  %v3323_v1 = vsel %vm212_vm0, %v8111_v7, %v2710_v25  ;;  %v5272_v7 = vld [vmem:[%s6497_s29 + $0x27a] sm:$0xff] }
 0x302   : > { %v8462_v22 = vpop.f32.mrb[36].mxu0  ;;  %v5848_v44 = vld [vmem:[%s6497_s29 + $0x159] sm:$0xff] }
 0x303   : > { %v8464_v15 = vpop.f32.mrb[37].mxu0  ;;  %v2904_v59 = vpop.permute.xlu1 %2903 }
 0x304   : > { %v2902_v16 = vpop.permute.xlu0 %2901  ;;  %v3388_v24 = vsel %vm1546_vm2, %v3324_v61, %v2904_v59 }
 0x305   : > { %2751 = vrot.lane.b32.xlu1 %v5270_v52, %s5943_s30  ;;  %2749 = vrot.lane.b32.xlu0 %v5269_v54, %s5943_s30  ;;  %v3387_v35 = vsel %vm1546_vm2, %v3323_v1, %v2902_v16  ;;  %v5849_v16 = vld [vmem:[%s6497_s29 + $0x151] sm:$0xff] }
 0x306   : > { %v8470_v3 = vpop.f32.mrb[38].mxu0 }
 0x307   : > { %v8475_v60 = vpop.f32.mrb[39].mxu0  ;;  %v3160_v42 = vpop.permute.xlu1 %3159 }
 0x308   : > { %v3452_v43 = vsel %vm1611_vm3, %v3388_v24, %v3160_v42  ;;  %v3158_v47 = vpop.permute.xlu0 %3157 }
 0x309   : > { %v3451_v37 = vsel %vm1611_vm3, %v3387_v35, %v3158_v47  ;;  %2943 = vrot.lane.b32.xlu1 %v5846_v30, %s5944_s5  ;;  %2941 = vrot.lane.b32.xlu0 %v5847_v48, %s5944_s5  ;;  %v5850_v30 = vld [vmem:[%s6497_s29 + $0x291] sm:$0xff]  ;;  %v5851_v48 = vld [vmem:[%s6497_s29 + $0x289] sm:$0xff] }
 0x30a   : > { %v8484_v38 = vpop.f32.mrb[40].mxu0  ;;  %5654 = vmatprep.mubr.msk.f32.mxu1 %vm1683_vm4, %v3451_v37 }
 0x30b   : > { %v8489_v29 = vpop.f32.mrb[41].mxu0  ;;  %5655 = vmatmul.mubr.msk.f32.gmra.mrb[26].mxu1 %vm1683_vm4, %v3452_v43  ;;  %v2716_v56 = vpop.permute.xlu1 %2715 }
 0x30c   : > { %v2714_v36 = vpop.permute.xlu0 %2713  ;;  %v3326_v25 = vsel %vm212_vm0, %v5848_v44, %v2716_v56  ;;  %v5273_v56 = vld [vmem:[%s6497_s29 + $0x28a] sm:$0xff] }
 0x30d   : > { %3199 = vrot.lane.b32.xlu1 %v5272_v7, %s5945_s10  ;;  %3197 = vrot.lane.b32.xlu0 %v5271_v46, %s5945_s10  ;;  %v3325_v61 = vsel %vm212_vm0, %v5849_v16, %v2714_v36 }
 0x30e   : > { %v8494_v49 = vpop.f32.mrb[42].mxu0 }
 0x30f   : > { %v8496_v57 = vpop.f32.mrb[43].mxu0  ;;  %v2908_v52 = vpop.permute.xlu1 %2907 }
 0x310   : > { %9794 = vst [vmem:[#allocation4_spill] sm:$0xff] %v8496_v57  ;;  %v2906_v54 = vpop.permute.xlu0 %2905  ;;  %v3390_v1 = vsel %vm1546_vm2, %v3326_v25, %v2908_v52 }
 0x311   : > { %2755 = vrot.lane.b32.xlu1 %v5272_v7, %s5943_s30  ;;  %2753 = vrot.lane.b32.xlu0 %v5271_v46, %s5943_s30  ;;  %v3389_v35 = vsel %vm1546_vm2, %v3325_v61, %v2906_v54  ;;  %v5274_v46 = vld [vmem:[%s6497_s29 + $0x292] sm:$0xff] }
 0x312   : > { %v8502_v59 = vpop.f32.mrb[44].mxu0 }
 0x313   : > { %9795 = vst [vmem:[#allocation10_spill] sm:$0xff] %v8502_v59  ;;  %v8507_v24 = vpop.f32.mrb[45].mxu0  ;;  %v3164_v42 = vpop.permute.xlu1 %3163 }
 0x314   : > { %9796 = vst [vmem:[#allocation5_spill] sm:$0xff] %v8507_v24  ;;  %v3454_v43 = vsel %vm1611_vm3, %v3390_v1, %v3164_v42  ;;  %v3162_v47 = vpop.permute.xlu0 %3161  ;;  %v5852_v1 = vld [vmem:[%s6497_s29 + $0x171] sm:$0xff] }
 0x315   : > { %v3453_v37 = vsel %vm1611_vm3, %v3389_v35, %v3162_v47  ;;  %2947 = vrot.lane.b32.xlu1 %v5850_v30, %s5944_s5  ;;  %2945 = vrot.lane.b32.xlu0 %v5851_v48, %s5944_s5 }
 0x316   : > { %v8516_v7 = vpop.f32.mrb[46].mxu0  ;;  %5657 = vmatprep.mubr.msk.f32.mxu1 %vm1683_vm4, %v3453_v37 }
 0x317   : > { %9797 = vst [vmem:[#allocation11_spill] sm:$0xff] %v8516_v7  ;;  %v8521_v36 = vpop.f32.mrb[47].mxu0  ;;  %5658 = vmatmul.mubr.msk.f32.gmra.mrb[28].mxu1 %vm1683_vm4, %v3454_v43  ;;  %v2720_v52 = vpop.permute.xlu1 %2719  ;;  %v5853_v43 = vld [vmem:[%s6497_s29 + $0x169] sm:$0xff] }
 0x318   : > { %9798 = vst [vmem:[#allocation6_spill] sm:$0xff] %v8521_v36  ;;  %v2718_v54 = vpop.permute.xlu0 %2717  ;;  %v3328_v42 = vsel %vm212_vm0, %v5852_v1, %v2720_v52  ;;  %v5854_v52 = vld [vmem:[%s6497_s29 + $0x2a9] sm:$0xff]  ;;  %v5855_v1 = vld [vmem:[%s6497_s29 + $0x2a1] sm:$0xff] }
 0x319   : > { %3203 = vrot.lane.b32.xlu1 %v5274_v46, %s5945_s10  ;;  %3201 = vrot.lane.b32.xlu0 %v5273_v56, %s5945_s10  ;;  %v3327_v47 = vsel %vm212_vm0, %v5853_v43, %v2718_v54  ;;  %v5276_v54 = vld [vmem:[%s6497_s29 + $0x2aa] sm:$0xff] }
 0x31a   : > { %v8526_v44 = vpop.f32.mrb[48].mxu0 }
 0x31b   : > { %9799 = vst [vmem:[#allocation14_spill] sm:$0xff] %v8526_v44  ;;  %v8528_v25 = vpop.f32.mrb[49].mxu0  ;;  %v2912_v16 = vpop.permute.xlu1 %2911 }
 0x31c   : > { %9800 = vst [vmem:[#allocation7_spill] sm:$0xff] %v8528_v25  ;;  %v2910_v61 = vpop.permute.xlu0 %2909  ;;  %v3392_v37 = vsel %vm1546_vm2, %v3328_v42, %v2912_v16  ;;  %v5275_v16 = vld [vmem:[%s6497_s29 + $0x2a2] sm:$0xff] }
 0x31d   : > { %2759 = vrot.lane.b32.xlu1 %v5274_v46, %s5943_s30  ;;  %2757 = vrot.lane.b32.xlu0 %v5273_v56, %s5943_s30  ;;  %v3391_v46 = vsel %vm1546_vm2, %v3327_v47, %v2910_v61 }
 0x31e   : > { %v8534_v35 = vpop.f32.mrb[50].mxu0 }
 0x31f   : > { %9801 = vst [vmem:[#allocation15_spill] sm:$0xff] %v8534_v35  ;;  %v8539_v30 = vpop.f32.mrb[51].mxu0  ;;  %v3168_v48 = vpop.permute.xlu1 %3167 }
 0x320   : > { %9802 = vst [vmem:[#allocation8_spill] sm:$0xff] %v8539_v30  ;;  %v3456_v25 = vsel %vm1611_vm3, %v3392_v37, %v3168_v48  ;;  %v3166_v56 = vpop.permute.xlu0 %3165 }
 0x321   : > { %v3455_v44 = vsel %vm1611_vm3, %v3391_v46, %v3166_v56  ;;  %2951 = vrot.lane.b32.xlu1 %v5854_v52, %s5944_s5  ;;  %2949 = vrot.lane.b32.xlu0 %v5855_v1, %s5944_s5  ;;  %v5856_v46 = vld [vmem:[%s6497_s29 + $0x1b9] sm:$0xff]  ;;  %v5857_v52 = vld [vmem:[%s6497_s29 + $0x1b1] sm:$0xff] }
 0x322   : > { %v8548_v35 = vpop.f32.mrb[52].mxu0  ;;  %5660 = vmatprep.mubr.msk.f32.mxu1 %vm1683_vm4, %v3455_v44 }
 0x323   : > { %9803 = vst [vmem:[#allocation18_spill] sm:$0xff] %v8548_v35  ;;  %v8553_v61 = vpop.f32.mrb[53].mxu0  ;;  %5661 = vmatmul.mubr.msk.f32.gmra.mrb[30].mxu1 %vm1683_vm4, %v3456_v25  ;;  %v2724_v42 = vpop.permute.xlu1 %2723 }
 0x324   : > { %9804 = vst [vmem:[#allocation9_spill] sm:$0xff] %v8553_v61  ;;  %v2722_v43 = vpop.permute.xlu0 %2721  ;;  %v3330_v25 = vsel %vm212_vm0, %v5856_v46, %v2724_v42  ;;  %v5858_v42 = vld [vmem:[%s6497_s29 + $0x2c1] sm:$0xff]  ;;  %v5859_v46 = vld [vmem:[%s6497_s29 + $0x2b9] sm:$0xff] }
 0x325   : > { %3207 = vrot.lane.b32.xlu1 %v5276_v54, %s5945_s10  ;;  %3205 = vrot.lane.b32.xlu0 %v5275_v16, %s5945_s10  ;;  %v3329_v1 = vsel %vm212_vm0, %v5857_v52, %v2722_v43  ;;  %v5278_v43 = vld [vmem:[%s6497_s29 + $0x2c2] sm:$0xff] }
 0x326   : > { %v8558_v47 = vpop.f32.mrb[54].mxu0 }
 0x327   : > { %9805 = vst [vmem:[#allocation19_spill] sm:$0xff] %v8558_v47  ;;  %v8560_v37 = vpop.f32.mrb[55].mxu0  ;;  %v2916_v48 = vpop.permute.xlu1 %2915 }
 0x328   : > { %9806 = vst [vmem:[#allocation12_spill] sm:$0xff] %v8560_v37  ;;  %v2914_v44 = vpop.permute.xlu0 %2913  ;;  %v3394_v37 = vsel %vm1546_vm2, %v3330_v25, %v2916_v48  ;;  %v5277_v48 = vld [vmem:[%s6497_s29 + $0x2ba] sm:$0xff] }
 0x329   : > { %2763 = vrot.lane.b32.xlu1 %v5276_v54, %s5943_s30  ;;  %2761 = vrot.lane.b32.xlu0 %v5275_v16, %s5943_s30  ;;  %v3393_v54 = vsel %vm1546_vm2, %v3329_v1, %v2914_v44 }
 0x32a   : > { %v8566_v56 = vpop.f32.mrb[56].mxu0 }
 0x32b   : > { %9807 = vst [vmem:[#allocation22_spill] sm:$0xff] %v8566_v56  ;;  %v8571_v47 = vpop.f32.mrb[57].mxu0  ;;  %v3172_v61 = vpop.permute.xlu1 %3171 }
 0x32c   : > { %9808 = vst [vmem:[#allocation13_spill] sm:$0xff] %v8571_v47  ;;  %v3458_v35 = vsel %vm1611_vm3, %v3394_v37, %v3172_v61  ;;  %v3170_v16 = vpop.permute.xlu0 %3169 }
 0x32d   : > { %v3457_v30 = vsel %vm1611_vm3, %v3393_v54, %v3170_v16  ;;  %2955 = vrot.lane.b32.xlu1 %v5858_v42, %s5944_s5  ;;  %2953 = vrot.lane.b32.xlu0 %v5859_v46, %s5944_s5  ;;  %v5860_v54 = vld [vmem:[%s6497_s29 + $0x1d1] sm:$0xff]  ;;  %v5861_v42 = vld [vmem:[%s6497_s29 + $0x1c9] sm:$0xff] }
 0x32e   : > { %v8580_v56 = vpop.f32.mrb[58].mxu0  ;;  %5663 = vmatprep.mubr.msk.f32.mxu1 %vm1683_vm4, %v3457_v30 }
 0x32f   : > { %9809 = vst [vmem:[#allocation23_spill] sm:$0xff] %v8580_v56  ;;  %v8585_v44 = vpop.f32.mrb[59].mxu0  ;;  %5664 = vmatmul.mubr.msk.f32.gmra.mrb[32].mxu1 %vm1683_vm4, %v3458_v35  ;;  %v2728_v61 = vpop.permute.xlu1 %2727 }
 0x330   : > { %9810 = vst [vmem:[#allocation16_spill] sm:$0xff] %v8585_v44  ;;  %v2726_v37 = vpop.permute.xlu0 %2725  ;;  %v3332_v35 = vsel %vm212_vm0, %v5860_v54, %v2728_v61  ;;  %v5862_v61 = vld [vmem:[%s6497_s29 + $0x2d9] sm:$0xff]  ;;  %v5863_v54 = vld [vmem:[%s6497_s29 + $0x2d1] sm:$0xff] }
 0x331   : > { %3211 = vrot.lane.b32.xlu1 %v5278_v43, %s5945_s10  ;;  %3209 = vrot.lane.b32.xlu0 %v5277_v48, %s5945_s10  ;;  %v3331_v46 = vsel %vm212_vm0, %v5861_v42, %v2726_v37  ;;  %v5280_v37 = vld [vmem:[%s6497_s29 + $0x2da] sm:$0xff] }
 0x332   : > { %v8590_v25 = vpop.f32.mrb[60].mxu0 }
 0x333   : > { %9811 = vst [vmem:[#allocation26_spill] sm:$0xff] %v8590_v25  ;;  %v8592_v52 = vpop.f32.mrb[61].mxu0  ;;  %v2920_v1 = vpop.permute.xlu1 %2919 }
 0x334   : > { %9812 = vst [vmem:[#allocation17_spill] sm:$0xff] %v8592_v52  ;;  %v2918_v30 = vpop.permute.xlu0 %2917  ;;  %v3396_v52 = vsel %vm1546_vm2, %v3332_v35, %v2920_v1  ;;  %v5279_v1 = vld [vmem:[%s6497_s29 + $0x2d2] sm:$0xff] }
 0x335   : > { %2767 = vrot.lane.b32.xlu1 %v5278_v43, %s5943_s30  ;;  %2765 = vrot.lane.b32.xlu0 %v5277_v48, %s5943_s30  ;;  %v3395_v43 = vsel %vm1546_vm2, %v3331_v46, %v2918_v30 }
 0x336   : > { %v8598_v16 = vpop.f32.mrb[62].mxu0 }
 0x337   : > { %9813 = vst [vmem:[#allocation27_spill] sm:$0xff] %v8598_v16  ;;  %v8603_v25 = vpop.f32.mrb[63].mxu0  ;;  %v3176_v44 = vpop.permute.xlu1 %3175  ;;  %v5866_v16 = vld [vmem:[%s6497_s29 + $0x2f1] sm:$0xff] }
 0x338   : > { %9814 = vst [vmem:[#allocation20_spill] sm:$0xff] %v8603_v25  ;;  %v3460_v56 = vsel %vm1611_vm3, %v3396_v52, %v3176_v44  ;;  %v3174_v48 = vpop.permute.xlu0 %3173 }
 0x339   : > { %v3459_v47 = vsel %vm1611_vm3, %v3395_v43, %v3174_v48  ;;  %2959 = vrot.lane.b32.xlu1 %v5862_v61, %s5944_s5  ;;  %2957 = vrot.lane.b32.xlu0 %v5863_v54, %s5944_s5 }
 0x33a   : > { %5666 = vmatprep.mubr.msk.f32.mxu1 %vm1683_vm4, %v3459_v47  ;;  %v5864_v47 = vld [vmem:[%s6497_s29 + $0x1e9] sm:$0xff] }
 0x33b   : > { %5667 = vmatmul.mubr.msk.f32.gmra.mrb[34].mxu1 %vm1683_vm4, %v3460_v56  ;;  %v2732_v30 = vpop.permute.xlu1 %2731  ;;  %v5865_v56 = vld [vmem:[%s6497_s29 + $0x1e1] sm:$0xff] }
 0x33c   : > { %v2730_v35 = vpop.permute.xlu0 %2729  ;;  %v3334_v42 = vsel %vm212_vm0, %v5864_v47, %v2732_v30  ;;  %v5282_v30 = vld [vmem:[%s6497_s29 + $0x2f2] sm:$0xff]  ;;  %v5868_v47 = vld [vmem:[%s6497_s29 + $0x201] sm:$0xff] }
 0x33d   : > { %3215 = vrot.lane.b32.xlu1 %v5280_v37, %s5945_s10  ;;  %3213 = vrot.lane.b32.xlu0 %v5279_v1, %s5945_s10  ;;  %v3333_v46 = vsel %vm212_vm0, %v5865_v56, %v2730_v35  ;;  %v5281_v35 = vld [vmem:[%s6497_s29 + $0x2ea] sm:$0xff]  ;;  %v5869_v56 = vld [vmem:[%s6497_s29 + $0x1f9] sm:$0xff] }
 0x33f   : > { %v2924_v44 = vpop.permute.xlu1 %2923 }
 0x340   : > { %v2922_v52 = vpop.permute.xlu0 %2921  ;;  %v3398_v43 = vsel %vm1546_vm2, %v3334_v42, %v2924_v44 }
 0x341   : > { %2771 = vrot.lane.b32.xlu1 %v5280_v37, %s5943_s30  ;;  %2769 = vrot.lane.b32.xlu0 %v5279_v1, %s5943_s30  ;;  %v3397_v61 = vsel %vm1546_vm2, %v3333_v46, %v2922_v52  ;;  %v5867_v1 = vld [vmem:[%s6497_s29 + $0x2e9] sm:$0xff] }
 0x343   : > { %v3180_v48 = vpop.permute.xlu1 %3179 }
 0x344   : > { %v3462_v54 = vsel %vm1611_vm3, %v3398_v43, %v3180_v48  ;;  %v3178_v25 = vpop.permute.xlu0 %3177 }
 0x345   : > { %v3461_v37 = vsel %vm1611_vm3, %v3397_v61, %v3178_v25  ;;  %2963 = vrot.lane.b32.xlu1 %v5866_v16, %s5944_s5  ;;  %2961 = vrot.lane.b32.xlu0 %v5867_v1, %s5944_s5 }
 0x346   : > { %5669 = vmatprep.mubr.msk.f32.mxu1 %vm1683_vm4, %v3461_v37 }
 0x347   : > { %5670 = vmatmul.mubr.msk.f32.gmra.mrb[36].mxu1 %vm1683_vm4, %v3462_v54  ;;  %v2736_v44 = vpop.permute.xlu1 %2735 }
 0x348   : > { %v2734_v52 = vpop.permute.xlu0 %2733  ;;  %v3336_v42 = vsel %vm212_vm0, %v5868_v47, %v2736_v44  ;;  %v5284_v44 = vld [vmem:[%s6497_s29 + $0x30a] sm:$0xff] }
 0x349   : > { %3219 = vrot.lane.b32.xlu1 %v5282_v30, %s5945_s10  ;;  %3217 = vrot.lane.b32.xlu0 %v5281_v35, %s5945_s10  ;;  %v3335_v46 = vsel %vm212_vm0, %v5869_v56, %v2734_v52  ;;  %v5283_v52 = vld [vmem:[%s6497_s29 + $0x302] sm:$0xff]  ;;  %v5872_v56 = vld [vmem:[%s6497_s29 + $0x219] sm:$0xff] }
 0x34b   : > { %v2928_v25 = vpop.permute.xlu1 %2927 }
 0x34c   : > { %v2926_v16 = vpop.permute.xlu0 %2925  ;;  %v3400_v43 = vsel %vm1546_vm2, %v3336_v42, %v2928_v25 }
 0x34d   : > { %2775 = vrot.lane.b32.xlu1 %v5282_v30, %s5943_s30  ;;  %2773 = vrot.lane.b32.xlu0 %v5281_v35, %s5943_s30  ;;  %v3399_v61 = vsel %vm1546_vm2, %v3335_v46, %v2926_v16  ;;  %v5870_v30 = vld [vmem:[%s6497_s29 + $0x309] sm:$0xff]  ;;  %v5871_v35 = vld [vmem:[%s6497_s29 + $0x301] sm:$0xff] }
 0x34f   : > { %v3184_v48 = vpop.permute.xlu1 %3183 }
 0x350   : > { %v3464_v54 = vsel %vm1611_vm3, %v3400_v43, %v3184_v48  ;;  %v3182_v37 = vpop.permute.xlu0 %3181  ;;  %v5873_v43 = vld [vmem:[%s6497_s29 + $0x211] sm:$0xff] }
 0x351   : > { %v3463_v1 = vsel %vm1611_vm3, %v3399_v61, %v3182_v37  ;;  %2967 = vrot.lane.b32.xlu1 %v5870_v30, %s5944_s5  ;;  %2965 = vrot.lane.b32.xlu0 %v5871_v35, %s5944_s5 }
 0x352   : > { %5672 = vmatprep.mubr.msk.f32.mxu1 %vm1683_vm4, %v3463_v1 }
 0x353   : > { %5673 = vmatmul.mubr.msk.f32.gmra.mrb[38].mxu1 %vm1683_vm4, %v3464_v54  ;;  %v2740_v25 = vpop.permute.xlu1 %2739 }
 0x354   : > { %v2738_v16 = vpop.permute.xlu0 %2737  ;;  %v3338_v46 = vsel %vm212_vm0, %v5872_v56, %v2740_v25  ;;  %v5286_v25 = vld [vmem:[%s6497_s29 + $0x322] sm:$0xff] }
 0x355   : > { %3223 = vrot.lane.b32.xlu1 %v5284_v44, %s5945_s10  ;;  %3221 = vrot.lane.b32.xlu0 %v5283_v52, %s5945_s10  ;;  %v3337_v48 = vsel %vm212_vm0, %v5873_v43, %v2738_v16  ;;  %v5285_v16 = vld [vmem:[%s6497_s29 + $0x31a] sm:$0xff]  ;;  %v5876_v43 = vld [vmem:[%s6497_s29 + $0x231] sm:$0xff] }
 0x357   : > { %v2932_v47 = vpop.permute.xlu1 %2931 }
 0x358   : > { %v2930_v42 = vpop.permute.xlu0 %2929  ;;  %v3402_v61 = vsel %vm1546_vm2, %v3338_v46, %v2932_v47 }
 0x359   : > { %2779 = vrot.lane.b32.xlu1 %v5284_v44, %s5943_s30  ;;  %2777 = vrot.lane.b32.xlu0 %v5283_v52, %s5943_s30  ;;  %v3401_v37 = vsel %vm1546_vm2, %v3337_v48, %v2930_v42  ;;  %v5874_v44 = vld [vmem:[%s6497_s29 + $0x321] sm:$0xff]  ;;  %v5875_v52 = vld [vmem:[%s6497_s29 + $0x319] sm:$0xff] }
 0x35b   : > { %v3188_v54 = vpop.permute.xlu1 %3187 }
 0x35c   : > { %v3466_v1 = vsel %vm1611_vm3, %v3402_v61, %v3188_v54  ;;  %v3186_v30 = vpop.permute.xlu0 %3185  ;;  %v5877_v61 = vld [vmem:[%s6497_s29 + $0x229] sm:$0xff] }
 0x35d   : > { %v3465_v35 = vsel %vm1611_vm3, %v3401_v37, %v3186_v30  ;;  %2971 = vrot.lane.b32.xlu1 %v5874_v44, %s5944_s5  ;;  %2969 = vrot.lane.b32.xlu0 %v5875_v52, %s5944_s5 }
 0x35e   : > { %5675 = vmatprep.mubr.msk.f32.mxu1 %vm1683_vm4, %v3465_v35 }
 0x35f   : > { %5676 = vmatmul.mubr.msk.f32.gmra.mrb[40].mxu1 %vm1683_vm4, %v3466_v1  ;;  %v2744_v47 = vpop.permute.xlu1 %2743 }
 0x360   : > { %v2742_v42 = vpop.permute.xlu0 %2741  ;;  %v3340_v48 = vsel %vm212_vm0, %v5876_v43, %v2744_v47  ;;  %v5288_v47 = vld [vmem:[%s6497_s29 + $0x33a] sm:$0xff] }
 0x361   : > { %3227 = vrot.lane.b32.xlu1 %v5286_v25, %s5945_s10  ;;  %3225 = vrot.lane.b32.xlu0 %v5285_v16, %s5945_s10  ;;  %v3339_v54 = vsel %vm212_vm0, %v5877_v61, %v2742_v42  ;;  %v5287_v42 = vld [vmem:[%s6497_s29 + $0x332] sm:$0xff]  ;;  %v8701_v61 = vld [vmem:[%s9550_s2] ss:$0 sm:$0xff] }
 0x363   : > { %v2936_v56 = vpop.permute.xlu1 %2935 }
 0x364   : > { %v2934_v46 = vpop.permute.xlu0 %2933  ;;  %v3404_v37 = vsel %vm1546_vm2, %v3340_v48, %v2936_v56 }
 0x365   : > { %2783 = vrot.lane.b32.xlu1 %v5286_v25, %s5943_s30  ;;  %2781 = vrot.lane.b32.xlu0 %v5285_v16, %s5943_s30  ;;  %v3403_v30 = vsel %vm1546_vm2, %v3339_v54, %v2934_v46  ;;  %v5878_v25 = vld [vmem:[%s6497_s29 + $0x339] sm:$0xff]  ;;  %v5879_v16 = vld [vmem:[%s6497_s29 + $0x331] sm:$0xff]  ;;  %s5366_s30 = sshll.u32 (%p6004_p3), %s5932_s17, 4 }
 0x366   : > { %s9406_s7 = scalar_lea.vmem (%p6004_p3), %s9552_s4, %s5366_s30 }
 0x367   : > { %v3192_v1 = vpop.permute.xlu1 %3191 }
 0x368   : > { %v3468_v35 = vsel %vm1611_vm3, %v3404_v37, %v3192_v1  ;;  %v3190_v44 = vpop.permute.xlu0 %3189  ;;  %v5880_v37 = vld [vmem:[%s6497_s29 + $0x249] sm:$0xff] }
 0x369   : > { %v3467_v52 = vsel %vm1611_vm3, %v3403_v30, %v3190_v44  ;;  %2975 = vrot.lane.b32.xlu1 %v5878_v25, %s5944_s5  ;;  %2973 = vrot.lane.b32.xlu0 %v5879_v16, %s5944_s5  ;;  %v8709_v44 = vld [vmem:[%s9551_s3] ss:$0 sm:$0xff] }
 0x36a   : > { %5678 = vmatprep.mubr.msk.f32.mxu1 %vm1683_vm4, %v3467_v52  ;;  %v5881_v52 = vld [vmem:[%s6497_s29 + $0x241] sm:$0xff] }
 0x36b   : > { %5679 = vmatmul.mubr.msk.f32.gmra.mrb[42].mxu1 %vm1683_vm4, %v3468_v35  ;;  %v2748_v56 = vpop.permute.xlu1 %2747 }
 0x36c   : > { %v2746_v46 = vpop.permute.xlu0 %2745  ;;  %v3342_v1 = vsel %vm212_vm0, %v5880_v37, %v2748_v56 }
 0x36d   : > { %3231 = vrot.lane.b32.xlu1 %v5288_v47, %s5945_s10  ;;  %3229 = vrot.lane.b32.xlu0 %v5287_v42, %s5945_s10  ;;  %v3341_v25 = vsel %vm212_vm0, %v5881_v52, %v2746_v46 }
 0x36f   : > { %v2940_v43 = vpop.permute.xlu1 %2939 }
 0x370   : > { %v2938_v48 = vpop.permute.xlu0 %2937  ;;  %v3406_v16 = vsel %vm1546_vm2, %v3342_v1, %v2940_v43 }
 0x371   : > { %v5617_v54 = vpop.f32.mrb[0].mxu1  ;;  %v3405_v36 = vsel %vm1546_vm2, %v3341_v25, %v2938_v48 }
 0x372   : > { %v4074_v30 = vmul.f32 %v5617_v54, %v8701_v61  ;;  %v3754_v35 = vpop.f32.mrb[1].mxu1 }
 0x373   : > { %v4073_v47 = vmul.f32 %v8701_v61, %v3754_v35  ;;  %v3196_v42 = vpop.permute.xlu1 %3195 }
 0x374   : > { %v4138_v56 = vadd.f32 %v8709_v44, %v4074_v30  ;;  %v3470_v54 = vsel %vm1611_vm3, %v3406_v16, %v3196_v42  ;;  %v3194_v37 = vpop.permute.xlu0 %3193  ;;  %v5882_v16 = vld [vmem:[%s6497_s29 + $0x261] sm:$0xff] }
 0x375   : > { %v4137_v7 = vadd.f32 %v8709_v44, %v4073_v47  ;;  %v3469_v24 = vsel %vm1611_vm3, %v3405_v36, %v3194_v37 }
 0x376   : > { %v4202_v59 = vmax.f32 %v4138_v56, 0.0  ;;  %5681 = vmatprep.mubr.msk.f32.mxu1 %vm1683_vm4, %v3469_v24 }
 0x377   : > { %v4201_v46 = vmax.f32 %v4137_v7, 0.0  ;;  %5682 = vmatmul.mubr.msk.f32.gmra.mrb[44].mxu1 %vm1683_vm4, %v3470_v54  ;;  %v2752_v43 = vpop.permute.xlu1 %2751 }
 0x378   : > { %4331 = vrot.lane.b32.xlu1 %v4202_v59, %s5946_s20  ;;  %v2750_v48 = vpop.permute.xlu0 %2749  ;;  %v3344_v47 = vsel %vm212_vm0, %v5882_v16, %v2752_v43  ;;  %v5883_v59 = vld [vmem:[%s6497_s29 + $0x259] sm:$0xff] }
 0x379   : > { %v5620_v1 = vpop.f32.mrb[2].mxu1  ;;  %4329 = vrot.lane.b32.xlu0 %v4201_v46, %s5946_s20  ;;  %v3343_v56 = vsel %vm212_vm0, %v5883_v59, %v2750_v48 }
 0x37a   : > { %v4076_v30 = vmul.f32 %v5620_v1, %v8701_v61  ;;  %v3764_v35 = vpop.f32.mrb[3].mxu1 }
 0x37b   : > { %v4075_v36 = vmul.f32 %v8701_v61, %v3764_v35  ;;  %v2944_v52 = vpop.permute.xlu1 %2943 }
 0x37c   : > { %v4140_v24 = vadd.f32 %v8709_v44, %v4076_v30  ;;  %v2942_v7 = vpop.permute.xlu0 %2941  ;;  %v3408_v37 = vsel %vm1546_vm2, %v3344_v47, %v2944_v52 }
 0x37d   : > { %v4139_v25 = vadd.f32 %v8709_v44, %v4075_v36  ;;  %v3407_v1 = vsel %vm1546_vm2, %v3343_v56, %v2942_v7 }
 0x37e   : > { %v4204_v42 = vmax.f32 %v4140_v24, 0.0 }
 0x37f   : > { %v4203_v54 = vmax.f32 %v4139_v25, 0.0  ;;  %v3200_v46 = vpop.permute.xlu1 %3199 }
 0x380   : > { %v3472_v35 = vsel %vm1611_vm3, %v3408_v37, %v3200_v46  ;;  %4335 = vrot.lane.b32.xlu1 %v4204_v42, %s5946_s20  ;;  %v3198_v30 = vpop.permute.xlu0 %3197 }
 0x381   : > { %v3471_v36 = vsel %vm1611_vm3, %v3407_v1, %v3198_v30  ;;  %v5623_v57 = vpop.f32.mrb[4].mxu1  ;;  %4333 = vrot.lane.b32.xlu0 %v4203_v54, %s5946_s20  ;;  %v5884_v54 = vld [vmem:[%s6497_s29 + $0x279] sm:$0xff] }
 0x382   : > { %v4078_v43 = vmul.f32 %v5623_v57, %v8701_v61  ;;  %v3774_v48 = vpop.f32.mrb[5].mxu1  ;;  %5684 = vmatprep.mubr.msk.f32.mxu1 %vm1683_vm4, %v3471_v36 }
 0x383   : > { %v4077_v52 = vmul.f32 %v8701_v61, %v3774_v48  ;;  %5685 = vmatmul.mubr.msk.f32.gmra.mrb[46].mxu1 %vm1683_vm4, %v3472_v35  ;;  %v2756_v24 = vpop.permute.xlu1 %2755  ;;  %v5885_v35 = vld [vmem:[%s6497_s29 + $0x271] sm:$0xff] }
 0x384   : > { %v4142_v7 = vadd.f32 %v8709_v44, %v4078_v43  ;;  %v2754_v25 = vpop.permute.xlu0 %2753  ;;  %v3346_v37 = vsel %vm212_vm0, %v5884_v54, %v2756_v24 }
 0x385   : > { %v4141_v16 = vadd.f32 %v8709_v44, %v4077_v52  ;;  %v3345_v30 = vsel %vm212_vm0, %v5885_v35, %v2754_v25 }
 0x386   : > { %v4206_v47 = vmax.f32 %v4142_v7, 0.0 }
 0x387   : > { %v4205_v42 = vmax.f32 %v4141_v16, 0.0  ;;  %v2948_v59 = vpop.permute.xlu1 %2947 }
 0x388   : > { %4339 = vrot.lane.b32.xlu1 %v4206_v47, %s5946_s20  ;;  %v2946_v57 = vpop.permute.xlu0 %2945  ;;  %v3410_v36 = vsel %vm1546_vm2, %v3346_v37, %v2948_v59 }
 0x389   : > { %v5626_v56 = vpop.f32.mrb[6].mxu1  ;;  %4337 = vrot.lane.b32.xlu0 %v4205_v42, %s5946_s20  ;;  %v3409_v52 = vsel %vm1546_vm2, %v3345_v30, %v2946_v57 }
 0x38a   : > { %v4080_v46 = vmul.f32 %v5626_v56, %v8701_v61  ;;  %v3784_v1 = vpop.f32.mrb[7].mxu1 }
 0x38b   : > { %v4079_v43 = vmul.f32 %v8701_v61, %v3784_v1  ;;  %v3204_v48 = vpop.permute.xlu1 %3203 }
 0x38c   : > { %v4144_v7 = vadd.f32 %v8709_v44, %v4080_v46  ;;  %v3474_v16 = vsel %vm1611_vm3, %v3410_v36, %v3204_v48  ;;  %v3202_v47 = vpop.permute.xlu0 %3201  ;;  %v5886_v48 = vld [vmem:[%s6497_s29 + $0x291] sm:$0xff] }
 0x38d   : > { %v4143_v24 = vadd.f32 %v8709_v44, %v4079_v43  ;;  %v3473_v42 = vsel %vm1611_vm3, %v3409_v52, %v3202_v47 }
 0x38e   : > { %v4208_v56 = vmax.f32 %v4144_v7, 0.0  ;;  %5687 = vmatprep.mubr.msk.f32.mxu1 %vm1683_vm4, %v3473_v42 }
 0x38f   : > { %v4207_v25 = vmax.f32 %v4143_v24, 0.0  ;;  %5688 = vmatmul.mubr.msk.f32.gmra.mrb[48].mxu1 %vm1683_vm4, %v3474_v16  ;;  %v2760_v59 = vpop.permute.xlu1 %2759  ;;  %v5887_v16 = vld [vmem:[%s6497_s29 + $0x289] sm:$0xff] }
 0x390   : > { %4343 = vrot.lane.b32.xlu1 %v4208_v56, %s5946_s20  ;;  %v2758_v57 = vpop.permute.xlu0 %2757  ;;  %v3348_v52 = vsel %vm212_vm0, %v5886_v48, %v2760_v59 }
 0x391   : > { %v5629_v54 = vpop.f32.mrb[8].mxu1  ;;  %4341 = vrot.lane.b32.xlu0 %v4207_v25, %s5946_s20  ;;  %v3347_v47 = vsel %vm212_vm0, %v5887_v16, %v2758_v57 }
 0x392   : > { %v4082_v37 = vmul.f32 %v5629_v54, %v8701_v61  ;;  %v3794_v46 = vpop.f32.mrb[9].mxu1 }
 0x393   : > { %v4081_v1 = vmul.f32 %v8701_v61, %v3794_v46  ;;  %v2952_v35 = vpop.permute.xlu1 %2951 }
 0x394   : > { %v4146_v30 = vadd.f32 %v8709_v44, %v4082_v37  ;;  %v2950_v36 = vpop.permute.xlu0 %2949  ;;  %v3412_v42 = vsel %vm1546_vm2, %v3348_v52, %v2952_v35 }
 0x395   : > { %v4145_v43 = vadd.f32 %v8709_v44, %v4081_v1  ;;  %v3411_v25 = vsel %vm1546_vm2, %v3347_v47, %v2950_v36 }
 0x396   : > { %v4210_v7 = vmax.f32 %v4146_v30, 0.0 }
 0x397   : > { %v4209_v24 = vmax.f32 %v4145_v43, 0.0  ;;  %v3208_v56 = vpop.permute.xlu1 %3207 }
 0x398   : > { %v3476_v54 = vsel %vm1611_vm3, %v3412_v42, %v3208_v56  ;;  %4347 = vrot.lane.b32.xlu1 %v4210_v7, %s5946_s20  ;;  %v3206_v37 = vpop.permute.xlu0 %3205  ;;  %v5888_v42 = vld [vmem:[%s6497_s29 + $0x2a9] sm:$0xff] }
 0x399   : > { %v3475_v46 = vsel %vm1611_vm3, %v3411_v25, %v3206_v37  ;;  %v5632_v1 = vpop.f32.mrb[10].mxu1  ;;  %4345 = vrot.lane.b32.xlu0 %v4209_v24, %s5946_s20  ;;  %v5889_v37 = vld [vmem:[%s6497_s29 + $0x2a1] sm:$0xff] }
 0x39a   : > { %v4084_v59 = vmul.f32 %v5632_v1, %v8701_v61  ;;  %v3804_v57 = vpop.f32.mrb[11].mxu1  ;;  %5690 = vmatprep.mubr.msk.f32.mxu1 %vm1683_vm4, %v3475_v46 }
 0x39b   : > { %v4083_v35 = vmul.f32 %v8701_v61, %v3804_v57  ;;  %5691 = vmatmul.mubr.msk.f32.gmra.mrb[50].mxu1 %vm1683_vm4, %v3476_v54  ;;  %v2764_v30 = vpop.permute.xlu1 %2763 }
 0x39c   : > { %v4148_v36 = vadd.f32 %v8709_v44, %v4084_v59  ;;  %v2762_v43 = vpop.permute.xlu0 %2761  ;;  %v3350_v56 = vsel %vm212_vm0, %v5888_v42, %v2764_v30 }
 0x39d   : > { %v4147_v48 = vadd.f32 %v8709_v44, %v4083_v35  ;;  %v3349_v46 = vsel %vm212_vm0, %v5889_v37, %v2762_v43 }
 0x39e   : > { %v4212_v52 = vmax.f32 %v4148_v36, 0.0 }
 0x39f   : > { %v4211_v7 = vmax.f32 %v4147_v48, 0.0  ;;  %v2956_v16 = vpop.permute.xlu1 %2955 }
 0x3a0   : > { %4351 = vrot.lane.b32.xlu1 %v4212_v52, %s5946_s20  ;;  %v2954_v47 = vpop.permute.xlu0 %2953  ;;  %v3414_v1 = vsel %vm1546_vm2, %v3350_v56, %v2956_v16 }
 0x3a1   : > { %v5635_v24 = vpop.f32.mrb[12].mxu1  ;;  %4349 = vrot.lane.b32.xlu0 %v4211_v7, %s5946_s20  ;;  %v3413_v35 = vsel %vm1546_vm2, %v3349_v46, %v2954_v47 }
 0x3a2   : > { %v4086_v25 = vmul.f32 %v5635_v24, %v8701_v61  ;;  %v3814_v54 = vpop.f32.mrb[13].mxu1 }
 0x3a3   : > { %v4085_v59 = vmul.f32 %v8701_v61, %v3814_v54  ;;  %v3212_v57 = vpop.permute.xlu1 %3211 }
 0x3a4   : > { %v4150_v36 = vadd.f32 %v8709_v44, %v4086_v25  ;;  %v3478_v48 = vsel %vm1611_vm3, %v3414_v1, %v3212_v57  ;;  %v3210_v52 = vpop.permute.xlu0 %3209  ;;  %v5890_v57 = vld [vmem:[%s6497_s29 + $0x2c1] sm:$0xff] }
 0x3a5   : > { %v4149_v30 = vadd.f32 %v8709_v44, %v4085_v59  ;;  %v3477_v7 = vsel %vm1611_vm3, %v3413_v35, %v3210_v52 }
 0x3a6   : > { %v4214_v24 = vmax.f32 %v4150_v36, 0.0  ;;  %5693 = vmatprep.mubr.msk.f32.mxu1 %vm1683_vm4, %v3477_v7 }
 0x3a7   : > { %v4213_v43 = vmax.f32 %v4149_v30, 0.0  ;;  %5694 = vmatmul.mubr.msk.f32.gmra.mrb[52].mxu1 %vm1683_vm4, %v3478_v48  ;;  %v2768_v16 = vpop.permute.xlu1 %2767  ;;  %v5891_v48 = vld [vmem:[%s6497_s29 + $0x2b9] sm:$0xff] }
 0x3a8   : > { %4355 = vrot.lane.b32.xlu1 %v4214_v24, %s5946_s20  ;;  %v2766_v47 = vpop.permute.xlu0 %2765  ;;  %v3352_v35 = vsel %vm212_vm0, %v5890_v57, %v2768_v16 }
 0x3a9   : > { %v5638_v42 = vpop.f32.mrb[14].mxu1  ;;  %4353 = vrot.lane.b32.xlu0 %v4213_v43, %s5946_s20  ;;  %v3351_v52 = vsel %vm212_vm0, %v5891_v48, %v2766_v47 }
 0x3aa   : > { %v4088_v56 = vmul.f32 %v5638_v42, %v8701_v61  ;;  %v3824_v25 = vpop.f32.mrb[15].mxu1 }
 0x3ab   : > { %v4087_v54 = vmul.f32 %v8701_v61, %v3824_v25  ;;  %v2960_v37 = vpop.permute.xlu1 %2959 }
 0x3ac   : > { %v4152_v46 = vadd.f32 %v8709_v44, %v4088_v56  ;;  %v2958_v1 = vpop.permute.xlu0 %2957  ;;  %v3416_v7 = vsel %vm1546_vm2, %v3352_v35, %v2960_v37 }
 0x3ad   : > { %v4151_v59 = vadd.f32 %v8709_v44, %v4087_v54  ;;  %v3415_v43 = vsel %vm1546_vm2, %v3351_v52, %v2958_v1 }
 0x3ae   : > { %v4216_v36 = vmax.f32 %v4152_v46, 0.0 }
 0x3af   : > { %v4215_v30 = vmax.f32 %v4151_v59, 0.0  ;;  %v3216_v24 = vpop.permute.xlu1 %3215 }
 0x3b0   : > { %v3480_v42 = vsel %vm1611_vm3, %v3416_v7, %v3216_v24  ;;  %4359 = vrot.lane.b32.xlu1 %v4216_v36, %s5946_s20  ;;  %v3214_v56 = vpop.permute.xlu0 %3213  ;;  %v5892_v7 = vld [vmem:[%s6497_s29 + $0x2d9] sm:$0xff] }
 0x3b1   : > { %v3479_v25 = vsel %vm1611_vm3, %v3415_v43, %v3214_v56  ;;  %v5641_v54 = vpop.f32.mrb[16].mxu1  ;;  %4357 = vrot.lane.b32.xlu0 %v4215_v30, %s5946_s20  ;;  %v5893_v56 = vld [vmem:[%s6497_s29 + $0x2d1] sm:$0xff] }
 0x3b2   : > { %v4090_v16 = vmul.f32 %v5641_v54, %v8701_v61  ;;  %v3834_v47 = vpop.f32.mrb[17].mxu1  ;;  %5696 = vmatprep.mubr.msk.f32.mxu1 %vm1683_vm4, %v3479_v25 }
 0x3b3   : > { %v4089_v37 = vmul.f32 %v8701_v61, %v3834_v47  ;;  %5697 = vmatmul.mubr.msk.f32.gmra.mrb[54].mxu1 %vm1683_vm4, %v3480_v42  ;;  %v2772_v46 = vpop.permute.xlu1 %2771 }
 0x3b4   : > { %v4154_v1 = vadd.f32 %v8709_v44, %v4090_v16  ;;  %v2770_v59 = vpop.permute.xlu0 %2769  ;;  %v3354_v24 = vsel %vm212_vm0, %v5892_v7, %v2772_v46 }
 0x3b5   : > { %v4153_v57 = vadd.f32 %v8709_v44, %v4089_v37  ;;  %v3353_v25 = vsel %vm212_vm0, %v5893_v56, %v2770_v59 }
 0x3b6   : > { %v4218_v35 = vmax.f32 %v4154_v1, 0.0 }
 0x3b7   : > { %v4217_v36 = vmax.f32 %v4153_v57, 0.0  ;;  %v2964_v48 = vpop.permute.xlu1 %2963 }
 0x3b8   : > { %4363 = vrot.lane.b32.xlu1 %v4218_v35, %s5946_s20  ;;  %v2962_v52 = vpop.permute.xlu0 %2961  ;;  %v3418_v54 = vsel %vm1546_vm2, %v3354_v24, %v2964_v48 }
 0x3b9   : > { %v5644_v30 = vpop.f32.mrb[18].mxu1  ;;  %4361 = vrot.lane.b32.xlu0 %v4217_v36, %s5946_s20  ;;  %v3417_v37 = vsel %vm1546_vm2, %v3353_v25, %v2962_v52 }
 0x3ba   : > { %v4092_v43 = vmul.f32 %v5644_v30, %v8701_v61  ;;  %v3844_v42 = vpop.f32.mrb[19].mxu1 }
 0x3bb   : > { %v4091_v16 = vmul.f32 %v8701_v61, %v3844_v42  ;;  %v3220_v47 = vpop.permute.xlu1 %3219 }
 0x3bc   : > { %v4156_v1 = vadd.f32 %v8709_v44, %v4092_v43  ;;  %v3482_v57 = vsel %vm1611_vm3, %v3418_v54, %v3220_v47  ;;  %v3218_v35 = vpop.permute.xlu0 %3217  ;;  %v5894_v47 = vld [vmem:[%s6497_s29 + $0x2f1] sm:$0xff] }
 0x3bd   : > { %v4155_v46 = vadd.f32 %v8709_v44, %v4091_v16  ;;  %v3481_v36 = vsel %vm1611_vm3, %v3417_v37, %v3218_v35 }
 0x3be   : > { %v4220_v30 = vmax.f32 %v4156_v1, 0.0  ;;  %5699 = vmatprep.mubr.msk.f32.mxu1 %vm1683_vm4, %v3481_v36 }
 0x3bf   : > { %v4219_v59 = vmax.f32 %v4155_v46, 0.0  ;;  %5700 = vmatmul.mubr.msk.f32.gmra.mrb[56].mxu1 %vm1683_vm4, %v3482_v57  ;;  %v2776_v48 = vpop.permute.xlu1 %2775  ;;  %v5895_v57 = vld [vmem:[%s6497_s29 + $0x2e9] sm:$0xff] }
 0x3c0   : > { %4367 = vrot.lane.b32.xlu1 %v4220_v30, %s5946_s20  ;;  %v2774_v52 = vpop.permute.xlu0 %2773  ;;  %v3356_v37 = vsel %vm212_vm0, %v5894_v47, %v2776_v48 }
 0x3c1   : > { %v5647_v7 = vpop.f32.mrb[20].mxu1  ;;  %4365 = vrot.lane.b32.xlu0 %v4219_v59, %s5946_s20  ;;  %v3355_v35 = vsel %vm212_vm0, %v5895_v57, %v2774_v52 }
 0x3c2   : > { %v4094_v24 = vmul.f32 %v5647_v7, %v8701_v61  ;;  %v3854_v43 = vpop.f32.mrb[21].mxu1 }
 0x3c3   : > { %v4093_v42 = vmul.f32 %v8701_v61, %v3854_v43  ;;  %v2968_v56 = vpop.permute.xlu1 %2967 }
 0x3c4   : > { %v4158_v25 = vadd.f32 %v8709_v44, %v4094_v24  ;;  %v2966_v54 = vpop.permute.xlu0 %2965  ;;  %v3420_v36 = vsel %vm1546_vm2, %v3356_v37, %v2968_v56 }
 0x3c5   : > { %v4157_v16 = vadd.f32 %v8709_v44, %v4093_v42  ;;  %v3419_v59 = vsel %vm1546_vm2, %v3355_v35, %v2966_v54 }
 0x3c6   : > { %v4222_v1 = vmax.f32 %v4158_v25, 0.0 }
 0x3c7   : > { %v4221_v46 = vmax.f32 %v4157_v16, 0.0  ;;  %v3224_v30 = vpop.permute.xlu1 %3223 }
 0x3c8   : > { %v3484_v7 = vsel %vm1611_vm3, %v3420_v36, %v3224_v30  ;;  %4371 = vrot.lane.b32.xlu1 %v4222_v1, %s5946_s20  ;;  %v3222_v24 = vpop.permute.xlu0 %3221 }
 0x3c9   : > { %v3483_v43 = vsel %vm1611_vm3, %v3419_v59, %v3222_v24  ;;  %v5650_v42 = vpop.f32.mrb[22].mxu1  ;;  %4369 = vrot.lane.b32.xlu0 %v4221_v46, %s5946_s20  ;;  %v5896_v46 = vld [vmem:[%s6497_s29 + $0x309] sm:$0xff]  ;;  %v5897_v59 = vld [vmem:[%s6497_s29 + $0x301] sm:$0xff] }
 0x3ca   : > { %v4096_v48 = vmul.f32 %v5650_v42, %v8701_v61  ;;  %v3864_v52 = vpop.f32.mrb[23].mxu1  ;;  %5702 = vmatprep.mubr.msk.f32.mxu1 %vm1683_vm4, %v3483_v43 }
 0x3cb   : > { %v4095_v56 = vmul.f32 %v8701_v61, %v3864_v52  ;;  %5703 = vmatmul.mubr.msk.f32.gmra.mrb[58].mxu1 %vm1683_vm4, %v3484_v7  ;;  %v2780_v25 = vpop.permute.xlu1 %2779 }
 0x3cc   : > { %v4160_v54 = vadd.f32 %v8709_v44, %v4096_v48  ;;  %v2778_v16 = vpop.permute.xlu0 %2777  ;;  %v3358_v36 = vsel %vm212_vm0, %v5896_v46, %v2780_v25 }
 0x3cd   : > { %v4159_v47 = vadd.f32 %v8709_v44, %v4095_v56  ;;  %v3357_v7 = vsel %vm212_vm0, %v5897_v59, %v2778_v16  ;;  %v5898_v59 = vld [vmem:[%s6497_s29 + $0x321] sm:$0xff] }
 0x3ce   : > { %v4224_v37 = vmax.f32 %v4160_v54, 0.0 }
 0x3cf   : > { %v4223_v1 = vmax.f32 %v4159_v47, 0.0  ;;  %v2972_v57 = vpop.permute.xlu1 %2971 }
 0x3d0   : > { %4375 = vrot.lane.b32.xlu1 %v4224_v37, %s5946_s20  ;;  %v2970_v35 = vpop.permute.xlu0 %2969  ;;  %v3422_v24 = vsel %vm1546_vm2, %v3358_v36, %v2972_v57 }
 0x3d1   : > { %4373 = vrot.lane.b32.xlu0 %v4223_v1, %s5946_s20  ;;  %v3421_v52 = vsel %vm1546_vm2, %v3357_v7, %v2970_v35 }
 0x3d2   : > { %v5653_v30 = vpop.f32.mrb[24].mxu1 }
 0x3d3   : > { %v4098_v43 = vmul.f32 %v5653_v30, %v8701_v61  ;;  %v3874_v42 = vpop.f32.mrb[25].mxu1  ;;  %v3228_v48 = vpop.permute.xlu1 %3227 }
 0x3d4   : > { %v4097_v56 = vmul.f32 %v8701_v61, %v3874_v42  ;;  %v3486_v54 = vsel %vm1611_vm3, %v3422_v24, %v3228_v48  ;;  %v3226_v47 = vpop.permute.xlu0 %3225 }
 0x3d5   : > { %v4162_v25 = vadd.f32 %v8709_v44, %v4098_v43  ;;  %v3485_v37 = vsel %vm1611_vm3, %v3421_v52, %v3226_v47  ;;  %v5899_v43 = vld [vmem:[%s6497_s29 + $0x319] sm:$0xff] }
 0x3d6   : > { %v4161_v16 = vadd.f32 %v8709_v44, %v4097_v56  ;;  %5705 = vmatprep.mubr.msk.f32.mxu1 %vm1683_vm4, %v3485_v37 }
 0x3d7   : > { %v4226_v1 = vmax.f32 %v4162_v25, 0.0  ;;  %5706 = vmatmul.mubr.msk.f32.gmra.mrb[60].mxu1 %vm1683_vm4, %v3486_v54  ;;  %v2784_v57 = vpop.permute.xlu1 %2783 }
 0x3d8   : > { %v4225_v35 = vmax.f32 %v4161_v16, 0.0  ;;  %v2782_v46 = vpop.permute.xlu0 %2781  ;;  %v3360_v7 = vsel %vm212_vm0, %v5898_v59, %v2784_v57 }
 0x3d9   : > { %4379 = vrot.lane.b32.xlu1 %v4226_v1, %s5946_s20  ;;  %v3359_v42 = vsel %vm212_vm0, %v5899_v43, %v2782_v46  ;;  %v2268_v1 = vmul.f32 %v8228_v58, %v8701_v61  ;;  %v2267_v46 = vmul.f32 %v8701_v61, %v8234_v2 }
 0x3da   : > { %4377 = vrot.lane.b32.xlu0 %v4225_v35, %s5946_s20 }
 0x3db   : > { %v2976_v36 = vpop.permute.xlu1 %2975  ;;  %v2337_v58 = vadd.f32 %v8709_v44, %v2267_v46 }
 0x3dc   : > { %v2974_v30 = vpop.permute.xlu0 %2973  ;;  %v3424_v48 = vsel %vm1546_vm2, %v3360_v7, %v2976_v36  ;;  %v2338_v7 = vadd.f32 %v8709_v44, %v2268_v1 }
 0x3dd   : > { %v3423_v47 = vsel %vm1546_vm2, %v3359_v42, %v2974_v30  ;;  %v2401_v43 = vmax.f32 %v2337_v58, 0.0  ;;  %v2269_v42 = vmul.f32 %v8701_v61, %v8247_v27 }
 0x3de   : > { %v5656_v24 = vpop.f32.mrb[26].mxu1  ;;  %v2402_v2 = vmax.f32 %v2338_v7, 0.0  ;;  %v2271_v7 = vmul.f32 %v8701_v61, %v8262_v41 }
 0x3df   : > { %v4100_v52 = vmul.f32 %v5656_v24, %v8701_v61  ;;  %v3884_v56 = vpop.f32.mrb[27].mxu1  ;;  %v3232_v54 = vpop.permute.xlu1 %3231  ;;  %v2270_v24 = vmul.f32 %v8243_v0, %v8701_v61  ;;  %v2339_v1 = vadd.f32 %v8709_v44, %v2269_v42 }
 0x3e0   : > { %v4099_v25 = vmul.f32 %v8701_v61, %v3884_v56  ;;  %v3488_v37 = vsel %vm1611_vm3, %v3424_v48, %v3232_v54  ;;  %v3230_v16 = vpop.permute.xlu0 %3229 }
 0x3e1   : > { %v4164_v57 = vadd.f32 %v8709_v44, %v4100_v52  ;;  %v3487_v35 = vsel %vm1611_vm3, %v3423_v47, %v3230_v16  ;;  %v2340_v27 = vadd.f32 %v8709_v44, %v2270_v24 }
 0x3e2   : > { %v4163_v36 = vadd.f32 %v8709_v44, %v4099_v25  ;;  %5708 = vmatprep.mubr.msk.f32.mxu1 %vm1683_vm4, %v3487_v35 }
 0x3e3   : > { %v4228_v30 = vmax.f32 %v4164_v57, 0.0  ;;  %5709 = vmatmul.mubr.msk.f32.gmra.mrb[62].mxu1 %vm1683_vm4, %v3488_v37 }
 0x3e4   : > { %v4227_v59 = vmax.f32 %v4163_v36, 0.0  ;;  %v2404_v36 = vmax.f32 %v2340_v27, 0.0 }
 0x3e5   : > { %4383 = vrot.lane.b32.xlu1 %v4228_v30, %s5946_s20  ;;  %v2272_v30 = vmul.f32 %v8254_v40, %v8701_v61  ;;  %v2341_v40 = vadd.f32 %v8709_v44, %v2271_v7 }
 0x3e6   : > { %4381 = vrot.lane.b32.xlu0 %v4227_v59, %s5946_s20  ;;  %v2403_v59 = vmax.f32 %v2339_v1, 0.0 }
 0x3e7   : > { %v2342_v42 = vadd.f32 %v8709_v44, %v2272_v30 }
 0x3ea   : > { %v4332_v48 = vpop.permute.xlu1 %4331  ;;  %v5659_v52 = vpop.f32.mrb[28].mxu1 }
 0x3eb   : > { %v4523_v56 = vsel %vm4521_vm5, %v2402_v2, %v4332_v48  ;;  %v4102_v54 = vmul.f32 %v5659_v52, %v8701_v61  ;;  %v3894_v47 = vpop.f32.mrb[29].mxu1  ;;  %v4330_v25 = vpop.permute.xlu0 %4329 }
 0x3ec   : > { %4587 = vst.msk [vmem:[%s8905_s15 + $0x8] sm:$0xff] %vm212_vm0, %v4523_v56  ;;  %v4101_v0 = vmul.f32 %v8701_v61, %v3894_v47  ;;  %v4522_v37 = vsel %vm4521_vm5, %v2401_v43, %v4330_v25  ;;  %v2274_v47 = vmul.f32 %v8271_v20, %v8701_v61 }
 0x3ed   : > { %v4166_v16 = vadd.f32 %v8709_v44, %v4102_v54  ;;  %4586 = vst.msk [vmem:[%s8905_s15] sm:$0xff] %vm212_vm0, %v4522_v37  ;;  %v2406_v54 = vmax.f32 %v2342_v42, 0.0  ;;  %v2273_v37 = vmul.f32 %v8701_v61, %v8275_v51 }
 0x3ee   : > { %v4165_v57 = vadd.f32 %v8709_v44, %v4101_v0  ;;  %v2405_v0 = vmax.f32 %v2341_v40, 0.0  ;;  %v2344_v20 = vadd.f32 %v8709_v44, %v2274_v47 }
 0x3ef   : > { %v4230_v35 = vmax.f32 %v4166_v16, 0.0  ;;  %v2343_v51 = vadd.f32 %v8709_v44, %v2273_v37  ;;  %v2278_v37 = vmul.f32 %v8297_v5, %v8701_v61 }
 0x3f0   : > { %v4229_v46 = vmax.f32 %v4165_v57, 0.0  ;;  %v2408_v30 = vmax.f32 %v2344_v20, 0.0 }
 0x3f1   : > { %4387 = vrot.lane.b32.xlu1 %v4230_v35, %s5946_s20  ;;  %v2407_v7 = vmax.f32 %v2343_v51, 0.0 }
 0x3f2   : > { %v4336_v58 = vpop.permute.xlu1 %4335  ;;  %4385 = vrot.lane.b32.xlu0 %v4229_v46, %s5946_s20 }
 0x3f3   : > { %v4525_v2 = vsel %vm4521_vm5, %v2404_v36, %v4336_v58  ;;  %v4334_v24 = vpop.permute.xlu0 %4333  ;;  %v2275_v58 = vmul.f32 %v8701_v61, %v8286_v6 }
 0x3f4   : > { %4589 = vst.msk [vmem:[%s8905_s15 + $0x18] sm:$0xff] %vm212_vm0, %v4525_v2  ;;  %v4524_v43 = vsel %vm4521_vm5, %v2403_v59, %v4334_v24  ;;  %v2276_v59 = vmul.f32 %v8280_v13, %v8701_v61 }
 0x3f5   : > { %4588 = vst.msk [vmem:[%s8905_s15 + $0x10] sm:$0xff] %vm212_vm0, %v4524_v43  ;;  %v2345_v6 = vadd.f32 %v8709_v44, %v2275_v58 }
 0x3f6   : > { %v5662_v48 = vpop.f32.mrb[30].mxu1  ;;  %v2346_v13 = vadd.f32 %v8709_v44, %v2276_v59 }
 0x3f7   : > { %v4104_v41 = vmul.f32 %v5662_v48, %v8701_v61  ;;  %v3904_v52 = vpop.f32.mrb[31].mxu1 }
 0x3f8   : > { %v4103_v56 = vmul.f32 %v8701_v61, %v3904_v52 }
 0x3f9   : > { %v4168_v25 = vadd.f32 %v8709_v44, %v4104_v41 }
 0x3fa   : > { %v4167_v27 = vadd.f32 %v8709_v44, %v4103_v56  ;;  %v4340_v16 = vpop.permute.xlu1 %4339 }
 0x3fb   : > { %v4232_v1 = vmax.f32 %v4168_v25, 0.0  ;;  %v4527_v57 = vsel %vm4521_vm5, %v2406_v54, %v4340_v16  ;;  %v4338_v35 = vpop.permute.xlu0 %4337  ;;  %v2277_v16 = vmul.f32 %v8701_v61, %v8303_v9 }
 0x3fc   : > { %v4231_v46 = vmax.f32 %v4167_v27, 0.0  ;;  %4591 = vst.msk [vmem:[%s8905_s15 + $0x28] sm:$0xff] %vm212_vm0, %v4527_v57  ;;  %v4526_v36 = vsel %vm4521_vm5, %v2405_v0, %v4338_v35  ;;  %v2410_v0 = vmax.f32 %v2346_v13, 0.0  ;;  %v2409_v27 = vmax.f32 %v2345_v6, 0.0 }
 0x3fd   : > { %4590 = vst.msk [vmem:[%s8905_s15 + $0x20] sm:$0xff] %vm212_vm0, %v4526_v36  ;;  %4391 = vrot.lane.b32.xlu1 %v4232_v1, %s5946_s20  ;;  %v2348_v36 = vadd.f32 %v8709_v44, %v2278_v37  ;;  %v2347_v5 = vadd.f32 %v8709_v44, %v2277_v16  ;;  %v2282_v6 = vmul.f32 %v8323_v23, %v8701_v61 }
 0x3fe   : > { %4389 = vrot.lane.b32.xlu0 %v4231_v46, %s5946_s20 }
 0x3ff   : > { %v2412_v59 = vmax.f32 %v2348_v36, 0.0  ;;  %v2352_v23 = vadd.f32 %v8709_v44, %v2282_v6 }
 0x402   : > { %v4344_v2 = vpop.permute.xlu1 %4343  ;;  %v5665_v24 = vpop.f32.mrb[32].mxu1 }
 0x403   : > { %v4529_v43 = vsel %vm4521_vm5, %v2408_v30, %v4344_v2  ;;  %v4106_v42 = vmul.f32 %v5665_v24, %v8701_v61  ;;  %v3914_v40 = vpop.f32.mrb[33].mxu1  ;;  %v4342_v48 = vpop.permute.xlu0 %4341  ;;  %v2411_v2 = vmax.f32 %v2347_v5, 0.0  ;;  %v2279_v24 = vmul.f32 %v8701_v61, %v8314_v10 }
 0x404   : > { %4593 = vst.msk [vmem:[%s8905_s15 + $0x38] sm:$0xff] %vm212_vm0, %v4529_v43  ;;  %v4105_v41 = vmul.f32 %v8701_v61, %v3914_v40  ;;  %v4528_v52 = vsel %vm4521_vm5, %v2407_v7, %v4342_v48  ;;  %v2280_v7 = vmul.f32 %v8308_v53, %v8701_v61 }
 0x405   : > { %v4170_v56 = vadd.f32 %v8709_v44, %v4106_v42  ;;  %4592 = vst.msk [vmem:[%s8905_s15 + $0x30] sm:$0xff] %vm212_vm0, %v4528_v52  ;;  %v2349_v10 = vadd.f32 %v8709_v44, %v2279_v24 }
 0x406   : > { %v4169_v54 = vadd.f32 %v8709_v44, %v4105_v41  ;;  %v2350_v53 = vadd.f32 %v8709_v44, %v2280_v7 }
 0x407   : > { %v4234_v47 = vmax.f32 %v4170_v56, 0.0 }
 0x408   : > { %v4233_v25 = vmax.f32 %v4169_v54, 0.0  ;;  %v2414_v56 = vmax.f32 %v2350_v53, 0.0  ;;  %v2413_v54 = vmax.f32 %v2349_v10, 0.0  ;;  %v2285_v10 = vmul.f32 %v8701_v61, %v8355_v32 }
 0x409   : > { %4395 = vrot.lane.b32.xlu1 %v4234_v47, %s5946_s20  ;;  %v2281_v47 = vmul.f32 %v8701_v61, %v8327_v39 }
 0x40a   : > { %v4348_v1 = vpop.permute.xlu1 %4347  ;;  %4393 = vrot.lane.b32.xlu0 %v4233_v25, %s5946_s20  ;;  %v2355_v32 = vadd.f32 %v8709_v44, %v2285_v10 }
 0x40b   : > { %v4531_v57 = vsel %vm4521_vm5, %v2410_v0, %v4348_v1  ;;  %v4346_v35 = vpop.permute.xlu0 %4345  ;;  %v2351_v39 = vadd.f32 %v8709_v44, %v2281_v47 }
 0x40c   : > { %4595 = vst.msk [vmem:[%s8905_s15 + $0x48] sm:$0xff] %vm212_vm0, %v4531_v57  ;;  %v4530_v46 = vsel %vm4521_vm5, %v2409_v27, %v4346_v35 }
 0x40d   : > { %4594 = vst.msk [vmem:[%s8905_s15 + $0x40] sm:$0xff] %vm212_vm0, %v4530_v46 }
 0x40e   : > { %v5668_v20 = vpop.f32.mrb[34].mxu1 }
 0x40f   : > { %v4108_v9 = vmul.f32 %v5668_v20, %v8701_v61  ;;  %v3924_v51 = vpop.f32.mrb[35].mxu1 }
 0x410   : > { %v4107_v30 = vmul.f32 %v8701_v61, %v3924_v51  ;;  %v2284_v51 = vmul.f32 %v8334_v63, %v8701_v61 }
 0x411   : > { %v4172_v58 = vadd.f32 %v8709_v44, %v4108_v9  ;;  %v2416_v9 = vmax.f32 %v2352_v23, 0.0 }
 0x412   : > { %v4171_v43 = vadd.f32 %v8709_v44, %v4107_v30  ;;  %v4352_v42 = vpop.permute.xlu1 %4351  ;;  %v2415_v30 = vmax.f32 %v2351_v39, 0.0 }
 0x413   : > { %v4236_v40 = vmax.f32 %v4172_v58, 0.0  ;;  %v4533_v48 = vsel %vm4521_vm5, %v2412_v59, %v4352_v42  ;;  %v4350_v41 = vpop.permute.xlu0 %4349  ;;  %v2283_v59 = vmul.f32 %v8701_v61, %v8342_v4 }
 0x414   : > { %v4235_v52 = vmax.f32 %v4171_v43, 0.0  ;;  %4597 = vst.msk [vmem:[%s8905_s15 + $0x58] sm:$0xff] %vm212_vm0, %v4533_v48  ;;  %v4532_v13 = vsel %vm4521_vm5, %v2411_v2, %v4350_v41  ;;  %v2354_v43 = vadd.f32 %v8709_v44, %v2284_v51 }
 0x415   : > { %4596 = vst.msk [vmem:[%s8905_s15 + $0x50] sm:$0xff] %vm212_vm0, %v4532_v13  ;;  %4399 = vrot.lane.b32.xlu1 %v4236_v40, %s5946_s20  ;;  %v2353_v63 = vadd.f32 %v8709_v44, %v2283_v59 }
 0x416   : > { %4397 = vrot.lane.b32.xlu0 %v4235_v52, %s5946_s20  ;;  %v2418_v41 = vmax.f32 %v2354_v43, 0.0  ;;  %v2286_v52 = vmul.f32 %v8351_v62, %v8701_v61  ;;  %v2289_v43 = vmul.f32 %v8701_v61, %v8383_v31 }
 0x417   : > { %v2417_v53 = vmax.f32 %v2353_v63, 0.0 }
 0x418   : > { %v2356_v62 = vadd.f32 %v8709_v44, %v2286_v52 }
 0x41a   : > { %v4356_v25 = vpop.permute.xlu1 %4355  ;;  %v5671_v0 = vpop.f32.mrb[36].mxu1 }
 0x41b   : > { %v4535_v37 = vsel %vm4521_vm5, %v2414_v56, %v4356_v25  ;;  %v4110_v27 = vmul.f32 %v5671_v0, %v8701_v61  ;;  %v3934_v16 = vpop.f32.mrb[37].mxu1  ;;  %v4354_v1 = vpop.permute.xlu0 %4353 }
 0x41c   : > { %4599 = vst.msk [vmem:[%s8905_s15 + $0x68] sm:$0xff] %vm212_vm0, %v4535_v37  ;;  %v4109_v57 = vmul.f32 %v8701_v61, %v3934_v16  ;;  %v4534_v35 = vsel %vm4521_vm5, %v2413_v54, %v4354_v1  ;;  %v2288_v16 = vmul.f32 %v8360_v18, %v8701_v61  ;;  %v2419_v1 = vmax.f32 %v2355_v32, 0.0 }
 0x41d   : > { %v4174_v46 = vadd.f32 %v8709_v44, %v4110_v27  ;;  %4598 = vst.msk [vmem:[%s8905_s15 + $0x60] sm:$0xff] %vm212_vm0, %v4534_v35  ;;  %v2420_v27 = vmax.f32 %v2356_v62, 0.0 }
 0x41e   : > { %v4173_v36 = vadd.f32 %v8709_v44, %v4109_v57  ;;  %v2287_v57 = vmul.f32 %v8701_v61, %v8366_v33  ;;  %v2358_v18 = vadd.f32 %v8709_v44, %v2288_v16 }
 0x41f   : > { %v4238_v5 = vmax.f32 %v4174_v46, 0.0 }
 0x420   : > { %v4237_v20 = vmax.f32 %v4173_v36, 0.0  ;;  %v2357_v33 = vadd.f32 %v8709_v44, %v2287_v57  ;;  %v9096_v57 = vld [vmem:[%s9550_s2] ss:$0 sm:$0xff] }
 0x421   : > { %4403 = vrot.lane.b32.xlu1 %v4238_v5, %s5946_s20 }
 0x422   : > { %v4360_v7 = vpop.permute.xlu1 %4359  ;;  %4401 = vrot.lane.b32.xlu0 %v4237_v20, %s5946_s20 }
 0x423   : > { %v4537_v58 = vsel %vm4521_vm5, %v2416_v9, %v4360_v7  ;;  %v4358_v2 = vpop.permute.xlu0 %4357 }
 0x424   : > { %4601 = vst.msk [vmem:[%s8905_s15 + $0x78] sm:$0xff] %vm212_vm0, %v4537_v58  ;;  %v4536_v24 = vsel %vm4521_vm5, %v2415_v30, %v4358_v2  ;;  %v2422_v58 = vmax.f32 %v2358_v18, 0.0  ;;  %v2290_v2 = vmul.f32 %v8377_v14, %v8701_v61  ;;  %v2359_v14 = vadd.f32 %v8709_v44, %v2289_v43 }
 0x425   : > { %4600 = vst.msk [vmem:[%s8905_s15 + $0x70] sm:$0xff] %vm212_vm0, %v4536_v24  ;;  %v2421_v24 = vmax.f32 %v2357_v33, 0.0  ;;  %v2294_v18 = vmul.f32 %v9096_v57, %v8403_v17  ;;  %v2293_v33 = vmul.f32 %v9096_v57, %v8407_v21 }
 0x426   : > { %v5674_v42 = vpop.f32.mrb[38].mxu1 }
 0x427   : > { %v4112_v4 = vmul.f32 %v5674_v42, %v8701_v61  ;;  %v3944_v40 = vpop.f32.mrb[39].mxu1 }
 0x428   : > { %v4111_v48 = vmul.f32 %v8701_v61, %v3944_v40 }
 0x429   : > { %v4176_v13 = vadd.f32 %v8709_v44, %v4112_v4 }
 0x42a   : > { %v4175_v56 = vadd.f32 %v8709_v44, %v4111_v48  ;;  %v4364_v6 = vpop.permute.xlu1 %4363  ;;  %v2360_v48 = vadd.f32 %v8709_v44, %v2290_v2 }
 0x42b   : > { %v4240_v54 = vmax.f32 %v4176_v13, 0.0  ;;  %v4539_v47 = vsel %vm4521_vm5, %v2418_v41, %v4364_v6  ;;  %v4362_v25 = vpop.permute.xlu0 %4361  ;;  %v2292_v6 = vmul.f32 %v8388_v28, %v8701_v61 }
 0x42c   : > { %v4239_v0 = vmax.f32 %v4175_v56, 0.0  ;;  %4603 = vst.msk [vmem:[%s8905_s15 + $0x88] sm:$0xff] %vm212_vm0, %v4539_v47  ;;  %v4538_v37 = vsel %vm4521_vm5, %v2417_v53, %v4362_v25  ;;  %v2424_v53 = vmax.f32 %v2360_v48, 0.0  ;;  %v2423_v56 = vmax.f32 %v2359_v14, 0.0 }
 0x42d   : > { %4602 = vst.msk [vmem:[%s8905_s15 + $0x80] sm:$0xff] %vm212_vm0, %v4538_v37  ;;  %4407 = vrot.lane.b32.xlu1 %v4240_v54, %s5946_s20  ;;  %v2291_v25 = vmul.f32 %v8701_v61, %v8394_v11  ;;  %v2362_v28 = vadd.f32 %v8709_v44, %v2292_v6 }
 0x42e   : > { %4405 = vrot.lane.b32.xlu0 %v4239_v0, %s5946_s20 }
 0x42f   : > { %v2361_v11 = vadd.f32 %v8709_v44, %v2291_v25 }
 0x432   : > { %v4368_v35 = vpop.permute.xlu1 %4367  ;;  %v5677_v23 = vpop.f32.mrb[40].mxu1 }
 0x433   : > { %v4541_v46 = vsel %vm4521_vm5, %v2420_v27, %v4368_v35  ;;  %v4114_v39 = vmul.f32 %v5677_v23, %v8701_v61  ;;  %v3954_v36 = vpop.f32.mrb[41].mxu1  ;;  %v4366_v5 = vpop.permute.xlu0 %4365 }
 0x434   : > { %4605 = vst.msk [vmem:[%s8905_s15 + $0x98] sm:$0xff] %vm212_vm0, %v4541_v46  ;;  %v4113_v20 = vmul.f32 %v8701_v61, %v3954_v36  ;;  %v4540_v9 = vsel %vm4521_vm5, %v2419_v1, %v4366_v5  ;;  %v2425_v1 = vmax.f32 %v2361_v11, 0.0 }
 0x435   : > { %v4178_v51 = vadd.f32 %v8709_v44, %v4114_v39  ;;  %4604 = vst.msk [vmem:[%s8905_s15 + $0x90] sm:$0xff] %vm212_vm0, %v4540_v9 }
 0x436   : > { %v4177_v30 = vadd.f32 %v8709_v44, %v4113_v20 }
 0x437   : > { %v4242_v59 = vmax.f32 %v4178_v51, 0.0 }
 0x438   : > { %v4241_v7 = vmax.f32 %v4177_v30, 0.0 }
 0x439   : > { %4411 = vrot.lane.b32.xlu1 %v4242_v59, %s5946_s20 }
 0x43a   : > { %v4372_v63 = vpop.permute.xlu1 %4371  ;;  %4409 = vrot.lane.b32.xlu0 %v4241_v7, %s5946_s20 }
 0x43b   : > { %v4543_v42 = vsel %vm4521_vm5, %v2422_v58, %v4372_v63  ;;  %v4370_v4 = vpop.permute.xlu0 %4369 }
 0x43c   : > { %4607 = vst.msk [vmem:[%s8905_s15 + $0xa8] sm:$0xff] %vm212_vm0, %v4543_v42  ;;  %v4542_v40 = vsel %vm4521_vm5, %v2421_v24, %v4370_v4 }
 0x43d   : > { %4606 = vst.msk [vmem:[%s8905_s15 + $0xa0] sm:$0xff] %vm212_vm0, %v4542_v40 }
 0x43e   : > { %v5680_v41 = vpop.f32.mrb[42].mxu1 }
 0x43f   : > { %v4116_v31 = vmul.f32 %v5680_v41, %v8701_v61  ;;  %v3964_v52 = vpop.f32.mrb[43].mxu1  ;;  %v2296_v41 = vmul.f32 %v9096_v57, %v8414_v34 }
 0x440   : > { %v4115_v13 = vmul.f32 %v8701_v61, %v3964_v52  ;;  %v2426_v61 = vmax.f32 %v2362_v28, 0.0  ;;  %v2295_v52 = vmul.f32 %v9096_v57, %v8422_v26  ;;  %v2298_v28 = vmul.f32 %v9096_v57, %v8428_v12 }
 0x441   : > { %v4180_v10 = vadd.f32 %v8709_v44, %v4116_v31 }
 0x442   : > { %v4179_v54 = vadd.f32 %v8709_v44, %v4115_v13  ;;  %v4376_v47 = vpop.permute.xlu1 %4375  ;;  %v9104_v44 = vld [vmem:[%s9551_s3] ss:$0 sm:$0xff] }
 0x443   : > { %v4244_v0 = vmax.f32 %v4180_v10, 0.0  ;;  %v4545_v37 = vsel %vm4521_vm5, %v2424_v53, %v4376_v47  ;;  %v4374_v62 = vpop.permute.xlu0 %4373  ;;  %v2364_v7 = vadd.f32 %v9104_v44, %v2294_v18  ;;  %v2363_v58 = vadd.f32 %v9104_v44, %v2293_v33 }
 0x444   : > { %v4243_v32 = vmax.f32 %v4179_v54, 0.0  ;;  %4609 = vst.msk [vmem:[%s8905_s15 + $0xb8] sm:$0xff] %vm212_vm0, %v4545_v37  ;;  %v4544_v27 = vsel %vm4521_vm5, %v2423_v56, %v4374_v62  ;;  %v2366_v10 = vadd.f32 %v9104_v44, %v2296_v41  ;;  %v2365_v56 = vadd.f32 %v9104_v44, %v2295_v52 }
 0x445   : > { %4608 = vst.msk [vmem:[%s8905_s15 + $0xb0] sm:$0xff] %vm212_vm0, %v4544_v27  ;;  %4415 = vrot.lane.b32.xlu1 %v4244_v0, %s5946_s20  ;;  %v2428_v17 = vmax.f32 %v2364_v7, 0.0  ;;  %v2427_v24 = vmax.f32 %v2363_v58, 0.0  ;;  %v2299_v7 = vmul.f32 %v9096_v57, %v8443_v50 }
 0x446   : > { %4413 = vrot.lane.b32.xlu0 %v4243_v32, %s5946_s20  ;;  %v2430_v34 = vmax.f32 %v2366_v10, 0.0  ;;  %v2429_v54 = vmax.f32 %v2365_v56, 0.0 }
 0x44a   : > { %v5683_v16 = vpop.f32.mrb[44].mxu1 }
 0x44b   : > { %v4118_v35 = vmul.f32 %v9096_v57, %v5683_v16  ;;  %v4380_v23 = vpop.permute.xlu1 %4379  ;;  %v3974_v46 = vpop.f32.mrb[45].mxu1 }
 0x44c   : > { %v4547_v39 = vsel %vm4521_vm5, %v2426_v61, %v4380_v23  ;;  %v4117_v36 = vmul.f32 %v9096_v57, %v3974_v46  ;;  %v4378_v5 = vpop.permute.xlu0 %4377  ;;  %v2297_v61 = vmul.f32 %v9096_v57, %v8431_v55 }
 0x44d   : > { %v4182_v20 = vadd.f32 %v9104_v44, %v4118_v35  ;;  %4611 = vst.msk [vmem:[%s8905_s15 + $0xc8] sm:$0xff] %vm212_vm0, %v4547_v39  ;;  %v4546_v9 = vsel %vm4521_vm5, %v2425_v1, %v4378_v5  ;;  %v2368_v35 = vadd.f32 %v9104_v44, %v2298_v28 }
 0x44e   : > { %v4181_v51 = vadd.f32 %v9104_v44, %v4117_v36  ;;  %4610 = vst.msk [vmem:[%s8905_s15 + $0xc0] sm:$0xff] %vm212_vm0, %v4546_v9  ;;  %v2367_v23 = vadd.f32 %v9104_v44, %v2297_v61 }
 0x44f   : > { %v4246_v30 = vmax.f32 %v4182_v20, 0.0  ;;  %v2432_v12 = vmax.f32 %v2368_v35, 0.0 }
 0x450   : > { %v4245_v59 = vmax.f32 %v4181_v51, 0.0  ;;  %v2431_v39 = vmax.f32 %v2367_v23, 0.0 }
 0x451   : > { %4419 = vrot.lane.b32.xlu1 %v4246_v30, %s5946_s20  ;;  %v2300_v30 = vmul.f32 %v9096_v57, %v8437_v19 }
 0x452   : > { %4417 = vrot.lane.b32.xlu0 %v4245_v59, %s5946_s20 }
 0x456   : > { %v5686_v2 = vpop.f32.mrb[46].mxu1 }
 0x457   : > { %v4120_v43 = vmul.f32 %v9096_v57, %v5686_v2  ;;  %v4384_v63 = vpop.permute.xlu1 %4383  ;;  %v3984_v42 = vpop.f32.mrb[47].mxu1  ;;  %v2370_v2 = vadd.f32 %v9104_v44, %v2300_v30 }
 0x458   : > { %v4549_v21 = vsel %vm4521_vm5, %v2428_v17, %v4384_v63  ;;  %v4119_v4 = vmul.f32 %v9096_v57, %v3984_v42  ;;  %v4382_v40 = vpop.permute.xlu0 %4381 }
 0x459   : > { %v4184_v48 = vadd.f32 %v9104_v44, %v4120_v43  ;;  %4613 = vst.msk [vmem:[%s8905_s15 + $0xd8] sm:$0xff] %vm212_vm0, %v4549_v21  ;;  %v4548_v14 = vsel %vm4521_vm5, %v2427_v24, %v4382_v40  ;;  %v2369_v24 = vadd.f32 %v9104_v44, %v2299_v7  ;;  %v2434_v19 = vmax.f32 %v2370_v2, 0.0 }
 0x45a   : > { %v4183_v31 = vadd.f32 %v9104_v44, %v4119_v4  ;;  %4612 = vst.msk [vmem:[%s8905_s15 + $0xd0] sm:$0xff] %vm212_vm0, %v4548_v14 }
 0x45b   : > { %v4248_v13 = vmax.f32 %v4184_v48, 0.0  ;;  %v2433_v63 = vmax.f32 %v2369_v24, 0.0 }
 0x45c   : > { %v4247_v53 = vmax.f32 %v4183_v31, 0.0  ;;  %v2302_v31 = vmul.f32 %v9096_v57, %v8452_v8 }
 0x45d   : > { %4423 = vrot.lane.b32.xlu1 %v4248_v13, %s5946_s20  ;;  %v2301_v13 = vmul.f32 %v9096_v57, %v8457_v45 }
 0x45e   : > { %4421 = vrot.lane.b32.xlu0 %v4247_v53, %s5946_s20  ;;  %v2372_v56 = vadd.f32 %v9104_v44, %v2302_v31 }
 0x460   : > { %v2436_v8 = vmax.f32 %v2372_v56, 0.0 }
 0x462   : > { %v5689_v6 = vpop.f32.mrb[48].mxu1 }
 0x463   : > { %v4122_v47 = vmul.f32 %v9096_v57, %v5689_v6  ;;  %v4388_v25 = vpop.permute.xlu1 %4387  ;;  %v3994_v0 = vpop.f32.mrb[49].mxu1 }
 0x464   : > { %v4551_v26 = vsel %vm4521_vm5, %v2430_v34, %v4388_v25  ;;  %v4121_v37 = vmul.f32 %v9096_v57, %v3994_v0  ;;  %v4386_v62 = vpop.permute.xlu0 %4385  ;;  %v2371_v34 = vadd.f32 %v9104_v44, %v2301_v13 }
 0x465   : > { %v4186_v32 = vadd.f32 %v9104_v44, %v4122_v47  ;;  %4615 = vst.msk [vmem:[%s8905_s15 + $0xe8] sm:$0xff] %vm212_vm0, %v4551_v26  ;;  %v4550_v27 = vsel %vm4521_vm5, %v2429_v54, %v4386_v62 }
 0x466   : > { %v4185_v11 = vadd.f32 %v9104_v44, %v4121_v37  ;;  %4614 = vst.msk [vmem:[%s8905_s15 + $0xe0] sm:$0xff] %vm212_vm0, %v4550_v27  ;;  %v2435_v54 = vmax.f32 %v2371_v34, 0.0  ;;  %v2304_v27 = vmul.f32 %v9096_v57, %v8462_v22 }
 0x467   : > { %v4250_v16 = vmax.f32 %v4186_v32, 0.0 }
 0x468   : > { %v4249_v1 = vmax.f32 %v4185_v11, 0.0  ;;  %v2303_v11 = vmul.f32 %v9096_v57, %v8464_v15 }
 0x469   : > { %4427 = vrot.lane.b32.xlu1 %v4250_v16, %s5946_s20 }
 0x46a   : > { %4425 = vrot.lane.b32.xlu0 %v4249_v1, %s5946_s20  ;;  %v2374_v1 = vadd.f32 %v9104_v44, %v2304_v27  ;;  %v2373_v35 = vadd.f32 %v9104_v44, %v2303_v11 }
 0x46c   : > { %v2438_v22 = vmax.f32 %v2374_v1, 0.0 }
 0x46e   : > { %v5692_v46 = vpop.f32.mrb[50].mxu1 }
 0x46f   : > { %v4124_v36 = vmul.f32 %v9096_v57, %v5692_v46  ;;  %v4392_v5 = vpop.permute.xlu1 %4391  ;;  %v4004_v20 = vpop.f32.mrb[51].mxu1 }
 0x470   : > { %v4553_v55 = vsel %vm4521_vm5, %v2432_v12, %v4392_v5  ;;  %v4123_v9 = vmul.f32 %v9096_v57, %v4004_v20  ;;  %v4390_v18 = vpop.permute.xlu0 %4389  ;;  %v2437_v12 = vmax.f32 %v2373_v35, 0.0 }
 0x471   : > { %v4188_v51 = vadd.f32 %v9104_v44, %v4124_v36  ;;  %4617 = vst.msk [vmem:[%s8905_s15 + $0xf8] sm:$0xff] %vm212_vm0, %v4553_v55  ;;  %v4552_v33 = vsel %vm4521_vm5, %v2431_v39, %v4390_v18  ;;  %v2306_v18 = vmul.f32 %v9096_v57, %v8470_v3 }
 0x472   : > { %v4187_v59 = vadd.f32 %v9104_v44, %v4123_v9  ;;  %4616 = vst.msk [vmem:[%s8905_s15 + $0xf0] sm:$0xff] %vm212_vm0, %v4552_v33  ;;  %v2305_v33 = vmul.f32 %v9096_v57, %v8475_v60 }
 0x473   : > { %v4252_v58 = vmax.f32 %v4188_v51, 0.0  ;;  %v2376_v7 = vadd.f32 %v9104_v44, %v2306_v18 }
 0x474   : > { %v4251_v17 = vmax.f32 %v4187_v59, 0.0 }
 0x475   : > { %4431 = vrot.lane.b32.xlu1 %v4252_v58, %s5946_s20  ;;  %v2375_v58 = vadd.f32 %v9104_v44, %v2305_v33  ;;  %v2440_v3 = vmax.f32 %v2376_v7, 0.0 }
 0x476   : > { %4429 = vrot.lane.b32.xlu0 %v4251_v17, %s5946_s20 }
 0x477   : > { %v2439_v2 = vmax.f32 %v2375_v58, 0.0 }
 0x47a   : > { %v5695_v43 = vpop.f32.mrb[52].mxu1 }
 0x47b   : > { %v4126_v42 = vmul.f32 %v9096_v57, %v5695_v43  ;;  %v4396_v21 = vpop.permute.xlu1 %4395  ;;  %v4014_v4 = vpop.f32.mrb[53].mxu1 }
 0x47c   : > { %v4555_v50 = vsel %vm4521_vm5, %v2434_v19, %v4396_v21  ;;  %v4125_v40 = vmul.f32 %v9096_v57, %v4014_v4  ;;  %v4394_v48 = vpop.permute.xlu0 %4393 }
 0x47d   : > { %v4190_v14 = vadd.f32 %v9104_v44, %v4126_v42  ;;  %4619 = vst.msk [vmem:[%s8905_s15 + $0x108] sm:$0xff] %vm212_vm0, %v4555_v50  ;;  %v4554_v41 = vsel %vm4521_vm5, %v2433_v63, %v4394_v48  ;;  %v2308_v50 = vmul.f32 %v9096_v57, %v8484_v38  ;;  %v2307_v48 = vmul.f32 %v9096_v57, %v8489_v29 }
 0x47e   : > { %v4189_v52 = vadd.f32 %v9104_v44, %v4125_v40  ;;  %4618 = vst.msk [vmem:[%s8905_s15 + $0x100] sm:$0xff] %vm212_vm0, %v4554_v41 }
 0x47f   : > { %v4254_v53 = vmax.f32 %v4190_v14, 0.0  ;;  %v2378_v31 = vadd.f32 %v9104_v44, %v2308_v50 }
 0x480   : > { %v4253_v10 = vmax.f32 %v4189_v52, 0.0  ;;  %v2377_v52 = vadd.f32 %v9104_v44, %v2307_v48  ;;  %v9820_v48 = vld [vmem:[#allocation14_spill] sm:$0xff] }
 0x481   : > { %4435 = vrot.lane.b32.xlu1 %v4254_v53, %s5946_s20  ;;  %v2442_v38 = vmax.f32 %v2378_v31, 0.0 }
 0x482   : > { %4433 = vrot.lane.b32.xlu0 %v4253_v10, %s5946_s20  ;;  %v2441_v53 = vmax.f32 %v2377_v52, 0.0 }
 0x486   : > { %v5698_v6 = vpop.f32.mrb[54].mxu1 }
 0x487   : > { %v4128_v47 = vmul.f32 %v9096_v57, %v5698_v6  ;;  %v4400_v25 = vpop.permute.xlu1 %4399  ;;  %v4024_v0 = vpop.f32.mrb[55].mxu1 }
 0x488   : > { %v4557_v45 = vsel %vm4521_vm5, %v2436_v8, %v4400_v25  ;;  %v4127_v26 = vmul.f32 %v9096_v57, %v4024_v0  ;;  %v4398_v37 = vpop.permute.xlu0 %4397  ;;  %v2310_v25 = vmul.f32 %v9096_v57, %v8494_v49 }
 0x489   : > { %v4192_v62 = vadd.f32 %v9104_v44, %v4128_v47  ;;  %4621 = vst.msk [vmem:[%s8905_s15 + $0x118] sm:$0xff] %vm212_vm0, %v4557_v45  ;;  %v4556_v32 = vsel %vm4521_vm5, %v2435_v54, %v4398_v37  ;;  %v9815_v45 = vld [vmem:[#allocation4_spill] sm:$0xff] }
 0x48a   : > { %v4191_v28 = vadd.f32 %v9104_v44, %v4127_v26  ;;  %4620 = vst.msk [vmem:[%s8905_s15 + $0x110] sm:$0xff] %vm212_vm0, %v4556_v32  ;;  %v2309_v26 = vmul.f32 %v9096_v57, %v9815_v45  ;;  %v2380_v32 = vadd.f32 %v9104_v44, %v2310_v25 }
 0x48b   : > { %v4256_v61 = vmax.f32 %v4192_v62, 0.0 }
 0x48c   : > { %v4255_v16 = vmax.f32 %v4191_v28, 0.0  ;;  %v2379_v27 = vadd.f32 %v9104_v44, %v2309_v26  ;;  %v2444_v49 = vmax.f32 %v2380_v32, 0.0 }
 0x48d   : > { %4439 = vrot.lane.b32.xlu1 %v4256_v61, %s5946_s20 }
 0x48e   : > { %4437 = vrot.lane.b32.xlu0 %v4255_v16, %s5946_s20  ;;  %v2443_v11 = vmax.f32 %v2379_v27, 0.0 }
 0x492   : > { %v5701_v23 = vpop.f32.mrb[56].mxu1 }
 0x493   : > { %v4130_v46 = vmul.f32 %v9096_v57, %v5701_v23  ;;  %v4404_v39 = vpop.permute.xlu1 %4403  ;;  %v4034_v36 = vpop.f32.mrb[57].mxu1 }
 0x494   : > { %v4559_v15 = vsel %vm4521_vm5, %v2438_v22, %v4404_v39  ;;  %v4129_v5 = vmul.f32 %v9096_v57, %v4034_v36  ;;  %v4402_v20 = vpop.permute.xlu0 %4401  ;;  %v9816_v39 = vld [vmem:[#allocation10_spill] sm:$0xff] }
 0x495   : > { %v4194_v55 = vadd.f32 %v9104_v44, %v4130_v46  ;;  %4623 = vst.msk [vmem:[%s8905_s15 + $0x128] sm:$0xff] %vm212_vm0, %v4559_v15  ;;  %v4558_v9 = vsel %vm4521_vm5, %v2437_v12, %v4402_v20  ;;  %v2312_v36 = vmul.f32 %v9096_v57, %v9816_v39 }
 0x496   : > { %v4193_v51 = vadd.f32 %v9104_v44, %v4129_v5  ;;  %4622 = vst.msk [vmem:[%s8905_s15 + $0x120] sm:$0xff] %vm212_vm0, %v4558_v9  ;;  %v9817_v5 = vld [vmem:[#allocation5_spill] sm:$0xff] }
 0x497   : > { %v4258_v30 = vmax.f32 %v4194_v55, 0.0  ;;  %v2311_v20 = vmul.f32 %v9096_v57, %v9817_v5  ;;  %v2382_v18 = vadd.f32 %v9104_v44, %v2312_v36  ;;  %v9826_v36 = vld [vmem:[#allocation19_spill] sm:$0xff]  ;;  %v9827_v5 = vld [vmem:[#allocation12_spill] sm:$0xff] }
 0x498   : > { %v4257_v59 = vmax.f32 %v4193_v51, 0.0 }
 0x499   : > { %4443 = vrot.lane.b32.xlu1 %v4258_v30, %s5946_s20  ;;  %v2381_v51 = vadd.f32 %v9104_v44, %v2311_v20  ;;  %v2446_v33 = vmax.f32 %v2382_v18, 0.0  ;;  %v2321_v20 = vmul.f32 %v9096_v57, %v9827_v5  ;;  %v4828_v5 = vld [vmem:[%s8905_s15 + $0x30] sm:$0xff] (%p6004_p3) }
 0x49a   : > { %4441 = vrot.lane.b32.xlu0 %v4257_v59, %s5946_s20  ;;  %4829 = vst [vmem:[%s9406_s7 + $0x60] sm:$0xff] (%p6004_p3), %v4828_v5 }
 0x49b   : > { %v2445_v30 = vmax.f32 %v2381_v51, 0.0 }
 0x49e   : > { %v5704_v17 = vpop.f32.mrb[58].mxu1 }
 0x49f   : > { %v4132_v24 = vmul.f32 %v9096_v57, %v5704_v17  ;;  %v4408_v19 = vpop.permute.xlu1 %4407  ;;  %v4044_v43 = vpop.f32.mrb[59].mxu1  ;;  %v9818_v17 = vld [vmem:[#allocation11_spill] sm:$0xff] }
 0x4a0   : > { %v4561_v60 = vsel %vm4521_vm5, %v2440_v3, %v4408_v19  ;;  %v4131_v63 = vmul.f32 %v9096_v57, %v4044_v43  ;;  %v4406_v42 = vpop.permute.xlu0 %4405 }
 0x4a1   : > { %v4196_v21 = vadd.f32 %v9104_v44, %v4132_v24  ;;  %4625 = vst.msk [vmem:[%s8905_s15 + $0x138] sm:$0xff] %vm212_vm0, %v4561_v60  ;;  %v4560_v4 = vsel %vm4521_vm5, %v2439_v2, %v4406_v42  ;;  %v2314_v2 = vmul.f32 %v9096_v57, %v9818_v17  ;;  %v9819_v24 = vld [vmem:[#allocation6_spill] sm:$0xff]  ;;  %v9829_v17 = vld [vmem:[#allocation13_spill] sm:$0xff] }
 0x4a2   : > { %v4195_v40 = vadd.f32 %v9104_v44, %v4131_v63  ;;  %4624 = vst.msk [vmem:[%s8905_s15 + $0x130] sm:$0xff] %vm212_vm0, %v4560_v4  ;;  %v2313_v19 = vmul.f32 %v9096_v57, %v9819_v24 }
 0x4a3   : > { %v4260_v14 = vmax.f32 %v4196_v21, 0.0  ;;  %v2384_v43 = vadd.f32 %v9104_v44, %v2314_v2  ;;  %v2323_v2 = vmul.f32 %v9096_v57, %v9829_v17  ;;  %v4852_v17 = vld [vmem:[%s8905_s15 + $0x90] sm:$0xff] (%p6004_p3) }
 0x4a4   : > { %v4259_v41 = vmax.f32 %v4195_v40, 0.0  ;;  %v2383_v60 = vadd.f32 %v9104_v44, %v2313_v19  ;;  %4853 = vst [vmem:[%s9406_s7 + $0x120] sm:$0xff] (%p6004_p3), %v4852_v17 }
 0x4a5   : > { %4447 = vrot.lane.b32.xlu1 %v4260_v14, %s5946_s20  ;;  %v2448_v63 = vmax.f32 %v2384_v43, 0.0  ;;  %v2316_v14 = vmul.f32 %v9096_v57, %v9820_v48  ;;  %v2393_v19 = vadd.f32 %v9104_v44, %v2323_v2  ;;  %v9831_v48 = vld [vmem:[#allocation16_spill] sm:$0xff]  ;;  %v4854_v2 = vld [vmem:[%s8905_s15 + $0x98] sm:$0xff] (%p6004_p3) }
 0x4a6   : > { %4445 = vrot.lane.b32.xlu0 %v4259_v41, %s5946_s20  ;;  %v2447_v42 = vmax.f32 %v2383_v60, 0.0  ;;  %v9821_v41 = vld [vmem:[#allocation7_spill] sm:$0xff]  ;;  %4855 = vst [vmem:[%s9406_s7 + $0x128] sm:$0xff] (%p6004_p3), %v4854_v2 }
 0x4a7   : > { %v2315_v31 = vmul.f32 %v9096_v57, %v9821_v41  ;;  %v2386_v52 = vadd.f32 %v9104_v44, %v2316_v14  ;;  %v2457_v60 = vmax.f32 %v2393_v19, 0.0  ;;  %v2325_v14 = vmul.f32 %v9096_v57, %v9831_v48  ;;  %v4858_v19 = vld [vmem:[%s8905_s15 + $0xa8] sm:$0xff] (%p6004_p3)  ;;  %v4876_v48 = vld [vmem:[%s8905_s15 + $0xf0] sm:$0xff] (%p6004_p3) }
 0x4a8   : > { %4859 = vst [vmem:[%s9406_s7 + $0x148] sm:$0xff] (%p6004_p3), %v4858_v19  ;;  %4877 = vst [vmem:[%s9406_s7 + $0x1e0] sm:$0xff] (%p6004_p3), %v4876_v48 }
 0x4aa   : > { %v5707_v13 = vpop.f32.mrb[60].mxu1 }
 0x4ab   : > { %v4134_v10 = vmul.f32 %v9096_v57, %v5707_v13  ;;  %v4412_v56 = vpop.permute.xlu1 %4411  ;;  %v4054_v34 = vpop.f32.mrb[61].mxu1  ;;  %v2450_v13 = vmax.f32 %v2386_v52, 0.0 }
 0x4ac   : > { %v4563_v29 = vsel %vm4521_vm5, %v2442_v38, %v4412_v56  ;;  %v4133_v8 = vmul.f32 %v9096_v57, %v4054_v34  ;;  %v4410_v6 = vpop.permute.xlu0 %4409  ;;  %v2385_v38 = vadd.f32 %v9104_v44, %v2315_v31  ;;  %v2395_v31 = vadd.f32 %v9104_v44, %v2325_v14  ;;  %v4878_v14 = vld [vmem:[%s8905_s15 + $0xf8] sm:$0xff] (%p6004_p3) }
 0x4ad   : > { %v4198_v54 = vadd.f32 %v9104_v44, %v4134_v10  ;;  %4627 = vst.msk [vmem:[%s8905_s15 + $0x148] sm:$0xff] %vm212_vm0, %v4563_v29  ;;  %v4562_v47 = vsel %vm4521_vm5, %v2441_v53, %v4410_v6  ;;  %4879 = vst [vmem:[%s9406_s7 + $0x1e8] sm:$0xff] (%p6004_p3), %v4878_v14 }
 0x4ae   : > { %v4197_v0 = vadd.f32 %v9104_v44, %v4133_v8  ;;  %4626 = vst.msk [vmem:[%s8905_s15 + $0x140] sm:$0xff] %vm212_vm0, %v4562_v47  ;;  %v2449_v53 = vmax.f32 %v2385_v38, 0.0  ;;  %v9822_v8 = vld [vmem:[#allocation15_spill] sm:$0xff]  ;;  %v2459_v38 = vmax.f32 %v2395_v31, 0.0  ;;  %v4882_v31 = vld [vmem:[%s8905_s15 + $0x108] sm:$0xff] (%p6004_p3) }
 0x4af   : > { %v4262_v37 = vmax.f32 %v4198_v54, 0.0  ;;  %v2318_v6 = vmul.f32 %v9096_v57, %v9822_v8  ;;  %v9823_v54 = vld [vmem:[#allocation8_spill] sm:$0xff]  ;;  %v9833_v8 = vld [vmem:[#allocation17_spill] sm:$0xff]  ;;  %4883 = vst [vmem:[%s9406_s7 + $0x208] sm:$0xff] (%p6004_p3), %v4882_v31 }
 0x4b0   : > { %v4261_v62 = vmax.f32 %v4197_v0, 0.0  ;;  %v2317_v47 = vmul.f32 %v9096_v57, %v9823_v54 }
 0x4b1   : > { %4451 = vrot.lane.b32.xlu1 %v4262_v37, %s5946_s20  ;;  %v2388_v25 = vadd.f32 %v9104_v44, %v2318_v6  ;;  %v2327_v6 = vmul.f32 %v9096_v57, %v9833_v8 }
 0x4b2   : > { %4449 = vrot.lane.b32.xlu0 %v4261_v62, %s5946_s20  ;;  %v2387_v0 = vadd.f32 %v9104_v44, %v2317_v47 }
 0x4b3   : > { %v2452_v45 = vmax.f32 %v2388_v25, 0.0  ;;  %v2397_v47 = vadd.f32 %v9104_v44, %v2327_v6 }
 0x4b4   : > { %v2451_v26 = vmax.f32 %v2387_v0, 0.0 }
 0x4b5   : > { %v2461_v0 = vmax.f32 %v2397_v47, 0.0 }
 0x4b6   : > { %v5710_v28 = vpop.f32.mrb[62].mxu1 }
 0x4b7   : > { %v4136_v61 = vmul.f32 %v9096_v57, %v5710_v28  ;;  %v4416_v16 = vpop.permute.xlu1 %4415  ;;  %v4064_v1 = vpop.f32.mrb[63].mxu1 }
 0x4b8   : > { %v4565_v35 = vsel %vm4521_vm5, %v2444_v49, %v4416_v16  ;;  %v4135_v22 = vmul.f32 %v9096_v57, %v4064_v1  ;;  %v4414_v23 = vpop.permute.xlu0 %4413  ;;  %v9824_v49 = vld [vmem:[#allocation18_spill] sm:$0xff] }
 0x4b9   : > { %v4200_v12 = vadd.f32 %v9104_v44, %v4136_v61  ;;  %4629 = vst.msk [vmem:[%s8905_s15 + $0x158] sm:$0xff] %vm212_vm0, %v4565_v35  ;;  %v4564_v46 = vsel %vm4521_vm5, %v2443_v11, %v4414_v23  ;;  %v2320_v28 = vmul.f32 %v9096_v57, %v9824_v49  ;;  %v9825_v11 = vld [vmem:[#allocation9_spill] sm:$0xff]  ;;  %v9835_v49 = vld [vmem:[#allocation20_spill] sm:$0xff] }
 0x4ba   : > { %v4199_v15 = vadd.f32 %v9104_v44, %v4135_v22  ;;  %4628 = vst.msk [vmem:[%s8905_s15 + $0x150] sm:$0xff] %vm212_vm0, %v4564_v46  ;;  %v2319_v61 = vmul.f32 %v9096_v57, %v9825_v11 }
 0x4bb   : > { %v4264_v55 = vmax.f32 %v4200_v12, 0.0  ;;  %v2390_v16 = vadd.f32 %v9104_v44, %v2320_v28  ;;  %v2329_v28 = vmul.f32 %v9096_v57, %v9835_v49 }
 0x4bc   : > { %v4263_v9 = vmax.f32 %v4199_v15, 0.0  ;;  %v2389_v1 = vadd.f32 %v9104_v44, %v2319_v61  ;;  %v2322_v15 = vmul.f32 %v9096_v57, %v9826_v36  ;;  %v4824_v36 = vld [vmem:[%s8905_s15 + $0x20] sm:$0xff] (%p6004_p3) }
 0x4bd   : > { %4455 = vrot.lane.b32.xlu1 %v4264_v55, %s5946_s20  ;;  %v2454_v35 = vmax.f32 %v2390_v16, 0.0  ;;  %v2399_v61 = vadd.f32 %v9104_v44, %v2329_v28  ;;  %4825 = vst [vmem:[%s9406_s7 + $0x40] sm:$0xff] (%p6004_p3), %v4824_v36 }
 0x4be   : > { %4453 = vrot.lane.b32.xlu0 %v4263_v9, %s5946_s20  ;;  %v2453_v22 = vmax.f32 %v2389_v1, 0.0  ;;  %v2392_v55 = vadd.f32 %v9104_v44, %v2322_v15  ;;  %v2391_v9 = vadd.f32 %v9104_v44, %v2321_v20  ;;  %v4826_v15 = vld [vmem:[%s8905_s15 + $0x28] sm:$0xff] (%p6004_p3)  ;;  %v4830_v20 = vld [vmem:[%s8905_s15 + $0x38] sm:$0xff] (%p6004_p3) }
 0x4bf   : > { %v2463_v1 = vmax.f32 %v2399_v61, 0.0  ;;  %4827 = vst [vmem:[%s9406_s7 + $0x48] sm:$0xff] (%p6004_p3), %v4826_v15  ;;  %4831 = vst [vmem:[%s9406_s7 + $0x68] sm:$0xff] (%p6004_p3), %v4830_v20 }
 0x4c0   : > { %v2456_v18 = vmax.f32 %v2392_v55, 0.0  ;;  %v2455_v51 = vmax.f32 %v2391_v9, 0.0  ;;  %v4832_v55 = vld [vmem:[%s8905_s15 + $0x40] sm:$0xff] (%p6004_p3)  ;;  %v4834_v9 = vld [vmem:[%s8905_s15 + $0x48] sm:$0xff] (%p6004_p3)  ;;  %v4902_v6 = vld [vmem:[%s8905_s15 + $0x158] sm:$0xff] (%p6004_p3) }
 0x4c1   : > { %4833 = vst [vmem:[%s9406_s7 + $0x80] sm:$0xff] (%p6004_p3), %v4832_v55  ;;  %4835 = vst [vmem:[%s9406_s7 + $0x88] sm:$0xff] (%p6004_p3), %v4834_v9  ;;  %v4900_v8 = vld [vmem:[%s8905_s15 + $0x150] sm:$0xff] (%p6004_p3) }
 0x4c2   : > { %4901 = vst [vmem:[%s9406_s7 + $0x2a0] sm:$0xff] (%p6004_p3), %v4900_v8  ;;  %4903 = vst [vmem:[%s9406_s7 + $0x2a8] sm:$0xff] (%p6004_p3), %v4902_v6 }
 0x4c3   : > { %v4420_v59 = vpop.permute.xlu1 %4419 }
 0x4c4   : > { %v4567_v7 = vsel %vm4521_vm5, %v2446_v33, %v4420_v59  ;;  %v4418_v58 = vpop.permute.xlu0 %4417 }
 0x4c5   : > { %4631 = vst.msk [vmem:[%s8905_s15 + $0x168] sm:$0xff] %vm212_vm0, %v4567_v7  ;;  %v4566_v3 = vsel %vm4521_vm5, %v2445_v30, %v4418_v58  ;;  %v9828_v58 = vld [vmem:[#allocation22_spill] sm:$0xff] }
 0x4c6   : > { %4630 = vst.msk [vmem:[%s8905_s15 + $0x160] sm:$0xff] %vm212_vm0, %v4566_v3  ;;  %v2324_v3 = vmul.f32 %v9096_v57, %v9828_v58  ;;  %v4848_v58 = vld [vmem:[%s8905_s15 + $0x80] sm:$0xff] (%p6004_p3) }
 0x4c7   : > { %4849 = vst [vmem:[%s9406_s7 + $0x100] sm:$0xff] (%p6004_p3), %v4848_v58 }
 0x4c8   : > { %v2394_v24 = vadd.f32 %v9104_v44, %v2324_v3  ;;  %v4850_v3 = vld [vmem:[%s8905_s15 + $0x88] sm:$0xff] (%p6004_p3) }
 0x4c9   : > { %4851 = vst [vmem:[%s9406_s7 + $0x108] sm:$0xff] (%p6004_p3), %v4850_v3 }
 0x4ca   : > { %v2458_v43 = vmax.f32 %v2394_v24, 0.0  ;;  %v4856_v24 = vld [vmem:[%s8905_s15 + $0xa0] sm:$0xff] (%p6004_p3) }
 0x4cb   : > { %4857 = vst [vmem:[%s9406_s7 + $0x140] sm:$0xff] (%p6004_p3), %v4856_v24 }
 0x4cc   : > { %v4906_v47 = vld [vmem:[%s8905_s15 + $0x168] sm:$0xff] (%p6004_p3) }
 0x4cd   : > { %4907 = vst [vmem:[%s9406_s7 + $0x2c8] sm:$0xff] (%p6004_p3), %v4906_v47 }
 0x4cf   : > { %v4424_v21 = vpop.permute.xlu1 %4423 }
 0x4d0   : > { %v4569_v4 = vsel %vm4521_vm5, %v2448_v63, %v4424_v21  ;;  %v4422_v50 = vpop.permute.xlu0 %4421 }
 0x4d1   : > { %4633 = vst.msk [vmem:[%s8905_s15 + $0x178] sm:$0xff] %vm212_vm0, %v4569_v4  ;;  %v4568_v40 = vsel %vm4521_vm5, %v2447_v42, %v4422_v50  ;;  %v9830_v50 = vld [vmem:[#allocation23_spill] sm:$0xff] }
 0x4d2   : > { %4632 = vst.msk [vmem:[%s8905_s15 + $0x170] sm:$0xff] %vm212_vm0, %v4568_v40  ;;  %v2326_v40 = vmul.f32 %v9096_v57, %v9830_v50  ;;  %v4872_v50 = vld [vmem:[%s8905_s15 + $0xe0] sm:$0xff] (%p6004_p3) }
 0x4d3   : > { %4873 = vst [vmem:[%s9406_s7 + $0x1c0] sm:$0xff] (%p6004_p3), %v4872_v50 }
 0x4d4   : > { %v2396_v41 = vadd.f32 %v9104_v44, %v2326_v40  ;;  %v4874_v40 = vld [vmem:[%s8905_s15 + $0xe8] sm:$0xff] (%p6004_p3) }
 0x4d5   : > { %4875 = vst [vmem:[%s9406_s7 + $0x1c8] sm:$0xff] (%p6004_p3), %v4874_v40 }
 0x4d6   : > { %v2460_v52 = vmax.f32 %v2396_v41, 0.0  ;;  %v4880_v41 = vld [vmem:[%s8905_s15 + $0x100] sm:$0xff] (%p6004_p3) }
 0x4d7   : > { %4881 = vst [vmem:[%s9406_s7 + $0x200] sm:$0xff] (%p6004_p3), %v4880_v41 }
 0x4db   : > { %v4428_v10 = vpop.permute.xlu1 %4427 }
 0x4dc   : > { %v4571_v56 = vsel %vm4521_vm5, %v2450_v13, %v4428_v10  ;;  %v4426_v34 = vpop.permute.xlu0 %4425 }
 0x4dd   : > { %4635 = vst.msk [vmem:[%s8905_s15 + $0x188] sm:$0xff] %vm212_vm0, %v4571_v56  ;;  %v4570_v29 = vsel %vm4521_vm5, %v2449_v53, %v4426_v34  ;;  %v9832_v34 = vld [vmem:[#allocation26_spill] sm:$0xff] }
 0x4de   : > { %4634 = vst.msk [vmem:[%s8905_s15 + $0x180] sm:$0xff] %vm212_vm0, %v4570_v29  ;;  %v2328_v29 = vmul.f32 %v9096_v57, %v9832_v34  ;;  %v4896_v34 = vld [vmem:[%s8905_s15 + $0x140] sm:$0xff] (%p6004_p3) }
 0x4df   : > { %4897 = vst [vmem:[%s9406_s7 + $0x280] sm:$0xff] (%p6004_p3), %v4896_v34 }
 0x4e0   : > { %v2398_v54 = vadd.f32 %v9104_v44, %v2328_v29  ;;  %v4898_v29 = vld [vmem:[%s8905_s15 + $0x148] sm:$0xff] (%p6004_p3) }
 0x4e1   : > { %4899 = vst [vmem:[%s9406_s7 + $0x288] sm:$0xff] (%p6004_p3), %v4898_v29 }
 0x4e2   : > { %v2462_v25 = vmax.f32 %v2398_v54, 0.0  ;;  %v4904_v54 = vld [vmem:[%s8905_s15 + $0x160] sm:$0xff] (%p6004_p3) }
 0x4e3   : > { %4905 = vst [vmem:[%s9406_s7 + $0x2c0] sm:$0xff] (%p6004_p3), %v4904_v54 }
 0x4e7   : > { %v4432_v37 = vpop.permute.xlu1 %4431 }
 0x4e8   : > { %v4573_v62 = vsel %vm4521_vm5, %v2452_v45, %v4432_v37  ;;  %v4430_v32 = vpop.permute.xlu0 %4429 }
 0x4e9   : > { %4637 = vst.msk [vmem:[%s8905_s15 + $0x198] sm:$0xff] %vm212_vm0, %v4573_v62  ;;  %v4572_v27 = vsel %vm4521_vm5, %v2451_v26, %v4430_v32  ;;  %v9834_v32 = vld [vmem:[#allocation27_spill] sm:$0xff] }
 0x4ea   : > { %4636 = vst.msk [vmem:[%s8905_s15 + $0x190] sm:$0xff] %vm212_vm0, %v4572_v27  ;;  %v2330_v27 = vmul.f32 %v9096_v57, %v9834_v32  ;;  %v4816_v57 = vld [vmem:[%s8905_s15] sm:$0xff] (%p6004_p3) }
 0x4eb   : > { %4817 = vst [vmem:[%s9406_s7] sm:$0xff] (%p6004_p3), %v4816_v57 }
 0x4ec   : > { %v2400_v11 = vadd.f32 %v9104_v44, %v2330_v27  ;;  %v4818_v44 = vld [vmem:[%s8905_s15 + $0x8] sm:$0xff] (%p6004_p3) }
 0x4ed   : > { %4819 = vst [vmem:[%s9406_s7 + $0x8] sm:$0xff] (%p6004_p3), %v4818_v44 }
 0x4ee   : > { %v2464_v16 = vmax.f32 %v2400_v11, 0.0 }
 0x4f3   : > { %v4436_v23 = vpop.permute.xlu1 %4435 }
 0x4f4   : > { %v4575_v12 = vsel %vm4521_vm5, %v2454_v35, %v4436_v23  ;;  %v4434_v46 = vpop.permute.xlu0 %4433 }
 0x4f5   : > { %4639 = vst.msk [vmem:[%s8905_s15 + $0x1a8] sm:$0xff] %vm212_vm0, %v4575_v12  ;;  %v4574_v39 = vsel %vm4521_vm5, %v2453_v22, %v4434_v46  ;;  %v4820_v46 = vld [vmem:[%s8905_s15 + $0x10] sm:$0xff] (%p6004_p3) }
 0x4f6   : > { %4638 = vst.msk [vmem:[%s8905_s15 + $0x1a0] sm:$0xff] %vm212_vm0, %v4574_v39  ;;  %v4822_v39 = vld [vmem:[%s8905_s15 + $0x18] sm:$0xff] (%p6004_p3)  ;;  %4821 = vst [vmem:[%s9406_s7 + $0x20] sm:$0xff] (%p6004_p3), %v4820_v46 }
 0x4f7   : > { %4823 = vst [vmem:[%s9406_s7 + $0x28] sm:$0xff] (%p6004_p3), %v4822_v39 }
 0x4fc   : > { %v4922_v27 = vld [vmem:[%s8905_s15 + $0x1a8] sm:$0xff] (%p6004_p3) }
 0x4fd   : > { %v4920_v32 = vld [vmem:[%s8905_s15 + $0x1a0] sm:$0xff] (%p6004_p3)  ;;  %4923 = vst [vmem:[%s9406_s7 + $0x348] sm:$0xff] (%p6004_p3), %v4922_v27 }
 0x4fe   : > { %4921 = vst [vmem:[%s9406_s7 + $0x340] sm:$0xff] (%p6004_p3), %v4920_v32 }
 0x4ff   : > { %v4440_v33 = vpop.permute.xlu1 %4439 }
 0x500   : > { %v4577_v30 = vsel %vm4521_vm5, %v2456_v18, %v4440_v33  ;;  %v4438_v59 = vpop.permute.xlu0 %4437  ;;  %v4836_v18 = vld [vmem:[%s8905_s15 + $0x50] sm:$0xff] (%p6004_p3)  ;;  %v4840_v33 = vld [vmem:[%s8905_s15 + $0x60] sm:$0xff] (%p6004_p3) }
 0x501   : > { %4641 = vst.msk [vmem:[%s8905_s15 + $0x1b8] sm:$0xff] %vm212_vm0, %v4577_v30  ;;  %v4576_v7 = vsel %vm4521_vm5, %v2455_v51, %v4438_v59  ;;  %v4838_v51 = vld [vmem:[%s8905_s15 + $0x58] sm:$0xff] (%p6004_p3)  ;;  %4837 = vst [vmem:[%s9406_s7 + $0xa0] sm:$0xff] (%p6004_p3), %v4836_v18  ;;  %v4842_v30 = vld [vmem:[%s8905_s15 + $0x68] sm:$0xff] (%p6004_p3) }
 0x502   : > { %4640 = vst.msk [vmem:[%s8905_s15 + $0x1b0] sm:$0xff] %vm212_vm0, %v4576_v7  ;;  %4839 = vst [vmem:[%s9406_s7 + $0xa8] sm:$0xff] (%p6004_p3), %v4838_v51  ;;  %v4844_v59 = vld [vmem:[%s8905_s15 + $0x70] sm:$0xff] (%p6004_p3)  ;;  %v4846_v7 = vld [vmem:[%s8905_s15 + $0x78] sm:$0xff] (%p6004_p3) }
 0x503   : > { %4841 = vst [vmem:[%s9406_s7 + $0xc0] sm:$0xff] (%p6004_p3), %v4840_v33  ;;  %4843 = vst [vmem:[%s9406_s7 + $0xc8] sm:$0xff] (%p6004_p3), %v4842_v30 }
 0x504   : > { %4845 = vst [vmem:[%s9406_s7 + $0xe0] sm:$0xff] (%p6004_p3), %v4844_v59  ;;  %4847 = vst [vmem:[%s9406_s7 + $0xe8] sm:$0xff] (%p6004_p3), %v4846_v7 }
 0x508   : > { %v4926_v28 = vld [vmem:[%s8905_s15 + $0x1b8] sm:$0xff] (%p6004_p3) }
 0x509   : > { %v4924_v49 = vld [vmem:[%s8905_s15 + $0x1b0] sm:$0xff] (%p6004_p3)  ;;  %4927 = vst [vmem:[%s9406_s7 + $0x368] sm:$0xff] (%p6004_p3), %v4926_v28 }
 0x50a   : > { %4925 = vst [vmem:[%s9406_s7 + $0x360] sm:$0xff] (%p6004_p3), %v4924_v49 }
 0x50b   : > { %v4444_v63 = vpop.permute.xlu1 %4443 }
 0x50c   : > { %v4579_v42 = vsel %vm4521_vm5, %v2458_v43, %v4444_v63  ;;  %v4442_v21 = vpop.permute.xlu0 %4441  ;;  %v4860_v43 = vld [vmem:[%s8905_s15 + $0xb0] sm:$0xff] (%p6004_p3)  ;;  %v4864_v63 = vld [vmem:[%s8905_s15 + $0xc0] sm:$0xff] (%p6004_p3) }
 0x50d   : > { %4643 = vst.msk [vmem:[%s8905_s15 + $0x1c8] sm:$0xff] %vm212_vm0, %v4579_v42  ;;  %v4578_v4 = vsel %vm4521_vm5, %v2457_v60, %v4442_v21  ;;  %v4862_v60 = vld [vmem:[%s8905_s15 + $0xb8] sm:$0xff] (%p6004_p3)  ;;  %4861 = vst [vmem:[%s9406_s7 + $0x160] sm:$0xff] (%p6004_p3), %v4860_v43  ;;  %v4866_v42 = vld [vmem:[%s8905_s15 + $0xc8] sm:$0xff] (%p6004_p3) }
 0x50e   : > { %4642 = vst.msk [vmem:[%s8905_s15 + $0x1c0] sm:$0xff] %vm212_vm0, %v4578_v4  ;;  %4863 = vst [vmem:[%s9406_s7 + $0x168] sm:$0xff] (%p6004_p3), %v4862_v60  ;;  %v4868_v21 = vld [vmem:[%s8905_s15 + $0xd0] sm:$0xff] (%p6004_p3)  ;;  %v4870_v4 = vld [vmem:[%s8905_s15 + $0xd8] sm:$0xff] (%p6004_p3) }
 0x50f   : > { %4865 = vst [vmem:[%s9406_s7 + $0x180] sm:$0xff] (%p6004_p3), %v4864_v63  ;;  %4867 = vst [vmem:[%s9406_s7 + $0x188] sm:$0xff] (%p6004_p3), %v4866_v42 }
 0x510   : > { %4869 = vst [vmem:[%s9406_s7 + $0x1a0] sm:$0xff] (%p6004_p3), %v4868_v21  ;;  %4871 = vst [vmem:[%s9406_s7 + $0x1a8] sm:$0xff] (%p6004_p3), %v4870_v4 }
 0x514   : > { %v4930_v61 = vld [vmem:[%s8905_s15 + $0x1c8] sm:$0xff] (%p6004_p3) }
 0x515   : > { %v4928_v11 = vld [vmem:[%s8905_s15 + $0x1c0] sm:$0xff] (%p6004_p3)  ;;  %4931 = vst [vmem:[%s9406_s7 + $0x388] sm:$0xff] (%p6004_p3), %v4930_v61 }
 0x516   : > { %4929 = vst [vmem:[%s9406_s7 + $0x380] sm:$0xff] (%p6004_p3), %v4928_v11 }
 0x517   : > { %v4448_v13 = vpop.permute.xlu1 %4447 }
 0x518   : > { %v4581_v53 = vsel %vm4521_vm5, %v2460_v52, %v4448_v13  ;;  %v4446_v10 = vpop.permute.xlu0 %4445  ;;  %v4884_v52 = vld [vmem:[%s8905_s15 + $0x110] sm:$0xff] (%p6004_p3)  ;;  %v4888_v13 = vld [vmem:[%s8905_s15 + $0x120] sm:$0xff] (%p6004_p3) }
 0x519   : > { %4645 = vst.msk [vmem:[%s8905_s15 + $0x1d8] sm:$0xff] %vm212_vm0, %v4581_v53  ;;  %v4580_v56 = vsel %vm4521_vm5, %v2459_v38, %v4446_v10  ;;  %v4886_v38 = vld [vmem:[%s8905_s15 + $0x118] sm:$0xff] (%p6004_p3)  ;;  %4885 = vst [vmem:[%s9406_s7 + $0x220] sm:$0xff] (%p6004_p3), %v4884_v52  ;;  %v4890_v53 = vld [vmem:[%s8905_s15 + $0x128] sm:$0xff] (%p6004_p3) }
 0x51a   : > { %4644 = vst.msk [vmem:[%s8905_s15 + $0x1d0] sm:$0xff] %vm212_vm0, %v4580_v56  ;;  %4887 = vst [vmem:[%s9406_s7 + $0x228] sm:$0xff] (%p6004_p3), %v4886_v38  ;;  %v4892_v10 = vld [vmem:[%s8905_s15 + $0x130] sm:$0xff] (%p6004_p3)  ;;  %v4894_v56 = vld [vmem:[%s8905_s15 + $0x138] sm:$0xff] (%p6004_p3) }
 0x51b   : > { %4889 = vst [vmem:[%s9406_s7 + $0x240] sm:$0xff] (%p6004_p3), %v4888_v13  ;;  %4891 = vst [vmem:[%s9406_s7 + $0x248] sm:$0xff] (%p6004_p3), %v4890_v53 }
 0x51c   : > { %4893 = vst [vmem:[%s9406_s7 + $0x260] sm:$0xff] (%p6004_p3), %v4892_v10  ;;  %4895 = vst [vmem:[%s9406_s7 + $0x268] sm:$0xff] (%p6004_p3), %v4894_v56 }
 0x523   : > { %v4452_v45 = vpop.permute.xlu1 %4451 }
 0x524   : > { %v4583_v26 = vsel %vm4521_vm5, %v2462_v25, %v4452_v45  ;;  %v4450_v37 = vpop.permute.xlu0 %4449  ;;  %v4908_v25 = vld [vmem:[%s8905_s15 + $0x170] sm:$0xff] (%p6004_p3)  ;;  %v4912_v45 = vld [vmem:[%s8905_s15 + $0x180] sm:$0xff] (%p6004_p3) }
 0x525   : > { %4647 = vst.msk [vmem:[%s8905_s15 + $0x1e8] sm:$0xff] %vm212_vm0, %v4583_v26  ;;  %v4582_v62 = vsel %vm4521_vm5, %v2461_v0, %v4450_v37  ;;  %v4910_v0 = vld [vmem:[%s8905_s15 + $0x178] sm:$0xff] (%p6004_p3)  ;;  %4909 = vst [vmem:[%s9406_s7 + $0x2e0] sm:$0xff] (%p6004_p3), %v4908_v25  ;;  %v4914_v26 = vld [vmem:[%s8905_s15 + $0x188] sm:$0xff] (%p6004_p3) }
 0x526   : > { %4646 = vst.msk [vmem:[%s8905_s15 + $0x1e0] sm:$0xff] %vm212_vm0, %v4582_v62  ;;  %4911 = vst [vmem:[%s9406_s7 + $0x2e8] sm:$0xff] (%p6004_p3), %v4910_v0  ;;  %v4916_v37 = vld [vmem:[%s8905_s15 + $0x190] sm:$0xff] (%p6004_p3)  ;;  %v4918_v62 = vld [vmem:[%s8905_s15 + $0x198] sm:$0xff] (%p6004_p3) }
 0x527   : > { %4913 = vst [vmem:[%s9406_s7 + $0x300] sm:$0xff] (%p6004_p3), %v4912_v45  ;;  %4915 = vst [vmem:[%s9406_s7 + $0x308] sm:$0xff] (%p6004_p3), %v4914_v26 }
 0x528   : > { %4917 = vst [vmem:[%s9406_s7 + $0x320] sm:$0xff] (%p6004_p3), %v4916_v37  ;;  %4919 = vst [vmem:[%s9406_s7 + $0x328] sm:$0xff] (%p6004_p3), %v4918_v62 }
 0x52c   : > { %4656 = sbr.rel (!%p6004_p3) target bundleno = 1339 (0x53b), region = 40 }
 0x52f   : > { %v4456_v35 = vpop.permute.xlu1 %4455 }
 0x530   : > { %v4585_v22 = vsel %vm4521_vm5, %v2464_v16, %v4456_v35  ;;  %v4454_v23 = vpop.permute.xlu0 %4453  ;;  %v4932_v16 = vld [vmem:[%s8905_s15 + $0x1d0] sm:$0xff] (%p6004_p3)  ;;  %v4936_v35 = vld [vmem:[%s8905_s15 + $0x1e0] sm:$0xff] (%p6004_p3) }
 0x531   : > { %4649 = vst.msk [vmem:[%s8905_s15 + $0x1f8] sm:$0xff] %vm212_vm0, %v4585_v22  ;;  %v4584_v12 = vsel %vm4521_vm5, %v2463_v1, %v4454_v23  ;;  %v4934_v1 = vld [vmem:[%s8905_s15 + $0x1d8] sm:$0xff] (%p6004_p3)  ;;  %4933 = vst [vmem:[%s9406_s7 + $0x3a0] sm:$0xff] (%p6004_p3), %v4932_v16  ;;  %v4938_v22 = vld [vmem:[%s8905_s15 + $0x1e8] sm:$0xff] (%p6004_p3) }
 0x532   : > { %4648 = vst.msk [vmem:[%s8905_s15 + $0x1f0] sm:$0xff] %vm212_vm0, %v4584_v12  ;;  %4935 = vst [vmem:[%s9406_s7 + $0x3a8] sm:$0xff] (%p6004_p3), %v4934_v1 }
 0x533   : > { %4937 = vst [vmem:[%s9406_s7 + $0x3c0] sm:$0xff] %v4936_v35  ;;  %4939 = vst [vmem:[%s9406_s7 + $0x3c8] sm:$0xff] %v4938_v22 }
 0x538   : > { %v4942_v12 = vld [vmem:[%s8905_s15 + $0x1f8] sm:$0xff] }
 0x539   : > { %v4940_v23 = vld [vmem:[%s8905_s15 + $0x1f0] sm:$0xff]  ;;  %4943 = vst [vmem:[%s9406_s7 + $0x3e8] sm:$0xff] %v4942_v12 }
 0x53a   : > { %4941 = vst [vmem:[%s9406_s7 + $0x3e0] sm:$0xff] %v4940_v23 }
 0x53b PF: > { %s14_s19 = sadd.s32 1, %s5940_s19   ;;  %s9836_s15 = smov %s5928_s16 }
 0x53c   : > { %p11_p8 = scmp.ge.s32.totalorder %s14_s19, 4   ;;  %s9837_s16 = smov %s6013_s25 }
 0x53d   : > { %s9838_s17 = smov %s5936_s18  ;;  %s9839_s18 = smov %s9841_s21 }
 0x53e   :  { %13 = sbr.rel (!%p11_p8) target bundleno = 3 (0x3), region = 109 }

</bundles_post_ra>
